<compile_context>
chip_gen: v5e
topology: v5e:2x2
jax: 0.10.0
libtpu: 0.0.40
codegen_flags: <defaults>
</compile_context>

<pallas_src>
import functools

import jax
import jax.numpy as jnp
from jax import lax
from jax.experimental import pallas as pl
from jax.experimental.pallas import tpu as pltpu


# ----------------------------------------------------------------------------
# Graph structure (fixed by the module spec)
# ----------------------------------------------------------------------------
NODE_TYPES = ("Person", "Skill", "AI Agent")
TYPE_ORDER = NODE_TYPES                       # row-stacking / weight-column-block order

EDGE_TYPES = (
    ("Person", "has_skill", "Skill"),
    ("Skill", "rev_has_skill", "Person"),
    ("AI Agent", "offers_skill", "Skill"),
    ("Skill", "rev_offers_skill", "AI Agent"),
    ("Person", "link_prediction", "AI Agent"),
    ("AI Agent", "rev_link_prediction", "Person"),
)

# destination node type -> the two edge types feeding it (slot 0, slot 1)
DST_EDGE_TYPES = {
    "Skill": (("Person", "has_skill", "Skill"),
              ("AI Agent", "offers_skill", "Skill")),
    "Person": (("Skill", "rev_has_skill", "Person"),
               ("AI Agent", "rev_link_prediction", "Person")),
    "AI Agent": (("Skill", "rev_offers_skill", "AI Agent"),
                 ("Person", "link_prediction", "AI Agent")),
}

N_PAD = 128   # padded stacked node count (rows AND adjacency K-dim -> lane-dense)
F_PAD = 128   # padded feature / hidden width (lane-dense)
H_PAD = 128


# ----------------------------------------------------------------------------
# The single fused Pallas kernel: conv1 -> relu -> conv2 -> relu, all dst types stacked.
# 10 MXU matmuls total, everything VMEM-resident, bf16 operands / f32 accumulation.
# ----------------------------------------------------------------------------
def _fused_hetero_gnn_kernel(x_ref, a_ref, invd_ref, w_ref, b_ref, o_ref, *, bounds):
    b_person, b_skill, b_agent = bounds       # row-range boundaries in the stacked space

    # per-row destination-type masks (built in-kernel: no extra input DMA)
    rows = lax.broadcasted_iota(jnp.int32, (N_PAD, 1), 0)
    m0 = (rows < b_person).astype(jnp.float32)                          # Person rows
    m1 = ((rows >= b_person) & (rows < b_skill)).astype(jnp.float32)    # Skill rows
    m2 = ((rows >= b_skill) & (rows < b_agent)).astype(jnp.float32)     # AI Agent rows

    a1 = a_ref[0]                      # [128,128] bf16 integer edge counts, slot 0
    a2 = a_ref[1]                      # [128,128] bf16 integer edge counts, slot 1
    invd1 = invd_ref[:, 0:1]           # [128,1] f32 inverse in-degree, slot 0
    invd2 = invd_ref[:, 1:2]           # [128,1] f32 inverse in-degree, slot 1

    def layer(xb, l):
        # mean aggregation: exact integer counts on the MXU, f32 accumulate,
        # then one f32 per-row 1/deg scale before the single bf16 downcast.
        agg1 = (jnp.dot(a1, xb, preferred_element_type=jnp.float32) * invd1
                ).astype(jnp.bfloat16)
        agg2 = (jnp.dot(a2, xb, preferred_element_type=jnp.float32) * invd2
                ).astype(jnp.bfloat16)
        # merged projection as 3 accumulating matmuls (no lane concat); output columns
        # are blocked per destination type: [Person | Skill | AI Agent] x 128 lanes.
        y = jnp.dot(agg1, w_ref[3 * l + 0], preferred_element_type=jnp.float32)
        y = y + jnp.dot(agg2, w_ref[3 * l + 1], preferred_element_type=jnp.float32)
        y = y + jnp.dot(xb, w_ref[3 * l + 2], preferred_element_type=jnp.float32)
        # select each row's own type block (128-aligned static lane slices), add the
        # folded bias (b1+b2), HeteroConv 'sum' already folded into the weights/bias.
        out = (m0 * (y[:, 0:128] + b_ref[3 * l + 0])
               + m1 * (y[:, 128:256] + b_ref[3 * l + 1])
               + m2 * (y[:, 256:384] + b_ref[3 * l + 2]))
        return jnp.maximum(out, 0.0)                                    # ReLU

    h1 = layer(x_ref[...], 0)                      # conv1 + relu (stays in VMEM/vregs)
    h2 = layer(h1.astype(jnp.bfloat16), 1)         # conv2 + relu
    o_ref[...] = h2.astype(o_ref.dtype)            # bf16, full 128-lane store


@functools.partial(jax.jit, static_argnames=("bounds",))
def fused_forward(x_all, a_all, invd, w_all, b_all, *, bounds):
    vmem = pl.BlockSpec(memory_space=pltpu.MemorySpace.VMEM)
    return pl.pallas_call(
        functools.partial(_fused_hetero_gnn_kernel, bounds=bounds),
        out_shape=jax.ShapeDtypeStruct((N_PAD, H_PAD), jnp.bfloat16),
        in_specs=[vmem] * 5,
        out_specs=vmem,
        compiler_params=pltpu.CompilerParams(vmem_limit_bytes=32 * 1024 * 1024),
    )(x_all, a_all, invd, w_all, b_all)


def hetero_gnn_forward(x_all, a_all, invd, w_all, b_all, *, bounds, hidden, n_nodes):
    out = fused_forward(x_all, a_all, invd, w_all, b_all, bounds=bounds)
    # slice stacked rows back per node type, columns back to hidden, cast outside kernel
    res, off = {}, 0
    for nt in TYPE_ORDER:
        n = n_nodes[nt]
        res[nt] = out[off:off + n, :hidden].astype(jnp.float32)
        off += n
    return res


# ----------------------------------------------------------------------------
# Glue: one-time graph / parameter packing (outside the per-forward path)
# ----------------------------------------------------------------------------
def build_offsets(n_nodes):
    off, o = {}, 0
    for nt in TYPE_ORDER:
        off[nt] = o
        o += n_nodes[nt]
    assert o <= N_PAD
    return off, o


def build_stacked_features(x_dict, off):
    x = jnp.zeros((N_PAD, F_PAD), jnp.float32)
    for nt in TYPE_ORDER:
        xi = x_dict[nt]
        x = x.at[off[nt]:off[nt] + xi.shape[0], :xi.shape[1]].set(xi)
    return x.astype(jnp.bfloat16)


def build_stacked_adjacency(edge_index_dict, off):
    """Two 'slot' adjacencies over the stacked node space, kept as INTEGER edge counts
    (exact in bf16), plus f32 inverse in-degrees for the mean normalization."""
    a = jnp.zeros((2, N_PAD, N_PAD), jnp.float32)
    for dst, ets in DST_EDGE_TYPES.items():
        for s, et in enumerate(ets):
            src_t = et[0]
            ei = edge_index_dict[et]
            a = a.at[s, off[dst] + ei[1], off[src_t] + ei[0]].add(1.0)
    deg = a.sum(axis=2)                                     # [2, N_PAD]
    invd = (1.0 / jnp.maximum(deg, 1.0)).T                  # [N_PAD, 2] f32
    return a.astype(jnp.bfloat16), invd


def init_sage(key, in_src, in_dst, hidden):
    k1, k2, k3 = jax.random.split(key, 3)
    wl = jax.random.normal(k1, (hidden, in_src), jnp.float32) * 0.1   # lin_l weight
    bl = jax.random.normal(k2, (hidden,), jnp.float32) * 0.1          # lin_l bias
    wr = jax.random.normal(k3, (hidden, in_dst), jnp.float32) * 0.1   # lin_r weight (no bias)
    return wl, bl, wr


def init_hetero_layer(key, in_dims, hidden):
    params = {}
    keys = jax.random.split(key, len(EDGE_TYPES))
    for k, et in zip(keys, EDGE_TYPES):
        s, _, d = et
        params[et] = init_sage(k, in_dims[s], in_dims[d], hidden)
    return params


def pack_params(params_layers, in_dims_layers, hidden):
    """Column-block the per-destination-type weights:
         w_all[3*l + s][:, t*128:(t+1)*128]  = slot-s weight^T of dst type t, layer l
           slot 0: lin_l of edge type 1, slot 1: lin_l of edge type 2,
           slot 2: lin_r(edge1) + lin_r(edge2)   (HeteroConv 'sum' folded)
         b_all[3*l + t] = (b_edge1 + b_edge2) of dst type t, layer l."""
    w_all = jnp.zeros((6, F_PAD, 3 * H_PAD), jnp.float32)
    b_all = jnp.zeros((6, 1, H_PAD), jnp.float32)
    for l, (params, in_dims) in enumerate(zip(params_layers, in_dims_layers)):
        for t, dst in enumerate(TYPE_ORDER):
            et1, et2 = DST_EDGE_TYPES[dst]
            wl1, b1, wr1 = params[et1]
            wl2, b2, wr2 = params[et2]
            slot_ws = ((wl1, in_dims[et1[0]]),
                       (wl2, in_dims[et2[0]]),
                       (wr1 + wr2, in_dims[dst]))
            for s, (w, in_dim) in enumerate(slot_ws):
                w_all = w_all.at[3 * l + s, :in_dim,
                                 t * H_PAD:t * H_PAD + hidden].set(w.T)
            b_all = b_all.at[3 * l + t, 0, :hidden].set(b1 + b2)
    return w_all.astype(jnp.bfloat16), b_all


def norm_adjacency(edge_index, n_src, n_dst):
    """Dense row-normalized adjacency for the pure-JAX f32 reference."""
    src, dst = edge_index[0], edge_index[1]
    a = jnp.zeros((n_dst, n_src), jnp.float32).at[dst, src].add(1.0)
    deg = a.sum(axis=1, keepdims=True)
    return a / jnp.maximum(deg, 1.0)


def reference_forward(x_dict, adj_dict, params1, params2):
    """Pure-JAX f32 reference with exact PyG SAGEConv / HeteroConv('sum') semantics."""
    def layer(x, params):
        out = {}
        for dst, (et1, et2) in DST_EDGE_TYPES.items():
            wl1, b1, wr1 = params[et1]
            wl2, b2, wr2 = params[et2]
            agg1 = adj_dict[et1] @ x[et1[0]]
            agg2 = adj_dict[et2] @ x[et2[0]]
            o = (agg1 @ wl1.T + b1 + x[dst] @ wr1.T) + (agg2 @ wl2.T + b2 + x[dst] @ wr2.T)
            out[dst] = jnp.maximum(o, 0.0)
        return out
    x = layer(x_dict, params1)
    x = layer(x, params2)
    return x


# ----------------------------------------------------------------------------
if __name__ == "__main__":
    key = jax.random.PRNGKey(0)
    hidden = 32

    n_nodes = {"Person": 8, "Skill": 16, "AI Agent": 8}
    feat_dims = {"Person": 16, "Skill": 12, "AI Agent": 24}

    kx, ke, kp1, kp2, klin = jax.random.split(key, 5)

    # node features (f32 originals for the reference, stacked bf16 for the kernel)
    xkeys = jax.random.split(kx, len(NODE_TYPES))
    x_dict = {nt: jax.random.normal(k, (n_nodes[nt], feat_dims[nt]), jnp.float32)
              for nt, k in zip(NODE_TYPES, xkeys)}

    # forward edges (COO [2, E]); reverse edge types are the flipped forward edges
    def make_edges(k, n_src, n_dst, n_edges):
        k1, k2 = jax.random.split(k)
        src = jax.random.randint(k1, (n_edges,), 0, n_src)
        dst = jax.random.randint(k2, (n_edges,), 0, n_dst)
        return jnp.stack([src, dst])

    ek1, ek2, ek3 = jax.random.split(ke, 3)
    edge_index_dict = {}
    edge_index_dict[("Person", "has_skill", "Skill")] = make_edges(
        ek1, n_nodes["Person"], n_nodes["Skill"], 24)
    edge_index_dict[("AI Agent", "offers_skill", "Skill")] = make_edges(
        ek2, n_nodes["AI Agent"], n_nodes["Skill"], 20)
    edge_index_dict[("Person", "link_prediction", "AI Agent")] = make_edges(
        ek3, n_nodes["Person"], n_nodes["AI Agent"], 16)
    edge_index_dict[("Skill", "rev_has_skill", "Person")] = \
        edge_index_dict[("Person", "has_skill", "Skill")][::-1]
    edge_index_dict[("Skill", "rev_offers_skill", "AI Agent")] = \
        edge_index_dict[("AI Agent", "offers_skill", "Skill")][::-1]
    edge_index_dict[("AI Agent", "rev_link_prediction", "Person")] = \
        edge_index_dict[("Person", "link_prediction", "AI Agent")][::-1]

    # stacked / packed kernel inputs (built once)
    off, n_total = build_offsets(n_nodes)
    bounds = (off["Person"] + n_nodes["Person"],
              off["Skill"] + n_nodes["Skill"],
              off["AI Agent"] + n_nodes["AI Agent"])
    x_all = build_stacked_features(x_dict, off)
    a_all, invd = build_stacked_adjacency(edge_index_dict, off)

    # parameters (deterministic init), column-blocked / merged / padded once
    params1 = init_hetero_layer(kp1, feat_dims, hidden)                      # conv1
    hid_dims = {nt: hidden for nt in NODE_TYPES}
    params2 = init_hetero_layer(kp2, hid_dims, hidden)                       # conv2
    w_all, b_all = pack_params((params1, params2), (feat_dims, hid_dims), hidden)
    lin_w = jax.random.normal(klin, (1, hidden), jnp.float32) * 0.1
    # TODO(synk): `self.lin` is never called in the reference forward(); kept only for parity.

    # fused Pallas forward (single pallas_call, 5 inputs, 1 output)
    out = hetero_gnn_forward(x_all, a_all, invd, w_all, b_all,
                             bounds=bounds, hidden=hidden, n_nodes=n_nodes)
    out = jax.block_until_ready(out)

    # pure-JAX f32 reference (bf16 kernel operands -> loose tolerance)
    adj_f32 = {et: norm_adjacency(ei, n_nodes[et[0]], n_nodes[et[2]])
               for et, ei in edge_index_dict.items()}
    ref = reference_forward(x_dict, adj_f32, params1, params2)

    for nt in NODE_TYPES:
        assert out[nt].shape == (n_nodes[nt], hidden)
        assert bool(jnp.all(out[nt] >= 0.0))
        assert bool(jnp.all(jnp.isfinite(out[nt])))
        assert bool(jnp.allclose(out[nt], ref[nt], rtol=3e-2, atol=3e-2)), nt

    print("KERNEL_OK")
</pallas_src>

<mosaic_0001>
module attributes {stable_mosaic.version = 11 : i64} {
  func.func @_fused_hetero_gnn_kernel(%arg0: memref<128x128xbf16, #tpu.memory_space<vmem>>, %arg1: memref<2x128x128xbf16, #tpu.memory_space<vmem>>, %arg2: memref<128x2xf32, #tpu.memory_space<vmem>>, %arg3: memref<6x128x384xbf16, #tpu.memory_space<vmem>>, %arg4: memref<6x1x128xf32, #tpu.memory_space<vmem>>, %arg5: memref<128x128xbf16, #tpu.memory_space<vmem>>) attributes {dimension_semantics = [], scalar_prefetch = 0 : i64, scratch_operands = 0 : i64, tpu.core_type = #tpu.core_type<tc>} {
    %0 = tpu.iota {dimensions = array<i32: 0>} : vector<128x1xi32>
    %c8_i32 = arith.constant 8 : i32
    %1 = vector.broadcast %c8_i32 : i32 to vector<128x1xi32>
    %2 = arith.cmpi slt, %0, %1 : vector<128x1xi32>
    %3 = arith.extui %2 : vector<128x1xi1> to vector<128x1xi32>
    %4 = arith.sitofp %3 : vector<128x1xi32> to vector<128x1xf32>
    %c8_i32_0 = arith.constant 8 : i32
    %5 = vector.broadcast %c8_i32_0 : i32 to vector<128x1xi32>
    %6 = arith.cmpi sge, %0, %5 : vector<128x1xi32>
    %c24_i32 = arith.constant 24 : i32
    %7 = vector.broadcast %c24_i32 : i32 to vector<128x1xi32>
    %8 = arith.cmpi slt, %0, %7 : vector<128x1xi32>
    %9 = arith.andi %6, %8 : vector<128x1xi1>
    %10 = arith.extui %9 : vector<128x1xi1> to vector<128x1xi32>
    %11 = arith.sitofp %10 : vector<128x1xi32> to vector<128x1xf32>
    %c24_i32_1 = arith.constant 24 : i32
    %12 = vector.broadcast %c24_i32_1 : i32 to vector<128x1xi32>
    %13 = arith.cmpi sge, %0, %12 : vector<128x1xi32>
    %c32_i32 = arith.constant 32 : i32
    %14 = vector.broadcast %c32_i32 : i32 to vector<128x1xi32>
    %15 = arith.cmpi slt, %0, %14 : vector<128x1xi32>
    %16 = arith.andi %13, %15 : vector<128x1xi1>
    %17 = arith.extui %16 : vector<128x1xi1> to vector<128x1xi32>
    %18 = arith.sitofp %17 : vector<128x1xi32> to vector<128x1xf32>
    %c0 = arith.constant 0 : index
    %c0_2 = arith.constant 0 : index
    %c0_3 = arith.constant 0 : index
    %19 = vector.load %arg1[%c0, %c0_2, %c0_3] : memref<2x128x128xbf16, #tpu.memory_space<vmem>>, vector<1x128x128xbf16>
    %20 = vector.shape_cast %19 : vector<1x128x128xbf16> to vector<128x128xbf16>
    %c1 = arith.constant 1 : index
    %c0_4 = arith.constant 0 : index
    %c0_5 = arith.constant 0 : index
    %21 = vector.load %arg1[%c1, %c0_4, %c0_5] : memref<2x128x128xbf16, #tpu.memory_space<vmem>>, vector<1x128x128xbf16>
    %22 = vector.shape_cast %21 : vector<1x128x128xbf16> to vector<128x128xbf16>
    %c0_6 = arith.constant 0 : index
    %c0_7 = arith.constant 0 : index
    %23 = vector.load %arg2[%c0_6, %c0_7] : memref<128x2xf32, #tpu.memory_space<vmem>>, vector<128x1xf32>
    %c0_8 = arith.constant 0 : index
    %c1_9 = arith.constant 1 : index
    %24 = vector.load %arg2[%c0_8, %c1_9] : memref<128x2xf32, #tpu.memory_space<vmem>>, vector<128x1xf32>
    %c0_10 = arith.constant 0 : index
    %c0_11 = arith.constant 0 : index
    %25 = vector.load %arg0[%c0_10, %c0_11] : memref<128x128xbf16, #tpu.memory_space<vmem>>, vector<128x128xbf16>
    %cst = arith.constant dense<0.000000e+00> : vector<128x128xf32>
    %26 = tpu.matmul %20, %25, %cst {dimension_numbers = #tpu.dot_dimension_numbers<[1], [0], [0], [1], [0, 0, 1, 1], [], []>} : vector<128x128xbf16>, vector<128x128xbf16>, vector<128x128xf32> -> vector<128x128xf32>
    %27 = vector.broadcast %23 : vector<128x1xf32> to vector<128x128xf32>
    %28 = arith.mulf %26, %27 : vector<128x128xf32>
    %29 = arith.truncf %28 : vector<128x128xf32> to vector<128x128xbf16>
    %cst_12 = arith.constant dense<0.000000e+00> : vector<128x128xf32>
    %30 = tpu.matmul %22, %25, %cst_12 {dimension_numbers = #tpu.dot_dimension_numbers<[1], [0], [0], [1], [0, 0, 1, 1], [], []>} : vector<128x128xbf16>, vector<128x128xbf16>, vector<128x128xf32> -> vector<128x128xf32>
    %31 = vector.broadcast %24 : vector<128x1xf32> to vector<128x128xf32>
    %32 = arith.mulf %30, %31 : vector<128x128xf32>
    %33 = arith.truncf %32 : vector<128x128xf32> to vector<128x128xbf16>
    %c0_13 = arith.constant 0 : index
    %c0_14 = arith.constant 0 : index
    %c0_15 = arith.constant 0 : index
    %34 = vector.load %arg3[%c0_13, %c0_14, %c0_15] : memref<6x128x384xbf16, #tpu.memory_space<vmem>>, vector<1x128x384xbf16>
    %35 = vector.shape_cast %34 : vector<1x128x384xbf16> to vector<128x384xbf16>
    %cst_16 = arith.constant dense<0.000000e+00> : vector<128x384xf32>
    %36 = tpu.matmul %29, %35, %cst_16 {dimension_numbers = #tpu.dot_dimension_numbers<[1], [0], [0], [1], [0, 0, 1, 1], [], []>} : vector<128x128xbf16>, vector<128x384xbf16>, vector<128x384xf32> -> vector<128x384xf32>
    %c1_17 = arith.constant 1 : index
    %c0_18 = arith.constant 0 : index
    %c0_19 = arith.constant 0 : index
    %37 = vector.load %arg3[%c1_17, %c0_18, %c0_19] : memref<6x128x384xbf16, #tpu.memory_space<vmem>>, vector<1x128x384xbf16>
    %38 = vector.shape_cast %37 : vector<1x128x384xbf16> to vector<128x384xbf16>
    %cst_20 = arith.constant dense<0.000000e+00> : vector<128x384xf32>
    %39 = tpu.matmul %33, %38, %cst_20 {dimension_numbers = #tpu.dot_dimension_numbers<[1], [0], [0], [1], [0, 0, 1, 1], [], []>} : vector<128x128xbf16>, vector<128x384xbf16>, vector<128x384xf32> -> vector<128x384xf32>
    %40 = arith.addf %36, %39 : vector<128x384xf32>
    %c2 = arith.constant 2 : index
    %c0_21 = arith.constant 0 : index
    %c0_22 = arith.constant 0 : index
    %41 = vector.load %arg3[%c2, %c0_21, %c0_22] : memref<6x128x384xbf16, #tpu.memory_space<vmem>>, vector<1x128x384xbf16>
    %42 = vector.shape_cast %41 : vector<1x128x384xbf16> to vector<128x384xbf16>
    %cst_23 = arith.constant dense<0.000000e+00> : vector<128x384xf32>
    %43 = tpu.matmul %25, %42, %cst_23 {dimension_numbers = #tpu.dot_dimension_numbers<[1], [0], [0], [1], [0, 0, 1, 1], [], []>} : vector<128x128xbf16>, vector<128x384xbf16>, vector<128x384xf32> -> vector<128x384xf32>
    %44 = arith.addf %40, %43 : vector<128x384xf32>
    %45 = vector.extract_strided_slice %44 {offsets = [0, 0], sizes = [128, 128], strides = [1, 1]} : vector<128x384xf32> to vector<128x128xf32>
    %c0_24 = arith.constant 0 : index
    %c0_25 = arith.constant 0 : index
    %c0_26 = arith.constant 0 : index
    %46 = vector.load %arg4[%c0_24, %c0_25, %c0_26] : memref<6x1x128xf32, #tpu.memory_space<vmem>>, vector<1x1x128xf32>
    %47 = vector.shape_cast %46 : vector<1x1x128xf32> to vector<1x128xf32>
    %48 = vector.broadcast %47 : vector<1x128xf32> to vector<128x128xf32>
    %49 = arith.addf %45, %48 : vector<128x128xf32>
    %50 = vector.broadcast %4 : vector<128x1xf32> to vector<128x128xf32>
    %51 = arith.mulf %50, %49 : vector<128x128xf32>
    %52 = vector.extract_strided_slice %44 {offsets = [0, 128], sizes = [128, 128], strides = [1, 1]} : vector<128x384xf32> to vector<128x128xf32>
    %c1_27 = arith.constant 1 : index
    %c0_28 = arith.constant 0 : index
    %c0_29 = arith.constant 0 : index
    %53 = vector.load %arg4[%c1_27, %c0_28, %c0_29] : memref<6x1x128xf32, #tpu.memory_space<vmem>>, vector<1x1x128xf32>
    %54 = vector.shape_cast %53 : vector<1x1x128xf32> to vector<1x128xf32>
    %55 = vector.broadcast %54 : vector<1x128xf32> to vector<128x128xf32>
    %56 = arith.addf %52, %55 : vector<128x128xf32>
    %57 = vector.broadcast %11 : vector<128x1xf32> to vector<128x128xf32>
    %58 = arith.mulf %57, %56 : vector<128x128xf32>
    %59 = arith.addf %51, %58 : vector<128x128xf32>
    %60 = vector.extract_strided_slice %44 {offsets = [0, 256], sizes = [128, 128], strides = [1, 1]} : vector<128x384xf32> to vector<128x128xf32>
    %c2_30 = arith.constant 2 : index
    %c0_31 = arith.constant 0 : index
    %c0_32 = arith.constant 0 : index
    %61 = vector.load %arg4[%c2_30, %c0_31, %c0_32] : memref<6x1x128xf32, #tpu.memory_space<vmem>>, vector<1x1x128xf32>
    %62 = vector.shape_cast %61 : vector<1x1x128xf32> to vector<1x128xf32>
    %63 = vector.broadcast %62 : vector<1x128xf32> to vector<128x128xf32>
    %64 = arith.addf %60, %63 : vector<128x128xf32>
    %65 = vector.broadcast %18 : vector<128x1xf32> to vector<128x128xf32>
    %66 = arith.mulf %65, %64 : vector<128x128xf32>
    %67 = arith.addf %59, %66 : vector<128x128xf32>
    %cst_33 = arith.constant 0.000000e+00 : f32
    %68 = vector.broadcast %cst_33 : f32 to vector<128x128xf32>
    %69 = arith.maximumf %67, %68 : vector<128x128xf32>
    %70 = arith.truncf %69 : vector<128x128xf32> to vector<128x128xbf16>
    %cst_34 = arith.constant dense<0.000000e+00> : vector<128x128xf32>
    %71 = tpu.matmul %20, %70, %cst_34 {dimension_numbers = #tpu.dot_dimension_numbers<[1], [0], [0], [1], [0, 0, 1, 1], [], []>} : vector<128x128xbf16>, vector<128x128xbf16>, vector<128x128xf32> -> vector<128x128xf32>
    %72 = vector.broadcast %23 : vector<128x1xf32> to vector<128x128xf32>
    %73 = arith.mulf %71, %72 : vector<128x128xf32>
    %74 = arith.truncf %73 : vector<128x128xf32> to vector<128x128xbf16>
    %cst_35 = arith.constant dense<0.000000e+00> : vector<128x128xf32>
    %75 = tpu.matmul %22, %70, %cst_35 {dimension_numbers = #tpu.dot_dimension_numbers<[1], [0], [0], [1], [0, 0, 1, 1], [], []>} : vector<128x128xbf16>, vector<128x128xbf16>, vector<128x128xf32> -> vector<128x128xf32>
    %76 = vector.broadcast %24 : vector<128x1xf32> to vector<128x128xf32>
    %77 = arith.mulf %75, %76 : vector<128x128xf32>
    %78 = arith.truncf %77 : vector<128x128xf32> to vector<128x128xbf16>
    %c3 = arith.constant 3 : index
    %c0_36 = arith.constant 0 : index
    %c0_37 = arith.constant 0 : index
    %79 = vector.load %arg3[%c3, %c0_36, %c0_37] : memref<6x128x384xbf16, #tpu.memory_space<vmem>>, vector<1x128x384xbf16>
    %80 = vector.shape_cast %79 : vector<1x128x384xbf16> to vector<128x384xbf16>
    %cst_38 = arith.constant dense<0.000000e+00> : vector<128x384xf32>
    %81 = tpu.matmul %74, %80, %cst_38 {dimension_numbers = #tpu.dot_dimension_numbers<[1], [0], [0], [1], [0, 0, 1, 1], [], []>} : vector<128x128xbf16>, vector<128x384xbf16>, vector<128x384xf32> -> vector<128x384xf32>
    %c4 = arith.constant 4 : index
    %c0_39 = arith.constant 0 : index
    %c0_40 = arith.constant 0 : index
    %82 = vector.load %arg3[%c4, %c0_39, %c0_40] : memref<6x128x384xbf16, #tpu.memory_space<vmem>>, vector<1x128x384xbf16>
    %83 = vector.shape_cast %82 : vector<1x128x384xbf16> to vector<128x384xbf16>
    %cst_41 = arith.constant dense<0.000000e+00> : vector<128x384xf32>
    %84 = tpu.matmul %78, %83, %cst_41 {dimension_numbers = #tpu.dot_dimension_numbers<[1], [0], [0], [1], [0, 0, 1, 1], [], []>} : vector<128x128xbf16>, vector<128x384xbf16>, vector<128x384xf32> -> vector<128x384xf32>
    %85 = arith.addf %81, %84 : vector<128x384xf32>
    %c5 = arith.constant 5 : index
    %c0_42 = arith.constant 0 : index
    %c0_43 = arith.constant 0 : index
    %86 = vector.load %arg3[%c5, %c0_42, %c0_43] : memref<6x128x384xbf16, #tpu.memory_space<vmem>>, vector<1x128x384xbf16>
    %87 = vector.shape_cast %86 : vector<1x128x384xbf16> to vector<128x384xbf16>
    %cst_44 = arith.constant dense<0.000000e+00> : vector<128x384xf32>
    %88 = tpu.matmul %70, %87, %cst_44 {dimension_numbers = #tpu.dot_dimension_numbers<[1], [0], [0], [1], [0, 0, 1, 1], [], []>} : vector<128x128xbf16>, vector<128x384xbf16>, vector<128x384xf32> -> vector<128x384xf32>
    %89 = arith.addf %85, %88 : vector<128x384xf32>
    %90 = vector.extract_strided_slice %89 {offsets = [0, 0], sizes = [128, 128], strides = [1, 1]} : vector<128x384xf32> to vector<128x128xf32>
    %c3_45 = arith.constant 3 : index
    %c0_46 = arith.constant 0 : index
    %c0_47 = arith.constant 0 : index
    %91 = vector.load %arg4[%c3_45, %c0_46, %c0_47] : memref<6x1x128xf32, #tpu.memory_space<vmem>>, vector<1x1x128xf32>
    %92 = vector.shape_cast %91 : vector<1x1x128xf32> to vector<1x128xf32>
    %93 = vector.broadcast %92 : vector<1x128xf32> to vector<128x128xf32>
    %94 = arith.addf %90, %93 : vector<128x128xf32>
    %95 = vector.broadcast %4 : vector<128x1xf32> to vector<128x128xf32>
    %96 = arith.mulf %95, %94 : vector<128x128xf32>
    %97 = vector.extract_strided_slice %89 {offsets = [0, 128], sizes = [128, 128], strides = [1, 1]} : vector<128x384xf32> to vector<128x128xf32>
    %c4_48 = arith.constant 4 : index
    %c0_49 = arith.constant 0 : index
    %c0_50 = arith.constant 0 : index
    %98 = vector.load %arg4[%c4_48, %c0_49, %c0_50] : memref<6x1x128xf32, #tpu.memory_space<vmem>>, vector<1x1x128xf32>
    %99 = vector.shape_cast %98 : vector<1x1x128xf32> to vector<1x128xf32>
    %100 = vector.broadcast %99 : vector<1x128xf32> to vector<128x128xf32>
    %101 = arith.addf %97, %100 : vector<128x128xf32>
    %102 = vector.broadcast %11 : vector<128x1xf32> to vector<128x128xf32>
    %103 = arith.mulf %102, %101 : vector<128x128xf32>
    %104 = arith.addf %96, %103 : vector<128x128xf32>
    %105 = vector.extract_strided_slice %89 {offsets = [0, 256], sizes = [128, 128], strides = [1, 1]} : vector<128x384xf32> to vector<128x128xf32>
    %c5_51 = arith.constant 5 : index
    %c0_52 = arith.constant 0 : index
    %c0_53 = arith.constant 0 : index
    %106 = vector.load %arg4[%c5_51, %c0_52, %c0_53] : memref<6x1x128xf32, #tpu.memory_space<vmem>>, vector<1x1x128xf32>
    %107 = vector.shape_cast %106 : vector<1x1x128xf32> to vector<1x128xf32>
    %108 = vector.broadcast %107 : vector<1x128xf32> to vector<128x128xf32>
    %109 = arith.addf %105, %108 : vector<128x128xf32>
    %110 = vector.broadcast %18 : vector<128x1xf32> to vector<128x128xf32>
    %111 = arith.mulf %110, %109 : vector<128x128xf32>
    %112 = arith.addf %104, %111 : vector<128x128xf32>
    %cst_54 = arith.constant 0.000000e+00 : f32
    %113 = vector.broadcast %cst_54 : f32 to vector<128x128xf32>
    %114 = arith.maximumf %112, %113 : vector<128x128xf32>
    %115 = arith.truncf %114 : vector<128x128xf32> to vector<128x128xbf16>
    %c0_55 = arith.constant 0 : index
    %c0_56 = arith.constant 0 : index
    %116 = vector.load %arg5[%c0_55, %c0_56] : memref<128x128xbf16, #tpu.memory_space<vmem>>, vector<128x128xbf16>
    tpu.vector_store %arg5[%c0_55, %c0_56], %115 {strides = array<i32>} : memref<128x128xbf16, #tpu.memory_space<vmem>>, vector<128x128xbf16>,
    return
  }
}

</mosaic_0001>

<bundles_post_ra>
// kernel: fused_forward.1
= control target key start
LH: loop header
LB: loop body
LE: loop exit
PB: predicated region body
PF: predicated region fallthrough
CT: control target
= control target key end

     0   :  { %10 = vsyncpa [#allocation3], 0  ;;  %s5406_s0 = inlined_call_operand.hbm [shape: bf16[128,128], index: 0, kind: input, shape index: {}]   ;;  %s5407_s1 = inlined_call_operand.vmem [shape: bf16[2,128,128], index: 1, kind: input, shape index: {}]   ;;  %s5408_s2 = inlined_call_operand.vmem [shape: f32[128,2], index: 2, kind: input, shape index: {}]   ;;  %s5409_s3 = inlined_call_operand.hbm [shape: bf16[6,128,384], index: 3, kind: input, shape index: {}]   ;;  %s5410_s4 = inlined_call_operand.hbm [shape: f32[6,1,128], index: 4, kind: input, shape index: {}]   ;;  %s5411_s5 = inlined_call_operand.hbm [shape: bf16[128,128], index: 5, kind: output, shape index: {}]  }
   0x1   :  { %11 = vsyncpa [#allocation6], 0  ;;  %s34_s20 = sshll.u32 %s5409_s3, 4  ;;  %s35_s20 = int_to_ptr.hbm [resolvable:$true] %s34_s20 }
   0x2   :  { %12 = vsyncpa [#allocation4], 0  ;;  %s4328_s21 = smov [#allocation5]   ;;  %s17_s25 = sshll.u32 %s5406_s0, 4  ;;  %s18_s25 = int_to_ptr.hbm [resolvable:$true] %s17_s25 }
   0x3   :  { %s36_s22 = sshll.u32 %s4328_s21, 4  ;;  %s4329_s26 = smov 192   ;;  %s37_s22 = int_to_ptr.vmem [resolvable:$true] %s36_s22 }
   0x4   :  { %s4330_s27 = smov 12   ;;  %s4331_s28 = smov [#allocation2]  }
   0x5   :  { %42 = dma.hbm_to_vmem [thread:$0]  %s35_s20, 18432, %s37_s22, [#allocation6], %s4329_s26, %s4329_s26, %s4330_s27  }
   0x6   :  { %s19_s29 = sshll.u32 %s4331_s28, 4  ;;  %s4332_s30 = smov 64   ;;  %s20_s29 = int_to_ptr.vmem [resolvable:$true] %s19_s29 }
   0x7   :  { %s4333_s6 = smov 4   ;;  %s47_s8 = sshll.u32 %s5410_s4, 4  ;;  %s48_s8 = int_to_ptr.hbm [resolvable:$true] %s47_s8 }
   0x8   :  { %25 = dma.hbm_to_vmem [thread:$0]  %s18_s25, 1024, %s20_s29, [#allocation3], %s4332_s30, %s4332_s30, %s4333_s6  }
   0x9   :  { %s4334_s9 = smov [#allocation7]   ;;  %s4335_s10 = smov 16  }
   0xa   :  { %s49_s0 = sshll.u32 %s4334_s9, 4  ;;  %s4336_s11 = smov 1   ;;  %s50_s0 = int_to_ptr.vmem [resolvable:$true] %s49_s0 }
   0xb   :  { %55 = dma.hbm_to_vmem [thread:$0]  %s48_s8, 96, %s50_s0, [#allocation6], %s4335_s10, %s4335_s10, %s4336_s11  }
   0xc   :  { %4322 = dma.done.wait [#allocation3], 1024  }
   0xd   :  { %4323 = vsyncadd [#allocation3], 4294966272 }
   0xe   :  { %4324 = dma.done.wait [#allocation6], 18528  }
   0xf   :  { %4325 = vsyncadd [#allocation6], 4294948768  ;;  %v4337_v0 = vmov 1   ;;  %v3969_v1 = vld [vmem:[#allocation2 + $0x38] sm:$0xff]  ;;  %v4388_v2 = vld [vmem:[%s5408_s2] sm:$0xff]  ;;  %v4338_v28 = vmov 0  }
  0x10   :  { %4189 = vset.pattern.permute.xlu0 %v4337_v0  ;;  %4190 = vset.pattern.permute.xlu1 %v4337_v0  ;;  %v4394_v3 = vld [vmem:[%s5408_s2 + $0x10] sm:$0xff]  ;;  %v3967_v5 = vld [vmem:[#allocation2 + $0x28] sm:$0xff]  ;;  %v4405_v7 = vld [vmem:[%s5408_s2 + $0x20] sm:$0xff]  ;;  %s3244_s29 = sshll.u32 %s5411_s5, 4  ;;  %s3245_s29 = int_to_ptr.hbm [resolvable:$true] %s3244_s29 }
  0x11   :  { %4191 = vset.pattern.permute.xlu2 %v4337_v0  ;;  %705 = vperm.xlu0 %4189, %v4388_v2   ;;  %v3968_v4 = vld [vmem:[#allocation2 + $0x30] sm:$0xff]  ;;  %v4400_v6 = vld [vmem:[%s5408_s2 + $0x8] sm:$0xff]  ;;  %v4410_v8 = vld [vmem:[%s5408_s2 + $0x18] sm:$0xff] }
  0x12   :  { %454 = vmatpush.bf16.msra.mxu0 %v3969_v1  ;;  %655 = vmatpush.bf16.msra.mxu1 %v3969_v1  ;;  %v3966_v9 = vld [vmem:[#allocation2 + $0x20] sm:$0xff]  ;;  %v4418_v10 = vld [vmem:[%s5408_s2 + $0x28] sm:$0xff]  ;;  %v3965_v11 = vld [vmem:[#allocation2 + $0x18] sm:$0xff] }
  0x13   :  { %4169 = vmatpush.bf16.msra.mxu3 %v3969_v1  ;;  %713 = vperm.xlu1 %4190, %v4394_v3   ;;  %v4423_v12 = vld [vmem:[%s5408_s2 + $0x30] sm:$0xff]  ;;  %v333_v13 = vld [vmem:[%s5408_s2 + $0x38] sm:$0xff]  ;;  %v4433_v15 = vld [vmem:[%s5408_s2 + $0x40] sm:$0xff] }
  0x14   :  { %4161 = vmatpush.bf16.msra.mxu2 %v3969_v1  ;;  %721 = vperm.xlu2 %4191, %v4405_v7   ;;  %v3964_v14 = vld [vmem:[#allocation2 + $0x10] sm:$0xff]  ;;  %v4435_v16 = vld [vmem:[#allocation2 + $0x8] sm:$0xff]  ;;  %v4446_v19 = vld [vmem:[#allocation2] sm:$0xff] }
  0x15   :  { %v335_v17 = vld [vmem:[%s5408_s2 + $0x48] sm:$0xff]  ;;  %v336_v18 = vld [vmem:[%s5408_s2 + $0x50] sm:$0xff]  ;;  %v337_v20 = vld [vmem:[%s5408_s2 + $0x58] sm:$0xff] }
  0x16   :  { %455 = vmatpush.bf16.msra.mxu0 %v3968_v4  ;;  %656 = vmatpush.bf16.msra.mxu1 %v3968_v4  ;;  %v3946_v21 = vld [vmem:[%s5407_s1] sm:$0xff]  ;;  %v339_v25 = vld [vmem:[%s5408_s2 + $0x68] sm:$0xff]  ;;  %v340_v26 = vld [vmem:[%s5408_s2 + $0x70] sm:$0xff] }
  0x17   :  { %4170 = vmatpush.bf16.msra.mxu3 %v3968_v4  ;;  %v3954_v22 = vld [vmem:[%s5407_s1 + $0x40] sm:$0xff]  ;;  %v341_v27 = vld [vmem:[%s5408_s2 + $0x78] sm:$0xff]  ;;  %v3947_v29 = vld [vmem:[%s5407_s1 + $0x8] sm:$0xff] }
  0x18   :  { %4162 = vmatpush.bf16.msra.mxu2 %v3968_v4  ;;  %v3958_v23 = vld [vmem:[%s5407_s1 + $0x60] sm:$0xff]  ;;  %v3955_v30 = vld [vmem:[%s5407_s1 + $0x48] sm:$0xff]  ;;  %v3948_v33 = vld [vmem:[%s5407_s1 + $0x10] sm:$0xff] }
  0x19   :  { %709 = vperm.xlu0 %4189, %v4400_v6   ;;  %v338_v24 = vld [vmem:[%s5408_s2 + $0x60] sm:$0xff]  ;;  %v3959_v31 = vld [vmem:[%s5407_s1 + $0x68] sm:$0xff]  ;;  %v3956_v34 = vld [vmem:[%s5407_s1 + $0x50] sm:$0xff] }
  0x1a   :  { %456 = vmatpush.bf16.msra.mxu0 %v3967_v5  ;;  %657 = vmatpush.bf16.msra.mxu1 %v3967_v5  ;;  %v3950_v32 = vld [vmem:[%s5407_s1 + $0x20] sm:$0xff]  ;;  %v3960_v35 = vld [vmem:[%s5407_s1 + $0x70] sm:$0xff]  ;;  %v3951_v36 = vld [vmem:[%s5407_s1 + $0x28] sm:$0xff] }
  0x1b   :  { %4171 = vmatpush.bf16.msra.mxu3 %v3967_v5  ;;  %717 = vperm.xlu1 %4190, %v4410_v8   ;;  %v3949_v37 = vld [vmem:[%s5407_s1 + $0x18] sm:$0xff]  ;;  %v3952_v40 = vld [vmem:[%s5407_s1 + $0x30] sm:$0xff]  ;;  %v3456_v42 = vld [vmem:[#allocation5 + $0x168] sm:$0xf] }
  0x1c   :  { %4163 = vmatpush.bf16.msra.mxu2 %v3967_v5  ;;  %725 = vperm.xlu2 %4191, %v4418_v10   ;;  %v3957_v38 = vld [vmem:[%s5407_s1 + $0x58] sm:$0xff]  ;;  %v4016_v43 = vld [vmem:[#allocation5 + $0x170] sm:$0xf0]  ;;  %v4015_v45 = vld [vmem:[#allocation5 + $0x16c] sm:$0xf] }
  0x1d   :  { %v3961_v39 = vld [vmem:[%s5407_s1 + $0x78] sm:$0xff]  ;;  %v3457_v44 = vor.u32 %v4016_v43, %v3456_v42  ;;  %v3464_v47 = vld [vmem:[#allocation5 + $0x170] sm:$0xf]  ;;  %v3552_v50 = vld [vmem:[#allocation5 + $0xa8] sm:$0xf] }
  0x1e   :  { %457 = vmatpush.bf16.msra.mxu0 %v3966_v9  ;;  %658 = vmatpush.bf16.msra.mxu1 %v3966_v9  ;;  %v3953_v41 = vld [vmem:[%s5407_s1 + $0x38] sm:$0xff]  ;;  %v3992_v51 = vld [vmem:[#allocation5 + $0xb0] sm:$0xf0]  ;;  %v3444_v54 = vld [vmem:[#allocation5 + $0x150] sm:$0xf] }
  0x1f   :  { %4172 = vmatpush.bf16.msra.mxu3 %v3966_v9  ;;  %v3458_v46 = vld [vmem:[#allocation5 + $0x174] sm:$0xf0]  ;;  %v4017_v49 = vld [vmem:[#allocation5 + $0x178] sm:$0xf0]  ;;  %v3553_v53 = vor.u32 %v3992_v51, %v3552_v50  ;;  %v4012_v56 = vld [vmem:[#allocation5 + $0x154] sm:$0xf] }
  0x20   :  { %4164 = vmatpush.bf16.msra.mxu2 %v3966_v9  ;;  %v3461_v48 = vor.u32 %v4015_v45, %v3458_v46  ;;  %v3465_v52 = vor.u32 %v4017_v49, %v3464_v47  ;;  %v4013_v55 = vld [vmem:[#allocation5 + $0x158] sm:$0xf0]  ;;  %v3446_v58 = vld [vmem:[#allocation5 + $0x15c] sm:$0xf0]  ;;  %v3452_v59 = vld [vmem:[#allocation5 + $0x158] sm:$0xf] }
  0x21   :  { %729 = vperm.xlu0 %4189, %v4423_v12   ;;  %v3445_v57 = vor.u32 %v4013_v55, %v3444_v54  ;;  %v4014_v60 = vld [vmem:[#allocation5 + $0x160] sm:$0xf0]  ;;  %v3449_v61 = vor.u32 %v4012_v56, %v3446_v58  ;;  %v3540_v63 = vld [vmem:[#allocation5 + $0x90] sm:$0xf]  ;;  %v3432_v1 = vld [vmem:[#allocation5 + $0x138] sm:$0xf] }
  0x22   :  { %458 = vmatpush.bf16.msra.mxu0 %v3965_v11  ;;  %659 = vmatpush.bf16.msra.mxu1 %v3965_v11  ;;  %v3453_v62 = vor.u32 %v4014_v60, %v3452_v59  ;;  %v4009_v4 = vld [vmem:[#allocation5 + $0x13c] sm:$0xf]  ;;  %v3434_v5 = vld [vmem:[#allocation5 + $0x144] sm:$0xf0]  ;;  %v4011_v9 = vld [vmem:[#allocation5 + $0x148] sm:$0xf0] }
  0x23   :  { %4173 = vmatpush.bf16.msra.mxu3 %v3965_v11  ;;  %733 = vperm.xlu1 %4190, %v333_v13   ;;  %v3396_v45 = vld [vmem:[#allocation5 + $0xf0] sm:$0xf]  ;;  %v4001_v46 = vld [vmem:[#allocation5 + $0xf8] sm:$0xf0]  ;;  %v4000_v47 = vld [vmem:[#allocation5 + $0xf4] sm:$0xf] }
  0x24   :  { %4165 = vmatpush.bf16.msra.mxu2 %v3965_v11  ;;  %737 = vperm.xlu2 %4191, %v4433_v15   ;;  %v3398_v49 = vld [vmem:[#allocation5 + $0xfc] sm:$0xf0]  ;;  %v3404_v50 = vld [vmem:[#allocation5 + $0xf8] sm:$0xf]  ;;  %v4002_v51 = vld [vmem:[#allocation5 + $0x100] sm:$0xf0] }
  0x25   :  { %v3492_v54 = vld [vmem:[#allocation5 + $0x30] sm:$0xf]  ;;  %v3977_v55 = vld [vmem:[#allocation5 + $0x38] sm:$0xf0]  ;;  %v3384_v56 = vld [vmem:[#allocation5 + $0xd8] sm:$0xf] }
  0x26   :  { %459 = vmatpush.bf16.msra.mxu0 %v3964_v14  ;;  %660 = vmatpush.bf16.msra.mxu1 %v3964_v14  ;;  %v3998_v58 = vld [vmem:[#allocation5 + $0xe0] sm:$0xf0]  ;;  %v3997_v59 = vld [vmem:[#allocation5 + $0xdc] sm:$0xf]  ;;  %v3386_v60 = vld [vmem:[#allocation5 + $0xe4] sm:$0xf0] }
  0x27   :  { %4174 = vmatpush.bf16.msra.mxu3 %v3964_v14 }
  0x28   :  { %4166 = vmatpush.bf16.msra.mxu2 %v3964_v14 }
  0x29   :  { %741 = vperm.xlu0 %4189, %v335_v17  }
  0x2a   :  { %460 = vmatpush.bf16.msra.mxu0 %v4435_v16  ;;  %661 = vmatpush.bf16.msra.mxu1 %v4435_v16 }
  0x2b   :  { %4175 = vmatpush.bf16.msra.mxu3 %v4435_v16  ;;  %745 = vperm.xlu1 %4190, %v336_v18  }
  0x2c   :  { %4167 = vmatpush.bf16.msra.mxu2 %v4435_v16  ;;  %749 = vperm.xlu2 %4191, %v337_v20  }
  0x2e   :  { %461 = vmatpush.bf16.msra.mxu0 %v4446_v19  ;;  %662 = vmatpush.bf16.msra.mxu1 %v4446_v19 }
  0x2f   :  { %4176 = vmatpush.bf16.msra.mxu3 %v4446_v19 }
  0x30   :  { %4168 = vmatpush.bf16.msra.mxu2 %v4446_v19 }
  0x31   :  { %462 = vmatmul.bf16.vlgmr.msra.gmra.mxu0 %v3946_v21  ;;  %663 = vmatmul.bf16.vlgmr.msra.gmra.mxu1 %v3954_v22  ;;  %v3422_v22 = vld [vmem:[#allocation5 + $0x12c] sm:$0xf0] }
  0x32   :  { %683 = vmatmul.bf16.vlgmr.msra.gmra.mxu3 %v3958_v23  ;;  %753 = vperm.xlu0 %4189, %v338_v24   ;;  %v3428_v23 = vld [vmem:[#allocation5 + $0x128] sm:$0xf] }
  0x33   :  { %757 = vperm.xlu1 %4190, %v339_v25   ;;  %482 = vmatmul.bf16.vlgmr.msra.gmra.mxu2 %v3950_v32  ;;  %v4003_v32 = vld [vmem:[#allocation5 + $0x10c] sm:$0xf] }
  0x34   :  { %761 = vperm.xlu2 %4191, %v340_v26   ;;  %985 = vmatpush.bf16.msrb.mxu2 %v3457_v44 }
  0x35   :  { %1034 = vmatpush.bf16.msrb.mxu3 %v3461_v48  ;;  %1083 = vmatpush.bf16.msrb.mxu0 %v3465_v52  ;;  %v3397_v48 = vor.u32 %v4001_v46, %v3396_v45  ;;  %v3401_v52 = vor.u32 %v4000_v47, %v3398_v49 }
  0x36   :  { %1260 = vmatpush.bf16.msrb.mxu1 %v3553_v53  ;;  %v3405_v53 = vor.u32 %v4002_v51, %v3404_v50 }
  0x38   :  { %986 = vmatpush.bf16.msrb.mxu2 %v3445_v57  ;;  %v3493_v57 = vor.u32 %v3977_v55, %v3492_v54 }
  0x39   :  { %1035 = vmatpush.bf16.msrb.mxu3 %v3449_v61  ;;  %1084 = vmatpush.bf16.msrb.mxu0 %v3453_v62  ;;  %v3385_v62 = vor.u32 %v3998_v58, %v3384_v56 }
  0x3a   :  { %765 = vperm.xlu0 %4189, %v341_v27  }
  0x3b   :  { %4192 = vset.pattern.permute.xlu1 %v4338_v28 }
  0x3c   :  { %505 = vperm.xlu1 %4192, %v4388_v2   ;;  %4193 = vset.pattern.permute.xlu2 %v4338_v28 }
  0x3d   :  { %510 = vperm.xlu2 %4193, %v4400_v6  }
  0x41   :  { %467 = vmatmul.bf16.gmra.mxu0 %v3947_v29  ;;  %668 = vmatmul.bf16.gmra.mxu1 %v3955_v30  ;;  %v3408_v29 = vld [vmem:[#allocation5 + $0x108] sm:$0xf] }
  0x42   :  { %688 = vmatmul.bf16.gmra.mxu3 %v3959_v31  ;;  %4194 = vset.pattern.permute.xlu0 %v4338_v28  ;;  %v3983_v28 = vld [vmem:[#allocation5 + $0x68] sm:$0xf0]  ;;  %v4004_v31 = vld [vmem:[#allocation5 + $0x110] sm:$0xf0] }
  0x43   :  { %515 = vperm.xlu0 %4194, %v4394_v3   ;;  %487 = vmatmul.bf16.gmra.mxu2 %v3951_v36  ;;  %v4010_v3 = vld [vmem:[#allocation5 + $0x140] sm:$0xf0] }
  0x44   :  { %520 = vperm.xlu1 %4192, %v4410_v8   ;;  %v3433_v6 = vor.u32 %v4010_v3, %v3432_v1  ;;  %v3440_v8 = vld [vmem:[#allocation5 + $0x140] sm:$0xf]  ;;  %v3999_v1 = vld [vmem:[#allocation5 + $0xe8] sm:$0xf0] }
  0x45   :  { %525 = vperm.xlu2 %4193, %v4405_v7   ;;  %v3437_v7 = vor.u32 %v4009_v4, %v3434_v5  ;;  %v3441_v11 = vor.u32 %v4011_v9, %v3440_v8  ;;  %v3974_v4 = vld [vmem:[#allocation5 + $0x20] sm:$0xf0]  ;;  %v3372_v8 = vld [vmem:[#allocation5 + $0xc0] sm:$0xf]  ;;  %v3995_v9 = vld [vmem:[#allocation5 + $0xc8] sm:$0xf0] }
  0x46   :  { %987 = vmatpush.bf16.msrb.mxu2 %v3433_v6 }
  0x47   :  { %1036 = vmatpush.bf16.msrb.mxu3 %v3437_v7  ;;  %1085 = vmatpush.bf16.msrb.mxu0 %v3441_v11  ;;  %v3373_v11 = vor.u32 %v3995_v9, %v3372_v8 }
  0x4b   :  { %540 = vperm.xlu0 %4194, %v333_v13  }
  0x4c   :  { %530 = vperm.xlu1 %4192, %v4418_v10   ;;  %v3528_v10 = vld [vmem:[#allocation5 + $0x78] sm:$0xf] }
  0x4d   :  { %535 = vperm.xlu2 %4193, %v4423_v12   ;;  %v3986_v12 = vld [vmem:[#allocation5 + $0x80] sm:$0xf0] }
  0x4e   :  { %v3529_v13 = vor.u32 %v3986_v12, %v3528_v10  ;;  %v3994_v10 = vld [vmem:[#allocation5 + $0xc4] sm:$0xf]  ;;  %v3374_v12 = vld [vmem:[#allocation5 + $0xcc] sm:$0xf0] }
  0x51   :  { %472 = vmatmul.bf16.gmra.mxu0 %v3948_v33  ;;  %673 = vmatmul.bf16.gmra.mxu1 %v3956_v34  ;;  %v3410_v33 = vld [vmem:[#allocation5 + $0x114] sm:$0xf0] }
  0x52   :  { %693 = vmatmul.bf16.gmra.mxu3 %v3960_v35  ;;  %v3409_v35 = vor.u32 %v4004_v31, %v3408_v29  ;;  %v3413_v36 = vor.u32 %v4003_v32, %v3410_v33 }
  0x53   :  { %555 = vperm.xlu0 %4194, %v336_v18   ;;  %492 = vmatmul.bf16.gmra.mxu2 %v3952_v40  ;;  %v4006_v18 = vld [vmem:[#allocation5 + $0x124] sm:$0xf] }
  0x54   :  { %545 = vperm.xlu1 %4192, %v4433_v15   ;;  %v3420_v15 = vld [vmem:[#allocation5 + $0x120] sm:$0xf] }
  0x55   :  { %550 = vperm.xlu2 %4193, %v335_v17   ;;  %v4007_v17 = vld [vmem:[#allocation5 + $0x128] sm:$0xf0] }
  0x56   :  { %v3421_v21 = vor.u32 %v4007_v17, %v3420_v15  ;;  %v3996_v15 = vld [vmem:[#allocation5 + $0xd0] sm:$0xf0]  ;;  %v3377_v17 = vor.u32 %v3994_v10, %v3374_v12 }
  0x58   :  { %988 = vmatpush.bf16.msrb.mxu2 %v3421_v21  ;;  %v3468_v21 = vld [vmem:[#allocation5] sm:$0xf] }
  0x5b   :  { %570 = vperm.xlu0 %4194, %v339_v25   ;;  %v3425_v25 = vor.u32 %v4006_v18, %v3422_v22  ;;  %v3971_v22 = vld [vmem:[#allocation5 + $0x8] sm:$0xf0] }
  0x5c   :  { %560 = vperm.xlu1 %4192, %v337_v20   ;;  %989 = vmatpush.bf16.msrb.mxu2 %v3409_v35 }
  0x5d   :  { %565 = vperm.xlu2 %4193, %v338_v24   ;;  %v4008_v24 = vld [vmem:[#allocation5 + $0x130] sm:$0xf0]  ;;  %1037 = vmatpush.bf16.msrb.mxu3 %v3425_v25 }
  0x60   :  { %990 = vmatpush.bf16.msrb.mxu2 %v3397_v48 }
  0x61   :  { %477 = vmatmul.bf16.gmra.mxu0 %v3949_v37  ;;  %678 = vmatmul.bf16.gmra.mxu1 %v3957_v38  ;;  %v3416_v37 = vld [vmem:[#allocation5 + $0x110] sm:$0xf]  ;;  %v4005_v38 = vld [vmem:[#allocation5 + $0x118] sm:$0xf0] }
  0x62   :  { %698 = vmatmul.bf16.gmra.mxu3 %v3961_v39  ;;  %v3504_v39 = vld [vmem:[#allocation5 + $0x48] sm:$0xf]  ;;  %v3417_v40 = vor.u32 %v4005_v38, %v3416_v37 }
  0x63   :  { %4195 = vset.pattern.permute.xlu0 %v4337_v0  ;;  %497 = vmatmul.bf16.gmra.mxu2 %v3953_v41  ;;  %v3989_v0 = vld [vmem:[#allocation5 + $0x98] sm:$0xf0]  ;;  %v3980_v41 = vld [vmem:[#allocation5 + $0x50] sm:$0xf0] }
  0x64   :  { %575 = vperm.xlu1 %4192, %v340_v26   ;;  %v3541_v2 = vor.u32 %v3989_v0, %v3540_v63  ;;  %v3429_v26 = vor.u32 %v4008_v24, %v3428_v23  ;;  %v3505_v42 = vor.u32 %v3980_v41, %v3504_v39  ;;  %1038 = vmatpush.bf16.msrb.mxu3 %v3413_v36  ;;  %v3392_v0 = vld [vmem:[#allocation5 + $0xe0] sm:$0xf] }
  0x65   :  { %580 = vperm.xlu2 %4193, %v341_v27   ;;  %v3516_v27 = vld [vmem:[#allocation5 + $0x60] sm:$0xf]  ;;  %v3389_v63 = vor.u32 %v3997_v59, %v3386_v60  ;;  %v3393_v3 = vor.u32 %v3999_v1, %v3392_v0  ;;  %991 = vmatpush.bf16.msrb.mxu2 %v3385_v62  ;;  %v3469_v23 = vor.u32 %v3971_v22, %v3468_v21 }
  0x66   :  { %1261 = vmatpush.bf16.msrb.mxu1 %v3541_v2  ;;  %v3517_v30 = vor.u32 %v3983_v28, %v3516_v27  ;;  %1086 = vmatpush.bf16.msrb.mxu0 %v3429_v26  ;;  %v3480_v2 = vld [vmem:[#allocation5 + $0x18] sm:$0xf] }
  0x67   :  { %v3481_v5 = vor.u32 %v3974_v4, %v3480_v2 }
  0x68   :  { %1039 = vmatpush.bf16.msrb.mxu3 %v3401_v52 }
  0x69   :  { %992 = vmatpush.bf16.msrb.mxu2 %v3373_v11 }
  0x6a   :  { %1262 = vmatpush.bf16.msrb.mxu1 %v3529_v13  ;;  %1087 = vmatpush.bf16.msrb.mxu0 %v3417_v40  ;;  %v3380_v13 = vld [vmem:[#allocation5 + $0xc8] sm:$0xf] }
  0x6b   :  { %v3381_v18 = vor.u32 %v3996_v15, %v3380_v13 }
  0x6c   :  { %1040 = vmatpush.bf16.msrb.mxu3 %v3389_v63 }
  0x6e   :  { %v4526_v14 = vpop.permute.xlu2 %721  ;;  %1263 = vmatpush.bf16.msrb.mxu1 %v3517_v30  ;;  %1088 = vmatpush.bf16.msrb.mxu0 %v3405_v53 }
  0x6f   :  { %5444 = vst [vmem:[#allocation12_spill] sm:$0xff] %v4526_v14 }
  0x70   :  { %1041 = vmatpush.bf16.msrb.mxu3 %v3377_v17 }
  0x72   :  { %1264 = vmatpush.bf16.msrb.mxu1 %v3505_v42  ;;  %1089 = vmatpush.bf16.msrb.mxu0 %v3393_v3 }
  0x76   :  { %v4532_v43 = vpop.permute.xlu2 %725  ;;  %1265 = vmatpush.bf16.msrb.mxu1 %v3493_v57  ;;  %1090 = vmatpush.bf16.msrb.mxu0 %v3381_v18 }
  0x77   :  { %5447 = vst [vmem:[#allocation15_spill] sm:$0xff] %v4532_v43 }
  0x7a   :  { %1266 = vmatpush.bf16.msrb.mxu1 %v3481_v5 }
  0x7e   :  { %v4540_v7 = vpop.permute.xlu2 %737  ;;  %1267 = vmatpush.bf16.msrb.mxu1 %v3469_v23 }
  0x7f   :  { %5451 = vst [vmem:[#allocation19_spill] sm:$0xff] %v4540_v7 }
  0x83   :  { %v4530_v34 = vpop.permute.xlu0 %705 }
  0x84   :  { %5446 = vst [vmem:[#allocation14_spill] sm:$0xff] %v4530_v34 }
  0x85   :  { %v4528_v20 = vpop.permute.xlu1 %713 }
  0x86   :  { %5445 = vst [vmem:[#allocation13_spill] sm:$0xff] %v4528_v20  ;;  %v4546_v26 = vpop.permute.xlu2 %749 }
  0x87   :  { %5454 = vst [vmem:[#allocation22_spill] sm:$0xff] %v4546_v26 }
  0x8b   :  { %v4536_v61 = vpop.permute.xlu0 %709 }
  0x8c   :  { %5449 = vst [vmem:[#allocation17_spill] sm:$0xff] %v4536_v61 }
  0x8d   :  { %v4534_v44 = vpop.permute.xlu1 %717 }
  0x8e   :  { %5448 = vst [vmem:[#allocation16_spill] sm:$0xff] %v4534_v44  ;;  %v4552_v29 = vpop.permute.xlu2 %761 }
  0x8f   :  { %5457 = vst [vmem:[#allocation25_spill] sm:$0xff] %v4552_v29 }
  0x93   :  { %v4542_v24 = vpop.permute.xlu0 %729 }
  0x94   :  { %5452 = vst [vmem:[#allocation20_spill] sm:$0xff] %v4542_v24 }
  0x95   :  { %v4538_v6 = vpop.permute.xlu1 %733 }
  0x96   :  { %5450 = vst [vmem:[#allocation18_spill] sm:$0xff] %v4538_v6 }
  0x97   :  { %v4558_v35 = vpop.permute.xlu2 %510 }
  0x98   :  { %5460 = vst [vmem:[#allocation28_spill] sm:$0xff] %v4558_v35 }
  0x9b   :  { %v4548_v27 = vpop.permute.xlu0 %741 }
  0x9c   :  { %5455 = vst [vmem:[#allocation23_spill] sm:$0xff] %v4548_v27 }
  0x9d   :  { %v4544_v25 = vpop.permute.xlu1 %745 }
  0x9e   :  { %5453 = vst [vmem:[#allocation21_spill] sm:$0xff] %v4544_v25 }
  0x9f   :  { %v4580_v62 = vpop.permute.xlu2 %525 }
  0xa0   :  { %5464 = vst [vmem:[#allocation32_spill] sm:$0xff] %v4580_v62 }
  0xa4   :  { %v4554_v32 = vpop.permute.xlu0 %753 }
  0xa5   :  { %v4550_v28 = vpop.permute.xlu1 %757  ;;  %5458 = vst [vmem:[#allocation26_spill] sm:$0xff] %v4554_v32 }
  0xa6   :  { %5456 = vst [vmem:[#allocation24_spill] sm:$0xff] %v4550_v28 }
  0xa7   :  { %v4591_v15 = vpop.permute.xlu2 %535 }
  0xa8   :  { %5466 = vst [vmem:[#allocation34_spill] sm:$0xff] %v4591_v15 }
  0xac   :  { %v4566_v46 = vpop.permute.xlu0 %765 }
  0xad   :  { %5461 = vst [vmem:[#allocation29_spill] sm:$0xff] %v4566_v46 }
  0xae   :  { %v463_v30 = vpop.f32.mrf.mxu0  ;;  %v664_v31 = vpop.f32.mrf.mxu1 }
  0xaf   :  { %v4556_v33 = vpop.permute.xlu1 %505  ;;  %v768_v39 = vmul.f32 %v4530_v34, %v664_v31 }
  0xb0   :  { %5459 = vst [vmem:[#allocation27_spill] sm:$0xff] %v4556_v33  ;;  %v583_v36 = vmul.f32 %v4556_v33, %v463_v30 }
  0xb5   :  { %v4569_v49 = vpop.permute.xlu0 %515  ;;  %v684_v10 = vpop.f32.mrf.mxu3 }
  0xb6   :  { %v465_v37 = vpop.f32.mrf.mxu0  ;;  %v666_v38 = vpop.f32.mrf.mxu1  ;;  %5462 = vst [vmem:[#allocation30_spill] sm:$0xff] %v4569_v49 }
  0xb7   :  { %v584_v40 = vmul.f32 %v4558_v35, %v465_v37  ;;  %v769_v41 = vmul.f32 %v4536_v61, %v666_v38  ;;  %v4571_v50 = vpop.permute.xlu1 %520  ;;  %v483_v11 = vpop.f32.mrf.mxu2 }
  0xb8   :  { %5463 = vst [vmem:[#allocation31_spill] sm:$0xff] %v4571_v50 }
  0xb9   :  { %v4564_v42 = vpack.c.bf16 %v584_v40, %v583_v36  ;;  %v784_v45 = vpack.c.bf16 %v769_v41, %v768_v39 }
  0xbb   :  { %993 = vmatmul.bf16.vlgmr.msrb.gmra.mxu2 %v784_v45  ;;  %1042 = vmatmul.bf16.vlgmr.msrb.gmra.mxu3 %v784_v45 }
  0xbc   :  { %1091 = vmatmul.bf16.vlgmr.msrb.gmra.mxu0 %v784_v45  ;;  %1268 = vmatmul.bf16.vlgmr.msrb.gmra.mxu1 %v4564_v42  ;;  %v4606_v45 = vpop.permute.xlu2 %550 }
  0xbd   :  { %v4593_v17 = vpop.permute.xlu0 %540  ;;  %v686_v18 = vpop.f32.mrf.mxu3  ;;  %5468 = vst [vmem:[#allocation36_spill] sm:$0xff] %v4606_v45 }
  0xbe   :  { %v468_v47 = vpop.f32.mrf.mxu0  ;;  %v669_v48 = vpop.f32.mrf.mxu1  ;;  %5467 = vst [vmem:[#allocation35_spill] sm:$0xff] %v4593_v17 }
  0xbf   :  { %v585_v51 = vmul.f32 %v4569_v49, %v468_v47  ;;  %v770_v54 = vmul.f32 %v4528_v20, %v669_v48  ;;  %v4582_v63 = vpop.permute.xlu1 %530  ;;  %v485_v22 = vpop.f32.mrf.mxu2  ;;  %v4794_v20 = vld [vmem:[#allocation7] ss:$0 sm:$0xff] }
  0xc0   :  { %5465 = vst [vmem:[#allocation33_spill] sm:$0xff] %v4582_v63 }
  0xc5   :  { %v4604_v41 = vpop.f32.mrf.mxu3 }
  0xc6   :  { %v470_v52 = vpop.f32.mrf.mxu0  ;;  %v671_v53 = vpop.f32.mrf.mxu1 }
  0xc7   :  { %v586_v55 = vmul.f32 %v4571_v50, %v470_v52  ;;  %v771_v56 = vmul.f32 %v4534_v44, %v671_v53  ;;  %v4602_v40 = vpop.f32.mrf.mxu2  ;;  %v4608_v47 = vpop.permute.xlu1 %545  ;;  %v776_v52 = vmul.f32 %v4540_v7, %v684_v10  ;;  %v777_v53 = vmul.f32 %v4548_v27, %v686_v18  ;;  %v3988_v10 = vld [vmem:[#allocation5 + $0x94] sm:$0xf]  ;;  %v3990_v18 = vld [vmem:[#allocation5 + $0xa0] sm:$0xf0]  ;;  %v4792_v44 = vld [vmem:[#allocation7 + $0x1] ss:$0 sm:$0xff] }
  0xc8   :  { %5469 = vst [vmem:[#allocation37_spill] sm:$0xff] %v4608_v47  ;;  %v591_v48 = vmul.f32 %v4608_v47, %v483_v11  ;;  %v3542_v11 = vld [vmem:[#allocation5 + $0x9c] sm:$0xf0]  ;;  %v4020_v7 = vld [vmem:[#allocation5 + $0x190] sm:$0xf0] }
  0xc9   :  { %v4577_v57 = vpack.c.bf16 %v586_v55, %v585_v51  ;;  %v785_v58 = vpack.c.bf16 %v771_v56, %v770_v54  ;;  %v592_v51 = vmul.f32 %v4606_v45, %v485_v22  ;;  %v788_v55 = vpack.c.bf16 %v777_v53, %v776_v52  ;;  %v4037_v22 = vld [vmem:[#allocation5 + $0x218] sm:$0xf0]  ;;  %v4039_v52 = vld [vmem:[#allocation5 + $0x22c] sm:$0xf]  ;;  %v3650_v53 = vld [vmem:[#allocation5 + $0x234] sm:$0xf0] }
  0xcb   :  { %998 = vmatmul.bf16.gmra.mxu2 %v785_v58  ;;  %1047 = vmatmul.bf16.gmra.mxu3 %v785_v58  ;;  %v4614_v54 = vpack.c.bf16 %v592_v51, %v591_v48  ;;  %v3624_v48 = vld [vmem:[#allocation5 + $0x1f8] sm:$0xf]  ;;  %v4034_v51 = vld [vmem:[#allocation5 + $0x200] sm:$0xf0] }
  0xcc   :  { %1096 = vmatmul.bf16.gmra.mxu0 %v785_v58  ;;  %1273 = vmatmul.bf16.gmra.mxu1 %v4577_v57 }
  0xcd   :  { %v691_v58 = vpop.f32.mrf.mxu3 }
  0xce   :  { %v473_v59 = vpop.f32.mrf.mxu0  ;;  %v674_v60 = vpop.f32.mrf.mxu1 }
  0xcf   :  { %v587_v0 = vmul.f32 %v4580_v62, %v473_v59  ;;  %v772_v3 = vmul.f32 %v4526_v14, %v674_v60  ;;  %v490_v56 = vpop.f32.mrf.mxu2  ;;  %v3991_v59 = vld [vmem:[#allocation5 + $0xac] sm:$0xf]  ;;  %v3554_v60 = vld [vmem:[#allocation5 + $0xb4] sm:$0xf0] }
  0xd6   :  { %v475_v1 = vpop.f32.mrf.mxu0  ;;  %v676_v2 = vpop.f32.mrf.mxu1 }
  0xd7   :  { %v588_v4 = vmul.f32 %v4582_v63, %v475_v1  ;;  %v773_v5 = vmul.f32 %v4532_v43, %v676_v2  ;;  %v3557_v1 = vor.u32 %v3991_v59, %v3554_v60  ;;  %v3993_v2 = vld [vmem:[#allocation5 + $0xb8] sm:$0xf0]  ;;  %v4619_v59 = vpop.permute.xlu0 %555 }
  0xd8   :  { %5471 = vst [vmem:[#allocation39_spill] sm:$0xff] %v4619_v59 }
  0xd9   :  { %v4588_v8 = vpack.c.bf16 %v588_v4, %v587_v0  ;;  %v786_v9 = vpack.c.bf16 %v773_v5, %v772_v3  ;;  %v3560_v0 = vld [vmem:[#allocation5 + $0xb0] sm:$0xf]  ;;  %v3648_v3 = vld [vmem:[#allocation5 + $0x228] sm:$0xf]  ;;  %v4040_v4 = vld [vmem:[#allocation5 + $0x230] sm:$0xf0]  ;;  %1309 = vmatpush.bf16.msra.mxu2 %v3557_v1 }
  0xda   :  { %v3561_v5 = vor.u32 %v3993_v2, %v3560_v0  ;;  %v3653_v0 = vor.u32 %v4039_v52, %v3650_v53  ;;  %v3982_v1 = vld [vmem:[#allocation5 + $0x64] sm:$0xf]  ;;  %v3518_v2 = vld [vmem:[#allocation5 + $0x6c] sm:$0xf0] }
  0xdb   :  { %1003 = vmatmul.bf16.gmra.mxu2 %v786_v9  ;;  %1052 = vmatmul.bf16.gmra.mxu3 %v786_v9  ;;  %v3512_v53 = vld [vmem:[#allocation5 + $0x50] sm:$0xf] }
  0xdc   :  { %1101 = vmatmul.bf16.gmra.mxu0 %v786_v9  ;;  %1278 = vmatmul.bf16.gmra.mxu1 %v4588_v8  ;;  %v3649_v9 = vor.u32 %v4040_v4, %v3648_v3  ;;  %v3625_v4 = vor.u32 %v4034_v51, %v3624_v48  ;;  %v778_v48 = vmul.f32 %v4544_v25, %v4604_v41 }
  0xdd   :  { %1358 = vmatpush.bf16.msra.mxu3 %v3561_v5  ;;  %v3524_v5 = vld [vmem:[#allocation5 + $0x68] sm:$0xf]  ;;  %1617 = vmatpush.bf16.msra.mxu1 %v3653_v0 }
  0xde   :  { %v478_v12 = vpop.f32.mrf.mxu0  ;;  %v679_v13 = vpop.f32.mrf.mxu1  ;;  %1568 = vmatpush.bf16.msra.mxu0 %v3649_v9  ;;  %v3984_v9 = vld [vmem:[#allocation5 + $0x70] sm:$0xf0]  ;;  %v3600_v0 = vld [vmem:[#allocation5 + $0x1c8] sm:$0xf] }
  0xdf   :  { %v589_v21 = vmul.f32 %v4591_v15, %v478_v12  ;;  %v774_v31 = vmul.f32 %v4542_v24, %v679_v13  ;;  %v3548_v12 = vld [vmem:[#allocation5 + $0x98] sm:$0xf]  ;;  %v3545_v13 = vor.u32 %v3988_v10, %v3542_v11  ;;  %v4036_v10 = vld [vmem:[#allocation5 + $0x214] sm:$0xf]  ;;  %v4621_v11 = vpop.f32.mrf.mxu2 }
  0xe1   :  { %1310 = vmatpush.bf16.msra.mxu2 %v3545_v13  ;;  %v593_v13 = vmul.f32 %v4619_v59, %v4602_v40  ;;  %v3979_v40 = vld [vmem:[#allocation5 + $0x4c] sm:$0xf] }
  0xe6   :  { %v480_v23 = vpop.f32.mrf.mxu0  ;;  %v681_v30 = vpop.f32.mrf.mxu1 }
  0xe7   :  { %v590_v36 = vmul.f32 %v4593_v17, %v480_v23  ;;  %v775_v37 = vmul.f32 %v4538_v6, %v681_v30  ;;  %v3549_v23 = vor.u32 %v3990_v18, %v3548_v12  ;;  %v3612_v12 = vld [vmem:[#allocation5 + $0x1e0] sm:$0xf]  ;;  %v4031_v18 = vld [vmem:[#allocation5 + $0x1e8] sm:$0xf0] }
  0xe9   :  { %v4599_v38 = vpack.c.bf16 %v590_v36, %v589_v21  ;;  %v787_v39 = vpack.c.bf16 %v775_v37, %v774_v31  ;;  %v3636_v21 = vld [vmem:[#allocation5 + $0x210] sm:$0xf]  ;;  %v3985_v31 = vld [vmem:[#allocation5 + $0x7c] sm:$0xf]  ;;  %v3530_v36 = vld [vmem:[#allocation5 + $0x84] sm:$0xf0]  ;;  %1359 = vmatpush.bf16.msra.mxu3 %v3549_v23 }
  0xea   :  { %v3637_v30 = vor.u32 %v4037_v22, %v3636_v21  ;;  %v3536_v37 = vld [vmem:[#allocation5 + $0x80] sm:$0xf]  ;;  %v3533_v60 = vor.u32 %v3985_v31, %v3530_v36  ;;  %v4623_v22 = vpop.f32.mrf.mxu3  ;;  %v3521_v36 = vor.u32 %v3982_v1, %v3518_v2  ;;  %v4028_v1 = vld [vmem:[#allocation5 + $0x1d0] sm:$0xf0] }
  0xeb   :  { %1008 = vmatmul.bf16.gmra.mxu2 %v787_v39  ;;  %1057 = vmatmul.bf16.gmra.mxu3 %v787_v39  ;;  %v3638_v21 = vld [vmem:[#allocation5 + $0x21c] sm:$0xf0]  ;;  %v3601_v2 = vor.u32 %v4028_v1, %v3600_v0  ;;  %v4634_v0 = vpop.permute.xlu2 %565  ;;  %v4636_v1 = vpop.permute.xlu0 %570 }
  0xec   :  { %1106 = vmatmul.bf16.gmra.mxu0 %v787_v39  ;;  %1283 = vmatmul.bf16.gmra.mxu1 %v4599_v38  ;;  %v3987_v39 = vld [vmem:[#allocation5 + $0x88] sm:$0xf0]  ;;  %v3641_v23 = vor.u32 %v4036_v10, %v3638_v21  ;;  %v3978_v21 = vld [vmem:[#allocation5 + $0x40] sm:$0xf0]  ;;  %5472 = vst [vmem:[#allocation40_spill] sm:$0xff] %v4634_v0 }
  0xed   :  { %1569 = vmatpush.bf16.msra.mxu0 %v3637_v30  ;;  %v3537_v3 = vor.u32 %v3987_v39, %v3536_v37  ;;  %v779_v30 = vmul.f32 %v4546_v26, %v691_v58  ;;  %1311 = vmatpush.bf16.msra.mxu2 %v3533_v60  ;;  %v3525_v37 = vor.u32 %v3984_v9, %v3524_v5  ;;  %v3981_v60 = vld [vmem:[#allocation5 + $0x58] sm:$0xf0]  ;;  %v3976_v5 = vld [vmem:[#allocation5 + $0x34] sm:$0xf]  ;;  %v495_v9 = vpop.f32.mrf.mxu2 }
  0xee   :  { %v3613_v39 = vor.u32 %v4031_v18, %v3612_v12  ;;  %1618 = vmatpush.bf16.msra.mxu1 %v3641_v23  ;;  %v3513_v41 = vor.u32 %v3981_v60, %v3512_v53  ;;  %v3494_v12 = vld [vmem:[#allocation5 + $0x3c] sm:$0xf0]  ;;  %v3500_v18 = vld [vmem:[#allocation5 + $0x38] sm:$0xf]  ;;  %5473 = vst [vmem:[#allocation41_spill] sm:$0xff] %v4636_v1 }
  0xef   :  { %1360 = vmatpush.bf16.msra.mxu3 %v3537_v3  ;;  %v789_v52 = vpack.c.bf16 %v779_v30, %v778_v48  ;;  %v4033_v3 = vld [vmem:[#allocation5 + $0x1fc] sm:$0xf]  ;;  %v3501_v23 = vor.u32 %v3978_v21, %v3500_v18  ;;  %v3588_v30 = vld [vmem:[#allocation5 + $0x1b0] sm:$0xf]  ;;  %v3488_v53 = vld [vmem:[#allocation5 + $0x20] sm:$0xf]  ;;  %v595_v18 = vmul.f32 %v4634_v0, %v4621_v11  ;;  %v596_v21 = vmul.f32 %v4636_v1, %v495_v9 }
  0xf0   :  { %v3614_v48 = vld [vmem:[#allocation5 + $0x1ec] sm:$0xf0]  ;;  %v3576_v60 = vld [vmem:[#allocation5 + $0x198] sm:$0xf] }
  0xf1   :  { %1570 = vmatpush.bf16.msra.mxu0 %v3625_v4  ;;  %1312 = vmatpush.bf16.msra.mxu2 %v3521_v36  ;;  %v3626_v4 = vld [vmem:[#allocation5 + $0x204] sm:$0xf0]  ;;  %v4025_v36 = vld [vmem:[#allocation5 + $0x1b8] sm:$0xf0] }
  0xf2   :  { %v3629_v10 = vor.u32 %v4033_v3, %v3626_v4  ;;  %v4027_v3 = vld [vmem:[#allocation5 + $0x1cc] sm:$0xf]  ;;  %v3602_v4 = vld [vmem:[#allocation5 + $0x1d4] sm:$0xf0] }
  0xf3   :  { %1361 = vmatpush.bf16.msra.mxu3 %v3525_v37  ;;  %v4030_v37 = vld [vmem:[#allocation5 + $0x1e4] sm:$0xf] }
  0xf4   :  { %1619 = vmatpush.bf16.msra.mxu1 %v3629_v10 }
  0xf5   :  { %1571 = vmatpush.bf16.msra.mxu0 %v3613_v39  ;;  %v3589_v39 = vor.u32 %v4025_v36, %v3588_v30  ;;  %v3470_v36 = vld [vmem:[#allocation5 + $0xc] sm:$0xf0] }
  0xf7   :  { %1362 = vmatpush.bf16.msra.mxu3 %v3513_v41 }
  0xf9   :  { %1572 = vmatpush.bf16.msra.mxu0 %v3601_v2  ;;  %v4022_v2 = vld [vmem:[#allocation5 + $0x1a0] sm:$0xf0] }
  0xfa   :  { %v3577_v10 = vor.u32 %v4022_v2, %v3576_v60  ;;  %v3590_v60 = vld [vmem:[#allocation5 + $0x1bc] sm:$0xf0] }
  0xfb   :  { %1013 = vmatmul.bf16.gmra.mxu2 %v788_v55  ;;  %1062 = vmatmul.bf16.gmra.mxu3 %v788_v55 }
  0xfc   :  { %1111 = vmatmul.bf16.gmra.mxu0 %v788_v55  ;;  %1288 = vmatmul.bf16.gmra.mxu1 %v4614_v54  ;;  %v4617_v55 = vpop.permute.xlu1 %560 }
  0xfd   :  { %5470 = vst [vmem:[#allocation38_spill] sm:$0xff] %v4617_v55  ;;  %v594_v31 = vmul.f32 %v4617_v55, %v490_v56  ;;  %v3506_v56 = vld [vmem:[#allocation5 + $0x54] sm:$0xf0]  ;;  %1363 = vmatpush.bf16.msra.mxu3 %v3501_v23  ;;  %1573 = vmatpush.bf16.msra.mxu0 %v3589_v39  ;;  %v780_v23 = vmul.f32 %v4554_v32, %v4623_v22  ;;  %v498_v39 = vpop.f32.mrf.mxu2  ;;  %v3578_v22 = vld [vmem:[#allocation5 + $0x1a4] sm:$0xf0] }
  0xfe   :  { %v3509_v58 = vor.u32 %v3979_v40, %v3506_v56  ;;  %v3482_v40 = vld [vmem:[#allocation5 + $0x24] sm:$0xf0]  ;;  %v3617_v56 = vor.u32 %v4030_v37, %v3614_v48  ;;  %v4032_v55 = vld [vmem:[#allocation5 + $0x1f0] sm:$0xf0] }
  0xff   :  { %v4631_v51 = vpack.c.bf16 %v594_v31, %v593_v13  ;;  %v696_v13 = vpop.f32.mrf.mxu3  ;;  %v3497_v31 = vor.u32 %v3976_v5, %v3494_v12  ;;  %v3605_v12 = vor.u32 %v4027_v3, %v3602_v4  ;;  %v3476_v37 = vld [vmem:[#allocation5 + $0x8] sm:$0xf]  ;;  %v4021_v3 = vld [vmem:[#allocation5 + $0x19c] sm:$0xf] }
 0x100   :  { %1313 = vmatpush.bf16.msra.mxu2 %v3509_v58  ;;  %v3975_v58 = vld [vmem:[#allocation5 + $0x28] sm:$0xf0]  ;;  %1620 = vmatpush.bf16.msra.mxu1 %v3617_v56  ;;  %v781_v30 = vmul.f32 %v4550_v28, %v696_v13  ;;  %v3581_v4 = vor.u32 %v4021_v3, %v3578_v22 }
 0x101   :  { %v3489_v5 = vor.u32 %v3975_v58, %v3488_v53  ;;  %1574 = vmatpush.bf16.msra.mxu0 %v3577_v10  ;;  %v4019_v56 = vld [vmem:[#allocation5 + $0x188] sm:$0xf0]  ;;  %v4644_v53 = vpack.c.bf16 %v596_v21, %v595_v18  ;;  %v4024_v58 = vld [vmem:[#allocation5 + $0x1b4] sm:$0xf]  ;;  %v3566_v10 = vld [vmem:[#allocation5 + $0x18c] sm:$0xf0] }
 0x102   :  { %v3593_v2 = vor.u32 %v4024_v58, %v3590_v60 }
 0x103   :  { %1364 = vmatpush.bf16.msra.mxu3 %v3489_v5  ;;  %v4018_v5 = vld [vmem:[#allocation5 + $0x184] sm:$0xf] }
 0x104   :  { %1314 = vmatpush.bf16.msra.mxu2 %v3497_v31  ;;  %v3970_v31 = vld [vmem:[#allocation5 + $0x4] sm:$0xf]  ;;  %1621 = vmatpush.bf16.msra.mxu1 %v3605_v12  ;;  %v4647_v12 = vpop.permute.xlu2 %580  ;;  %v4649_v18 = vpop.permute.xlu1 %575 }
 0x105   :  { %v3473_v48 = vor.u32 %v3970_v31, %v3470_v36  ;;  %5474 = vst [vmem:[#allocation42_spill] sm:$0xff] %v4647_v12  ;;  %v500_v21 = vpop.f32.mrf.mxu2  ;;  %v597_v36 = vmul.f32 %v4649_v18, %v498_v39 }
 0x106   :  { %5475 = vst [vmem:[#allocation43_spill] sm:$0xff] %v4649_v18 }
 0x107   :  { %v699_v11 = vpop.f32.mrf.mxu3 }
 0x108   :  { %1622 = vmatpush.bf16.msra.mxu1 %v3593_v2 }
 0x10b   :  { %1018 = vmatmul.bf16.gmra.mxu2 %v789_v52  ;;  %1067 = vmatmul.bf16.gmra.mxu3 %v789_v52 }
 0x10c   :  { %1116 = vmatmul.bf16.gmra.mxu0 %v789_v52  ;;  %1293 = vmatmul.bf16.gmra.mxu1 %v4631_v51  ;;  %v3973_v52 = vld [vmem:[#allocation5 + $0x1c] sm:$0xf] }
 0x10d   :  { %v3485_v41 = vor.u32 %v3973_v52, %v3482_v40  ;;  %v3972_v52 = vld [vmem:[#allocation5 + $0x10] sm:$0xf0]  ;;  %v3564_v40 = vld [vmem:[#allocation5 + $0x180] sm:$0xf]  ;;  %1623 = vmatpush.bf16.msra.mxu1 %v3581_v4 }
 0x10e   :  { %v3477_v9 = vor.u32 %v3972_v52, %v3476_v37  ;;  %v3565_v13 = vor.u32 %v4019_v56, %v3564_v40  ;;  %v598_v37 = vmul.f32 %v4647_v12, %v500_v21  ;;  %v4041_v12 = vld [vmem:[#allocation5 + $0x238] sm:$0xf0] }
 0x10f   :  { %1315 = vmatpush.bf16.msra.mxu2 %v3485_v41  ;;  %v790_v41 = vpack.c.bf16 %v781_v30, %v780_v23  ;;  %v3569_v30 = vor.u32 %v4018_v5, %v3566_v10  ;;  %v701_v31 = vpop.f32.mrf.mxu3 }
 0x110   :  { %1365 = vmatpush.bf16.msra.mxu3 %v3477_v9  ;;  %1575 = vmatpush.bf16.msra.mxu0 %v3565_v13  ;;  %v783_v23 = vmul.f32 %v4566_v46, %v701_v31  ;;  %v4655_v52 = vpack.c.bf16 %v598_v37, %v597_v36 }
 0x111   :  { %1624 = vmatpush.bf16.msra.mxu1 %v3569_v30 }
 0x113   :  { %1316 = vmatpush.bf16.msra.mxu2 %v3473_v48  ;;  %v782_v48 = vmul.f32 %v4552_v29, %v699_v11 }
 0x115   :  { %v791_v40 = vpack.c.bf16 %v783_v23, %v782_v48 }
 0x11b   :  { %1023 = vmatmul.bf16.gmra.mxu2 %v790_v41  ;;  %1072 = vmatmul.bf16.gmra.mxu3 %v790_v41 }
 0x11c   :  { %1121 = vmatmul.bf16.gmra.mxu0 %v790_v41  ;;  %1298 = vmatmul.bf16.gmra.mxu1 %v4644_v53 }
 0x12b   :  { %1028 = vmatmul.bf16.gmra.mxu2 %v791_v40  ;;  %1077 = vmatmul.bf16.gmra.mxu3 %v791_v40 }
 0x12c   :  { %1126 = vmatmul.bf16.gmra.mxu0 %v791_v40  ;;  %1303 = vmatmul.bf16.gmra.mxu1 %v4655_v52 }
 0x139   :  { %v4658_v56 = vpop.f32.mrf.mxu0  ;;  %v1269_v9 = vpop.f32.mrf.mxu1 }
 0x13b   :  { %1317 = vmatmul.bf16.vlgmr.msra.gmra.mxu2 %v4564_v42  ;;  %1366 = vmatmul.bf16.vlgmr.msra.gmra.mxu3 %v4564_v42 }
 0x13c   :  { %1576 = vmatmul.bf16.vlgmr.msra.gmra.mxu0 %v4446_v19  ;;  %1625 = vmatmul.bf16.vlgmr.msra.gmra.mxu1 %v4446_v19 }
 0x13e   :  { %v994_v39 = vpop.f32.mrf.mxu2  ;;  %v4694_v23 = vpop.f32.mrf.mxu3 }
 0x13f   :  { %v4664_v11 = vadd.f32 %v1269_v9, %v994_v39  ;;  %v4702_v39 = vld [vmem:[#allocation2 + $0x18] sm:$0xff] }
 0x141   :  { %v4666_v13 = vpop.f32.mrf.mxu0  ;;  %v1271_v58 = vpop.f32.mrf.mxu1 }
 0x146   :  { %v996_v60 = vpop.f32.mrf.mxu2 }
 0x147   :  { %v4668_v41 = vadd.f32 %v1271_v58, %v996_v60  ;;  %v4706_v58 = vpop.f32.mrf.mxu3 }
 0x149   :  { %v4670_v2 = vpop.f32.mrf.mxu0  ;;  %v1274_v3 = vpop.f32.mrf.mxu1 }
 0x14b   :  { %1322 = vmatmul.bf16.gmra.mxu2 %v4577_v57  ;;  %1371 = vmatmul.bf16.gmra.mxu3 %v4577_v57  ;;  %v4686_v57 = vld [vmem:[#allocation2 + $0x10] sm:$0xff] }
 0x14c   :  { %1581 = vmatmul.bf16.gmra.mxu0 %v4435_v16  ;;  %1630 = vmatmul.bf16.gmra.mxu1 %v4435_v16 }
 0x14e   :  { %v999_v19 = vpop.f32.mrf.mxu2 }
 0x14f   :  { %v4676_v42 = vadd.f32 %v1274_v3, %v999_v19 }
 0x151   :  { %v4678_v22 = vpop.f32.mrf.mxu0  ;;  %v1276_v4 = vpop.f32.mrf.mxu1 }
 0x156   :  { %v1001_v5 = vpop.f32.mrf.mxu2 }
 0x157   :  { %v4680_v10 = vadd.f32 %v1276_v4, %v1001_v5 }
 0x159   :  { %v4682_v21 = vpop.f32.mrf.mxu0  ;;  %v1279_v30 = vpop.f32.mrf.mxu1 }
 0x15b   :  { %1327 = vmatmul.bf16.gmra.mxu2 %v4588_v8  ;;  %1376 = vmatmul.bf16.gmra.mxu3 %v4588_v8 }
 0x15c   :  { %1586 = vmatmul.bf16.gmra.mxu0 %v4686_v57  ;;  %1635 = vmatmul.bf16.gmra.mxu1 %v4686_v57 }
 0x15e   :  { %v1004_v16 = vpop.f32.mrf.mxu2 }
 0x15f   :  { %v4690_v31 = vadd.f32 %v1279_v30, %v1004_v16  ;;  %v4714_v16 = vpop.f32.mrf.mxu3 }
 0x161   :  { %v4692_v36 = vpop.f32.mrf.mxu0  ;;  %v1281_v37 = vpop.f32.mrf.mxu1 }
 0x166   :  { %v1006_v48 = vpop.f32.mrf.mxu2 }
 0x167   :  { %v4696_v40 = vadd.f32 %v1281_v37, %v1006_v48  ;;  %v3656_v48 = vld [vmem:[#allocation5 + $0x230] sm:$0xf] }
 0x168   :  { %v3657_v18 = vor.u32 %v4041_v12, %v3656_v48  ;;  %v4035_v12 = vld [vmem:[#allocation5 + $0x208] sm:$0xf0]  ;;  %v4730_v48 = vpop.f32.mrf.mxu3 }
 0x169   :  { %v4698_v9 = vpop.f32.mrf.mxu0  ;;  %v1284_v8 = vpop.f32.mrf.mxu1 }
 0x16a   :  { %1666 = vmatpush.bf16.msrb.mxu2 %v3657_v18  ;;  %v3620_v18 = vld [vmem:[#allocation5 + $0x1e8] sm:$0xf] }
 0x16b   :  { %1332 = vmatmul.bf16.gmra.mxu2 %v4599_v38  ;;  %1381 = vmatmul.bf16.gmra.mxu3 %v4599_v38  ;;  %v3621_v59 = vor.u32 %v4032_v55, %v3620_v18  ;;  %v3596_v55 = vld [vmem:[#allocation5 + $0x1b8] sm:$0xf] }
 0x16c   :  { %1591 = vmatmul.bf16.gmra.mxu0 %v4702_v39  ;;  %1640 = vmatmul.bf16.gmra.mxu1 %v4702_v39 }
 0x16e   :  { %v1009_v60 = vpop.f32.mrf.mxu2 }
 0x16f   :  { %v4708_v3 = vadd.f32 %v1284_v8, %v1009_v60  ;;  %v4720_v8 = vld [vmem:[#allocation2 + $0x20] sm:$0xff] }
 0x171   :  { %v4710_v19 = vpop.f32.mrf.mxu0  ;;  %v1286_v4 = vpop.f32.mrf.mxu1 }
 0x176   :  { %v1011_v5 = vpop.f32.mrf.mxu2 }
 0x177   :  { %v4712_v30 = vadd.f32 %v1286_v4, %v1011_v5  ;;  %v3644_v4 = vld [vmem:[#allocation5 + $0x218] sm:$0xf]  ;;  %v4038_v5 = vld [vmem:[#allocation5 + $0x220] sm:$0xf0] }
 0x178   :  { %v3645_v29 = vor.u32 %v4038_v5, %v3644_v4  ;;  %v4029_v4 = vld [vmem:[#allocation5 + $0x1d8] sm:$0xf0]  ;;  %v4738_v5 = vpop.f32.mrf.mxu3 }
 0x179   :  { %v4716_v38 = vpop.f32.mrf.mxu0  ;;  %v1289_v37 = vpop.f32.mrf.mxu1 }
 0x17a   :  { %1667 = vmatpush.bf16.msrb.mxu2 %v3645_v29 }
 0x17b   :  { %1337 = vmatmul.bf16.gmra.mxu2 %v4614_v54  ;;  %1386 = vmatmul.bf16.gmra.mxu3 %v4614_v54  ;;  %v3632_v54 = vld [vmem:[#allocation5 + $0x200] sm:$0xf] }
 0x17c   :  { %1596 = vmatmul.bf16.gmra.mxu0 %v4720_v8  ;;  %1645 = vmatmul.bf16.gmra.mxu1 %v4720_v8  ;;  %v3633_v28 = vor.u32 %v4035_v12, %v3632_v54  ;;  %v4740_v54 = vld [vmem:[#allocation2 + $0x28] sm:$0xff]  ;;  %v4026_v12 = vld [vmem:[#allocation5 + $0x1c0] sm:$0xf0] }
 0x17d   :  { %v3597_v18 = vor.u32 %v4026_v12, %v3596_v55 }
 0x17e   :  { %v1014_v60 = vpop.f32.mrf.mxu2  ;;  %1668 = vmatpush.bf16.msrb.mxu2 %v3633_v28 }
 0x17f   :  { %v4724_v46 = vadd.f32 %v1289_v37, %v1014_v60  ;;  %v3608_v60 = vld [vmem:[#allocation5 + $0x1d0] sm:$0xf] }
 0x180   :  { %v3609_v29 = vor.u32 %v4029_v4, %v3608_v60  ;;  %v4023_v60 = vld [vmem:[#allocation5 + $0x1a8] sm:$0xf0]  ;;  %v4750_v47 = vpop.f32.mrf.mxu3 }
 0x181   :  { %v4726_v1 = vpop.f32.mrf.mxu0  ;;  %v4728_v0 = vpop.f32.mrf.mxu1 }
 0x182   :  { %1669 = vmatpush.bf16.msrb.mxu2 %v3621_v59 }
 0x186   :  { %v4732_v32 = vpop.f32.mrf.mxu2  ;;  %1670 = vmatpush.bf16.msrb.mxu2 %v3609_v29  ;;  %v3572_v29 = vld [vmem:[#allocation5 + $0x188] sm:$0xf] }
 0x187   :  { %v3573_v17 = vor.u32 %v4020_v7, %v3572_v29  ;;  %v4778_v29 = vld [vmem:[#allocation2 + $0x38] sm:$0xff] }
 0x189   :  { %v4734_v26 = vpop.f32.mrf.mxu0  ;;  %v1294_v37 = vpop.f32.mrf.mxu1 }
 0x18a   :  { %1671 = vmatpush.bf16.msrb.mxu2 %v3597_v18  ;;  %v4764_v18 = vpop.f32.mrf.mxu3 }
 0x18b   :  { %1342 = vmatmul.bf16.gmra.mxu2 %v4631_v51  ;;  %1391 = vmatmul.bf16.gmra.mxu3 %v4631_v51  ;;  %v3584_v51 = vld [vmem:[#allocation5 + $0x1a0] sm:$0xf] }
 0x18c   :  { %1601 = vmatmul.bf16.gmra.mxu0 %v4740_v54  ;;  %1650 = vmatmul.bf16.gmra.mxu1 %v4740_v54  ;;  %v3585_v4 = vor.u32 %v4023_v60, %v3584_v51 }
 0x18e   :  { %v1019_v28 = vpop.f32.mrf.mxu2  ;;  %1672 = vmatpush.bf16.msrb.mxu2 %v3585_v4 }
 0x18f   :  { %v4744_v59 = vadd.f32 %v1294_v37, %v1019_v28  ;;  %v4758_v28 = vld [vmem:[#allocation2 + $0x30] sm:$0xff] }
 0x191   :  { %v4746_v25 = vpop.f32.mrf.mxu0  ;;  %v4748_v45 = vpop.f32.mrf.mxu1 }
 0x192   :  { %1673 = vmatpush.bf16.msrb.mxu2 %v3573_v17  ;;  %v4774_v4 = vpop.f32.mrf.mxu3 }
 0x196   :  { %v4752_v27 = vpop.f32.mrf.mxu2 }
 0x199   :  { %v4754_v15 = vpop.f32.mrf.mxu0  ;;  %v1299_v37 = vpop.f32.mrf.mxu1 }
 0x19b   :  { %1347 = vmatmul.bf16.gmra.mxu2 %v4644_v53  ;;  %1396 = vmatmul.bf16.gmra.mxu3 %v4644_v53 }
 0x19c   :  { %1606 = vmatmul.bf16.gmra.mxu0 %v4758_v28  ;;  %1655 = vmatmul.bf16.gmra.mxu1 %v4758_v28 }
 0x19e   :  { %v1024_v55 = vpop.f32.mrf.mxu2 }
 0x19f   :  { %v4762_v12 = vadd.f32 %v1299_v37, %v1024_v55 }
 0x1a1   :  { %v4766_v7 = vpop.f32.mrf.mxu0  ;;  %v4768_v51 = vpop.f32.mrf.mxu1 }
 0x1a6   :  { %v4770_v17 = vpop.f32.mrf.mxu2 }
 0x1a9   :  { %v4772_v60 = vpop.f32.mrf.mxu0  ;;  %v1304_v53 = vpop.f32.mrf.mxu1 }
 0x1aa   :  { %5476 = vst [vmem:[#allocation44_spill] sm:$0xff] %v4772_v60 }
 0x1ab   :  { %1352 = vmatmul.bf16.gmra.mxu2 %v4655_v52  ;;  %1401 = vmatmul.bf16.gmra.mxu3 %v4655_v52  ;;  %v4208_v52 = vld [vmem:[#allocation2] sm:$0xff] }
 0x1ac   :  { %1611 = vmatmul.bf16.gmra.mxu0 %v4778_v29  ;;  %1660 = vmatmul.bf16.gmra.mxu1 %v4778_v29 }
 0x1ae   :  { %v1029_v37 = vpop.f32.mrf.mxu2 }
 0x1af   :  { %v4782_v55 = vadd.f32 %v1304_v53, %v1029_v37 }
 0x1b1   :  { %v4784_v6 = vpop.f32.mrf.mxu0  ;;  %v4786_v24 = vpop.f32.mrf.mxu1 }
 0x1b2   :  { %5477 = vst [vmem:[#allocation45_spill] sm:$0xff] %v4784_v6 }
 0x1b3   :  { %5478 = vst [vmem:[#allocation46_spill] sm:$0xff] %v4786_v24 }
 0x1b6   :  { %v4788_v63 = vpop.f32.mrf.mxu2 }
 0x1b7   :  { %5479 = vst [vmem:[#allocation47_spill] sm:$0xff] %v4788_v63 }
 0x1b9   :  { %v1577_v62 = vpop.f32.mrf.mxu0  ;;  %v1626_v43 = vpop.f32.mrf.mxu1 }
 0x1ba   :  { %v1715_v14 = vadd.f32 %v1577_v62, %v4664_v11 }
 0x1bb   :  { %1674 = vmatmul.bf16.vlgmr.msrb.gmra.mxu2 %v4208_v52 }
 0x1bc   :  { %v1767_v34 = vadd.f32 %v4794_v20, %v1715_v14 }
 0x1be   :  { %v1318_v50 = vpop.f32.mrf.mxu2 }
 0x1bf   :  { %v1319_v49 = vadd.f32 %v1318_v50, %v4694_v23 }
 0x1c1   :  { %v1579_v53 = vpop.f32.mrf.mxu0  ;;  %v1716_v37 = vadd.f32 %v1626_v43, %v1319_v49  ;;  %v1628_v35 = vpop.f32.mrf.mxu1 }
 0x1c2   :  { %v1718_v33 = vadd.f32 %v1579_v53, %v4668_v41  ;;  %v4209_v53 = vld [vmem:[#allocation2 + $0x8] sm:$0xff] }
 0x1c3   :  { %v1804_v61 = vadd.f32 %v4792_v44, %v1716_v37  ;;  %v4805_v37 = vpop.f32.mrf.mxu3 }
 0x1c4   :  { %v1768_v11 = vadd.f32 %v4794_v20, %v1718_v33 }
 0x1c5   :  { %v1820_v6 = vmul.f32 0.0, %v1804_v61 }
 0x1c6   :  { %v1320_v62 = vpop.f32.mrf.mxu2  ;;  %v1784_v49 = vmul.f32 0.0, %v1768_v11 }
 0x1c7   :  { %v4800_v52 = vadd.f32 %v1820_v6, %v1767_v34  ;;  %v1321_v50 = vadd.f32 %v1320_v62, %v4706_v58 }
 0x1c9   :  { %v1582_v23 = vpop.f32.mrf.mxu0  ;;  %v1719_v24 = vadd.f32 %v1628_v35, %v1321_v50  ;;  %v1631_v63 = vpop.f32.mrf.mxu1 }
 0x1ca   :  { %v1721_v43 = vadd.f32 %v1582_v23, %v4676_v42 }
 0x1cb   :  { %v1805_v41 = vadd.f32 %v4792_v44, %v1719_v24  ;;  %1679 = vmatmul.bf16.gmra.mxu2 %v4209_v53  ;;  %v4815_v50 = vpop.f32.mrf.mxu3 }
 0x1cc   :  { %v1769_v34 = vadd.f32 %v4794_v20, %v1721_v43 }
 0x1cd   :  { %v4807_v14 = vadd.f32 %v1805_v41, %v1784_v49 }
 0x1ce   :  { %v1323_v61 = vpop.f32.mrf.mxu2  ;;  %v1785_v62 = vmul.f32 0.0, %v1769_v34 }
 0x1cf   :  { %v1324_v6 = vadd.f32 %v1323_v61, %v4714_v16 }
 0x1d1   :  { %v1584_v33 = vpop.f32.mrf.mxu0  ;;  %v1722_v58 = vadd.f32 %v1631_v63, %v1324_v6  ;;  %v1633_v35 = vpop.f32.mrf.mxu1 }
 0x1d2   :  { %v1724_v11 = vadd.f32 %v1584_v33, %v4680_v10 }
 0x1d3   :  { %v1806_v42 = vadd.f32 %v4792_v44, %v1722_v58 }
 0x1d4   :  { %v1770_v41 = vadd.f32 %v4794_v20, %v1724_v11 }
 0x1d5   :  { %v4813_v24 = vadd.f32 %v1806_v42, %v1785_v62  ;;  %v4825_v62 = vpop.f32.mrf.mxu3 }
 0x1d6   :  { %v1325_v23 = vpop.f32.mrf.mxu2  ;;  %v1786_v34 = vmul.f32 0.0, %v1770_v41 }
 0x1d7   :  { %v1326_v49 = vadd.f32 %v1325_v23, %v4730_v48 }
 0x1d9   :  { %v1587_v43 = vpop.f32.mrf.mxu0  ;;  %v1725_v53 = vadd.f32 %v1633_v35, %v1326_v49  ;;  %v1636_v16 = vpop.f32.mrf.mxu1 }
 0x1da   :  { %v1727_v63 = vadd.f32 %v1587_v43, %v4690_v31 }
 0x1db   :  { %v1807_v61 = vadd.f32 %v4792_v44, %v1725_v53  ;;  %1684 = vmatmul.bf16.gmra.mxu2 %v4686_v57 }
 0x1dc   :  { %v1771_v48 = vadd.f32 %v4794_v20, %v1727_v63 }
 0x1dd   :  { %v1823_v10 = vmul.f32 0.0, %v1807_v61  ;;  %v4834_v63 = vpop.f32.mrf.mxu3 }
 0x1de   :  { %v1328_v6 = vpop.f32.mrf.mxu2  ;;  %v1787_v23 = vmul.f32 0.0, %v1771_v48 }
 0x1df   :  { %v4822_v33 = vadd.f32 %v1823_v10, %v1786_v34  ;;  %v1329_v58 = vadd.f32 %v1328_v6, %v4738_v5 }
 0x1e1   :  { %v1589_v42 = vpop.f32.mrf.mxu0  ;;  %v1728_v35 = vadd.f32 %v1636_v16, %v1329_v58  ;;  %v1638_v11 = vpop.f32.mrf.mxu1 }
 0x1e2   :  { %v1730_v49 = vadd.f32 %v1589_v42, %v4696_v40 }
 0x1e3   :  { %v1808_v31 = vadd.f32 %v4792_v44, %v1728_v35 }
 0x1e4   :  { %v1772_v5 = vadd.f32 %v4794_v20, %v1730_v49 }
 0x1e5   :  { %v1824_v57 = vmul.f32 0.0, %v1808_v31 }
 0x1e6   :  { %v1330_v41 = vpop.f32.mrf.mxu2  ;;  %v1788_v40 = vmul.f32 0.0, %v1772_v5 }
 0x1e7   :  { %v4830_v43 = vadd.f32 %v1824_v57, %v1787_v23  ;;  %v1331_v53 = vadd.f32 %v1330_v41, %v4750_v47  ;;  %v1073_v57 = vpop.f32.mrf.mxu3 }
 0x1e9   :  { %v1592_v61 = vpop.f32.mrf.mxu0  ;;  %v1731_v34 = vadd.f32 %v1638_v11, %v1331_v53  ;;  %v1641_v10 = vpop.f32.mrf.mxu1 }
 0x1ea   :  { %v1733_v16 = vadd.f32 %v1592_v61, %v4708_v3 }
 0x1eb   :  { %v1809_v6 = vadd.f32 %v4792_v44, %v1731_v34  ;;  %1689 = vmatmul.bf16.gmra.mxu2 %v4702_v39 }
 0x1ec   :  { %v1773_v35 = vadd.f32 %v4794_v20, %v1733_v16 }
 0x1ed   :  { %v1825_v58 = vmul.f32 0.0, %v1809_v6 }
 0x1ee   :  { %v1333_v48 = vpop.f32.mrf.mxu2  ;;  %v1789_v3 = vmul.f32 0.0, %v1773_v35 }
 0x1ef   :  { %v4839_v42 = vadd.f32 %v1825_v58, %v1788_v40  ;;  %v1334_v47 = vadd.f32 %v1333_v48, %v4764_v18 }
 0x1f1   :  { %v1594_v31 = vpop.f32.mrf.mxu0  ;;  %v1734_v11 = vadd.f32 %v1641_v10, %v1334_v47  ;;  %v1643_v23 = vpop.f32.mrf.mxu1 }
 0x1f2   :  { %v1736_v41 = vadd.f32 %v1594_v31, %v4712_v30  ;;  %v4852_v30 = vpop.f32.mrf.mxu3 }
 0x1f3   :  { %v1810_v49 = vadd.f32 %v4792_v44, %v1734_v11 }
 0x1f4   :  { %v1774_v34 = vadd.f32 %v4794_v20, %v1736_v41 }
 0x1f5   :  { %v1826_v53 = vmul.f32 0.0, %v1810_v49 }
 0x1f6   :  { %v1335_v39 = vpop.f32.mrf.mxu2  ;;  %v1790_v58 = vmul.f32 0.0, %v1774_v34 }
 0x1f7   :  { %v4845_v5 = vadd.f32 %v1826_v53, %v1789_v3  ;;  %v1336_v61 = vadd.f32 %v1335_v39, %v4774_v4 }
 0x1f9   :  { %v1597_v18 = vpop.f32.mrf.mxu0  ;;  %v1737_v6 = vadd.f32 %v1643_v23, %v1336_v61  ;;  %v1646_v16 = vpop.f32.mrf.mxu1 }
 0x1fa   :  { %v1739_v10 = vadd.f32 %v1597_v18, %v4724_v46  ;;  %v1078_v39 = vpop.f32.mrf.mxu3 }
 0x1fb   :  { %v1811_v40 = vadd.f32 %v4792_v44, %v1737_v6  ;;  %1694 = vmatmul.bf16.gmra.mxu2 %v4720_v8 }
 0x1fc   :  { %v1775_v31 = vadd.f32 %v4794_v20, %v1739_v10 }
 0x1fd   :  { %v1827_v48 = vmul.f32 0.0, %v1811_v40 }
 0x1fe   :  { %v1338_v47 = vpop.f32.mrf.mxu2  ;;  %v1791_v3 = vmul.f32 0.0, %v1775_v31 }
 0x1ff   :  { %v4854_v35 = vadd.f32 %v1827_v48, %v1790_v58  ;;  %v1339_v4 = vadd.f32 %v1338_v47, %v4805_v37 }
 0x201   :  { %v4858_v11 = vpop.f32.mrf.mxu0  ;;  %v1740_v23 = vadd.f32 %v1646_v16, %v1339_v4  ;;  %v4860_v49 = vpop.f32.mrf.mxu1 }
 0x202   :  { %v4875_v48 = vpop.f32.mrf.mxu3 }
 0x203   :  { %v1812_v46 = vadd.f32 %v4792_v44, %v1740_v23  ;;  %5480 = vst [vmem:[#allocation48_spill] sm:$0xff] %v4875_v48 }
 0x205   :  { %v1828_v8 = vmul.f32 0.0, %v1812_v46 }
 0x206   :  { %v4863_v41 = vpop.f32.mrf.mxu2 }
 0x207   :  { %v4865_v53 = vadd.f32 %v1828_v8, %v1791_v3 }
 0x209   :  { %v1602_v61 = vpop.f32.mrf.mxu0  ;;  %v1651_v34 = vpop.f32.mrf.mxu1 }
 0x20a   :  { %v1745_v37 = vadd.f32 %v1602_v61, %v4744_v59 }
 0x20b   :  { %1699 = vmatmul.bf16.gmra.mxu2 %v4740_v54 }
 0x20c   :  { %v1777_v16 = vadd.f32 %v4794_v20, %v1745_v37 }
 0x20e   :  { %v1343_v18 = vpop.f32.mrf.mxu2  ;;  %v1793_v4 = vmul.f32 0.0, %v1777_v16 }
 0x20f   :  { %v1344_v6 = vadd.f32 %v1343_v18, %v4825_v62  ;;  %v1367_v62 = vpop.f32.mrf.mxu3 }
 0x211   :  { %v4871_v10 = vpop.f32.mrf.mxu0  ;;  %v1746_v40 = vadd.f32 %v1651_v34, %v1344_v6  ;;  %v4873_v58 = vpop.f32.mrf.mxu1 }
 0x213   :  { %v1814_v47 = vadd.f32 %v4792_v44, %v1746_v40 }
 0x215   :  { %v1830_v31 = vmul.f32 0.0, %v1814_v47 }
 0x216   :  { %v4878_v23 = vpop.f32.mrf.mxu2 }
 0x217   :  { %v4880_v54 = vadd.f32 %v1830_v31, %v1793_v4  ;;  %v1369_v4 = vpop.f32.mrf.mxu3 }
 0x219   :  { %v1607_v59 = vpop.f32.mrf.mxu0  ;;  %v1656_v46 = vpop.f32.mrf.mxu1 }
 0x21a   :  { %v1751_v3 = vadd.f32 %v1607_v59, %v4762_v12 }
 0x21b   :  { %1704 = vmatmul.bf16.gmra.mxu2 %v4758_v28 }
 0x21c   :  { %v1779_v34 = vadd.f32 %v4794_v20, %v1751_v3 }
 0x21e   :  { %v1348_v8 = vpop.f32.mrf.mxu2  ;;  %v1795_v40 = vmul.f32 0.0, %v1779_v34 }
 0x21f   :  { %v1349_v61 = vadd.f32 %v1348_v8, %v1073_v57 }
 0x221   :  { %v4885_v37 = vpop.f32.mrf.mxu0  ;;  %v1752_v18 = vadd.f32 %v1656_v46, %v1349_v61  ;;  %v4888_v16 = vpop.f32.mrf.mxu1 }
 0x222   :  { %v1372_v46 = vpop.f32.mrf.mxu3 }
 0x223   :  { %v1816_v6 = vadd.f32 %v4792_v44, %v1752_v18 }
 0x225   :  { %v1832_v47 = vmul.f32 0.0, %v1816_v6 }
 0x226   :  { %v4890_v31 = vpop.f32.mrf.mxu2 }
 0x227   :  { %v4892_v28 = vadd.f32 %v1832_v47, %v1795_v40 }
 0x229   :  { %5481 = vst [vmem:[#allocation49_spill] sm:$0xff] %v4892_v28  ;;  %v1612_v60 = vpop.f32.mrf.mxu0  ;;  %v1661_v59 = vpop.f32.mrf.mxu1  ;;  %v4903_v28 = vld [vmem:[#allocation7 + $0x2] ss:$0 sm:$0xff] }
 0x22a   :  { %v1757_v12 = vadd.f32 %v1612_v60, %v4782_v55  ;;  %v1374_v47 = vpop.f32.mrf.mxu3 }
 0x22b   :  { %1709 = vmatmul.bf16.gmra.mxu2 %v4778_v29  ;;  %v1368_v29 = vadd.f32 %v1367_v62, %v4658_v56 }
 0x22c   :  { %v1781_v8 = vadd.f32 %v4794_v20, %v1757_v12 }
 0x22e   :  { %v1353_v57 = vpop.f32.mrf.mxu2  ;;  %v1797_v18 = vmul.f32 0.0, %v1781_v8 }
 0x22f   :  { %v1354_v3 = vadd.f32 %v1353_v57, %v1078_v39 }
 0x231   :  { %v1758_v61 = vadd.f32 %v1661_v59, %v1354_v3  ;;  %v1370_v59 = vadd.f32 %v1369_v4, %v4666_v13 }
 0x232   :  { %v1377_v12 = vpop.f32.mrf.mxu3 }
 0x233   :  { %v1818_v34 = vadd.f32 %v4792_v44, %v1758_v61 }
 0x235   :  { %v1834_v6 = vmul.f32 0.0, %v1818_v34 }
 0x236   :  { %v4898_v48 = vpop.f32.mrf.mxu2 }
 0x237   :  { %v4900_v40 = vadd.f32 %v1834_v6, %v1797_v18  ;;  %v1373_v6 = vadd.f32 %v1372_v46, %v4670_v2  ;;  %v1378_v46 = vadd.f32 %v1377_v12, %v4682_v21 }
 0x239   :  { %5482 = vst [vmem:[#allocation50_spill] sm:$0xff] %v4900_v40 }
 0x23a   :  { %v1379_v62 = vpop.f32.mrf.mxu3 }
 0x23e   :  { %v1675_v60 = vpop.f32.mrf.mxu2 }
 0x23f   :  { %v1717_v55 = vadd.f32 %v1675_v60, %v1368_v29 }
 0x241   :  { %v1857_v39 = vadd.f32 %v4903_v28, %v1717_v55 }
 0x243   :  { %v1873_v57 = vmul.f32 0.0, %v1857_v39 }
 0x245   :  { %v1889_v3 = vadd.f32 %v1873_v57, %v4800_v52  ;;  %v1375_v52 = vadd.f32 %v1374_v47, %v4678_v22 }
 0x246   :  { %v1677_v8 = vpop.f32.mrf.mxu2 }
 0x247   :  { %v1720_v61 = vadd.f32 %v1677_v8, %v1370_v59  ;;  %v1905_v29 = vmax.f32 %v1889_v3, 0.0 }
 0x249   :  { %v1858_v34 = vadd.f32 %v4903_v28, %v1720_v61  ;;  %v1382_v61 = vpop.f32.mrf.mxu3 }
 0x24a   :  { %v1383_v12 = vadd.f32 %v1382_v61, %v4698_v9 }
 0x24b   :  { %v1874_v18 = vmul.f32 0.0, %v1858_v34 }
 0x24d   :  { %v1890_v56 = vadd.f32 %v1874_v18, %v4807_v14 }
 0x24e   :  { %v1680_v40 = vpop.f32.mrf.mxu2 }
 0x24f   :  { %v1906_v60 = vmax.f32 %v1890_v56, 0.0  ;;  %v1723_v55 = vadd.f32 %v1680_v40, %v1373_v6 }
 0x251   :  { %v4911_v39 = vpack.c.bf16 %v1906_v60, %v1905_v29  ;;  %v1859_v13 = vadd.f32 %v4903_v28, %v1723_v55  ;;  %v1384_v22 = vpop.f32.mrf.mxu3 }
 0x253   :  { %v1875_v4 = vmul.f32 0.0, %v1859_v13 }
 0x255   :  { %v1891_v57 = vadd.f32 %v1875_v4, %v4813_v24  ;;  %v1380_v24 = vadd.f32 %v1379_v62, %v4692_v36 }
 0x256   :  { %v1682_v59 = vpop.f32.mrf.mxu2 }
 0x257   :  { %v1726_v8 = vadd.f32 %v1682_v59, %v1375_v52  ;;  %v1907_v3 = vmax.f32 %v1891_v57, 0.0 }
 0x259   :  { %v1860_v2 = vadd.f32 %v4903_v28, %v1726_v8  ;;  %v1387_v21 = vpop.f32.mrf.mxu3 }
 0x25b   :  { %v1892_v14 = vadd.f32 %v1860_v2, %v4822_v33 }
 0x25d   :  { %v1908_v40 = vmax.f32 %v1892_v14, 0.0 }
 0x25e   :  { %v1685_v34 = vpop.f32.mrf.mxu2 }
 0x25f   :  { %v4919_v18 = vpack.c.bf16 %v1908_v40, %v1907_v3  ;;  %v1729_v6 = vadd.f32 %v1685_v34, %v1378_v46  ;;  %v1388_v34 = vadd.f32 %v1387_v21, %v4716_v38 }
 0x261   :  { %v1861_v56 = vadd.f32 %v4903_v28, %v1729_v6  ;;  %v1389_v46 = vpop.f32.mrf.mxu3 }
 0x263   :  { %v1877_v47 = vmul.f32 0.0, %v1861_v56  ;;  %v1292_v56 = vadd.f32 %v4728_v0, %v4732_v32  ;;  %v1390_v32 = vadd.f32 %v1389_v46, %v4726_v1  ;;  %v1297_v1 = vadd.f32 %v4748_v45, %v4752_v27 }
 0x265   :  { %v1893_v29 = vadd.f32 %v1877_v47, %v4830_v43  ;;  %v1385_v43 = vadd.f32 %v1384_v22, %v4710_v19  ;;  %v1748_v46 = vadd.f32 %v4871_v10, %v1297_v1  ;;  %v1351_v10 = vadd.f32 %v4890_v31, %v4852_v30  ;;  %v5487_v1 = vld [vmem:[#allocation46_spill] sm:$0xff] }
 0x266   :  { %v1687_v60 = vpop.f32.mrf.mxu2 }
 0x267   :  { %v1732_v55 = vadd.f32 %v1687_v60, %v1380_v24  ;;  %v1909_v57 = vmax.f32 %v1893_v29, 0.0  ;;  %v1742_v60 = vadd.f32 %v4858_v11, %v1292_v56 }
 0x269   :  { %v1862_v33 = vadd.f32 %v4903_v28, %v1732_v55  ;;  %v1392_v29 = vpop.f32.mrf.mxu3 }
 0x26b   :  { %v1878_v13 = vmul.f32 0.0, %v1862_v33 }
 0x26d   :  { %v1894_v4 = vadd.f32 %v1878_v13, %v4839_v42  ;;  %v1341_v42 = vadd.f32 %v4863_v41, %v4815_v50 }
 0x26e   :  { %v1690_v52 = vpop.f32.mrf.mxu2 }
 0x26f   :  { %v1910_v59 = vmax.f32 %v1894_v4, 0.0  ;;  %v1735_v8 = vadd.f32 %v1690_v52, %v1383_v12  ;;  %v1743_v19 = vadd.f32 %v4860_v49, %v1341_v42  ;;  %v1346_v52 = vadd.f32 %v4878_v23, %v4834_v63 }
 0x271   :  { %v4927_v2 = vpack.c.bf16 %v1910_v59, %v1909_v57  ;;  %v1863_v36 = vadd.f32 %v4903_v28, %v1735_v8  ;;  %v1813_v38 = vadd.f32 %v4792_v44, %v1743_v19  ;;  %v1394_v11 = vpop.f32.mrf.mxu3  ;;  %v1393_v59 = vadd.f32 %v1392_v29, %v4734_v26 }
 0x272   :  { %v1778_v26 = vadd.f32 %v4794_v20, %v1748_v46  ;;  %v1755_v29 = vadd.f32 %v4888_v16, %v1351_v10 }
 0x273   :  { %v1879_v62 = vmul.f32 0.0, %v1863_v36  ;;  %v1829_v33 = vmul.f32 0.0, %v1813_v38 }
 0x274   :  { %v1817_v30 = vadd.f32 %v4792_v44, %v1755_v29 }
 0x275   :  { %v1895_v14 = vadd.f32 %v1879_v62, %v4845_v5 }
 0x276   :  { %v1692_v3 = vpop.f32.mrf.mxu2 }
 0x277   :  { %v1738_v40 = vadd.f32 %v1692_v3, %v1385_v43  ;;  %v1911_v5 = vmax.f32 %v1895_v14, 0.0 }
 0x279   :  { %v1864_v9 = vadd.f32 %v4903_v28, %v1738_v40  ;;  %v1397_v23 = vpop.f32.mrf.mxu3 }
 0x27a   :  { %v1398_v19 = vadd.f32 %v1397_v23, %v4754_v15 }
 0x27b   :  { %v1880_v61 = vmul.f32 0.0, %v1864_v9  ;;  %v1395_v9 = vadd.f32 %v1394_v11, %v4746_v25  ;;  %v1302_v25 = vadd.f32 %v4768_v51, %v4770_v17  ;;  %v1833_v17 = vmul.f32 0.0, %v1817_v30  ;;  %v4216_v30 = vld [vmem:[%s5407_s1 + $0x18] sm:$0xff] }
 0x27d   :  { %v1896_v6 = vadd.f32 %v1880_v61, %v4854_v35  ;;  %v1776_v35 = vadd.f32 %v4794_v20, %v1742_v60  ;;  %v1794_v61 = vmul.f32 0.0, %v1778_v26 }
 0x27e   :  { %v1695_v47 = vpop.f32.mrf.mxu2 }
 0x27f   :  { %v1912_v22 = vmax.f32 %v1896_v6, 0.0  ;;  %v1741_v24 = vadd.f32 %v1695_v47, %v1388_v34  ;;  %v1792_v21 = vmul.f32 0.0, %v1776_v35 }
 0x281   :  { %v4941_v55 = vpack.c.bf16 %v1912_v22, %v1911_v5  ;;  %v1865_v50 = vadd.f32 %v4903_v28, %v1741_v24  ;;  %v1845_v4 = vadd.f32 %v1829_v33, %v1792_v21  ;;  %v1399_v22 = vpop.f32.mrf.mxu3 }
 0x282   :  { %v1400_v31 = vadd.f32 %v1399_v22, %v4766_v7  ;;  %v5486_v7 = vld [vmem:[#allocation47_spill] sm:$0xff] }
 0x283   :  { %v1881_v41 = vmul.f32 0.0, %v1865_v50 }
 0x285   :  { %v1897_v0 = vadd.f32 %v1881_v41, %v4865_v53  ;;  %v1749_v53 = vadd.f32 %v4873_v58, %v1346_v52  ;;  %v1754_v41 = vadd.f32 %v4885_v37, %v1302_v25  ;;  %v5483_v37 = vld [vmem:[#allocation48_spill] sm:$0xff]  ;;  %v1663_v52 = vpop.f32.mrf.mxu1 }
 0x286   :  { %v1697_v49 = vpop.f32.mrf.mxu2  ;;  %v1356_v21 = vadd.f32 %v4898_v48, %v5483_v37 }
 0x287   :  { %v1744_v13 = vadd.f32 %v1697_v49, %v1390_v32  ;;  %v1913_v62 = vmax.f32 %v1897_v0, 0.0  ;;  %v1815_v40 = vadd.f32 %v4792_v44, %v1749_v53  ;;  %v1780_v15 = vadd.f32 %v4794_v20, %v1754_v41  ;;  %v1614_v53 = vpop.f32.mrf.mxu0  ;;  %v4215_v41 = vld [vmem:[%s5407_s1 + $0x50] sm:$0xff] }
 0x289   :  { %v1866_v12 = vadd.f32 %v4903_v28, %v1744_v13  ;;  %v1831_v45 = vmul.f32 0.0, %v1815_v40  ;;  %v1402_v16 = vpop.f32.mrf.mxu3  ;;  %v1796_v49 = vmul.f32 0.0, %v1780_v15  ;;  %v4218_v15 = vld [vmem:[%s5407_s1 + $0x20] sm:$0xff] }
 0x28b   :  { %v1882_v57 = vmul.f32 0.0, %v1866_v12  ;;  %v1847_v6 = vadd.f32 %v1831_v45, %v1794_v61  ;;  %v1849_v13 = vadd.f32 %v1833_v17, %v1796_v49  ;;  %v5484_v12 = vld [vmem:[#allocation49_spill] sm:$0xff] }
 0x28c   :  { %v5488_v45 = vld [vmem:[#allocation45_spill] sm:$0xff] }
 0x28d   :  { %v1898_v8 = vadd.f32 %v1882_v57, %v1845_v4  ;;  %v5485_v57 = vld [vmem:[#allocation44_spill] sm:$0xff]  ;;  %v4088_v17 = vld [vmem:[#allocation5 + $0x3b0] sm:$0xf0]  ;;  %v3752_v49 = vld [vmem:[#allocation5 + $0x3b0] sm:$0xf] }
 0x28e   :  { %v1700_v36 = vpop.f32.mrf.mxu2 }
 0x28f   :  { %v1914_v43 = vmax.f32 %v1898_v8, 0.0  ;;  %v1747_v14 = vadd.f32 %v1700_v36, %v1393_v59  ;;  %v1403_v59 = vadd.f32 %v1402_v16, %v5485_v57  ;;  %v1307_v36 = vadd.f32 %v5487_v1, %v5486_v7  ;;  %v3746_v16 = vld [vmem:[#allocation5 + $0x3b4] sm:$0xf0]  ;;  %v3840_v1 = vld [vmem:[#allocation5 + $0x2e8] sm:$0xf] }
 0x290   :  { %v3740_v57 = vld [vmem:[#allocation5 + $0x398] sm:$0xf] }
 0x291   :  { %v4956_v3 = vpack.c.bf16 %v1914_v43, %v1913_v62  ;;  %v1867_v63 = vadd.f32 %v4903_v28, %v1747_v14  ;;  %v1761_v43 = vadd.f32 %v1663_v52, %v1356_v21  ;;  %v1404_v48 = vpop.f32.mrf.mxu3  ;;  %v3732_v21 = vld [vmem:[#allocation5 + $0x390] sm:$0xf]  ;;  %v3734_v52 = vld [vmem:[#allocation5 + $0x39c] sm:$0xf0] }
 0x293   :  { %v1883_v42 = vmul.f32 0.0, %v1867_v63  ;;  %v1760_v63 = vadd.f32 %v1614_v53, %v1307_v36  ;;  %v1819_v26 = vadd.f32 %v4792_v44, %v1761_v43  ;;  %v4064_v36 = vld [vmem:[#allocation5 + $0x2f0] sm:$0xf0]  ;;  %v4220_v53 = vld [vmem:[%s5407_s1 + $0x28] sm:$0xff] }
 0x294   :  { %v3841_v43 = vor.u32 %v4064_v36, %v3840_v1  ;;  %v4070_v1 = vld [vmem:[#allocation5 + $0x320] sm:$0xf0]  ;;  %v4069_v36 = vld [vmem:[#allocation5 + $0x31c] sm:$0xf] }
 0x295   :  { %v1899_v56 = vadd.f32 %v1883_v42, %v4880_v54  ;;  %v1405_v42 = vadd.f32 %v1404_v48, %v5488_v45  ;;  %v1835_v61 = vmul.f32 0.0, %v1819_v26  ;;  %v3722_v48 = vld [vmem:[#allocation5 + $0x384] sm:$0xf0]  ;;  %v3728_v26 = vld [vmem:[#allocation5 + $0x380] sm:$0xf] }
 0x296   :  { %v1702_v27 = vpop.f32.mrf.mxu2 }
 0x297   :  { %v1750_v58 = vadd.f32 %v1702_v27, %v1395_v9  ;;  %v1915_v60 = vmax.f32 %v1899_v56, 0.0  ;;  %v1782_v27 = vadd.f32 %v4794_v20, %v1760_v63  ;;  %v4210_v20 = vld [vmem:[%s5407_s1] sm:$0xff] }
 0x299   :  { %v1868_v34 = vadd.f32 %v4903_v28, %v1750_v58  ;;  %v1798_v10 = vmul.f32 0.0, %v1782_v27 }
 0x29b   :  { %v1884_v47 = vmul.f32 0.0, %v1868_v34 }
 0x29d   :  { %v1900_v5 = vadd.f32 %v1884_v47, %v1847_v6  ;;  %v1851_v47 = vadd.f32 %v1835_v61, %v1798_v10  ;;  %v3708_v61 = vld [vmem:[#allocation5 + $0x360] sm:$0xf]  ;;  %v4078_v10 = vld [vmem:[#allocation5 + $0x364] sm:$0xf] }
 0x29e   :  { %v1705_v24 = vpop.f32.mrf.mxu2 }
 0x29f   :  { %v1916_v50 = vmax.f32 %v1900_v5, 0.0  ;;  %v1753_v38 = vadd.f32 %v1705_v24, %v1398_v19  ;;  %v5489_v19 = vld [vmem:[#allocation50_spill] sm:$0xff] }
 0x2a1   :  { %v4971_v35 = vpack.c.bf16 %v1916_v50, %v1915_v60  ;;  %v1869_v54 = vadd.f32 %v4903_v28, %v1753_v38  ;;  %v4212_v60 = vld [vmem:[%s5407_s1 + $0x8] sm:$0xff]  ;;  %v4214_v38 = vld [vmem:[%s5407_s1 + $0x10] sm:$0xff] }
 0x2a2   :  { %v4213_v50 = vld [vmem:[%s5407_s1 + $0x48] sm:$0xff] }
 0x2a3   :  { %v1885_v32 = vmul.f32 0.0, %v1869_v54  ;;  %v4217_v54 = vld [vmem:[%s5407_s1 + $0x58] sm:$0xff] }
 0x2a5   :  { %v1901_v11 = vadd.f32 %v1885_v32, %v5484_v12  ;;  %v4087_v32 = vld [vmem:[#allocation5 + $0x3ac] sm:$0xf]  ;;  %v4085_v12 = vld [vmem:[#allocation5 + $0x398] sm:$0xf0] }
 0x2a6   :  { %v1707_v51 = vpop.f32.mrf.mxu2 }
 0x2a7   :  { %v1756_v0 = vadd.f32 %v1707_v51, %v1400_v31  ;;  %v1917_v14 = vmax.f32 %v1901_v11, 0.0  ;;  %v4219_v31 = vld [vmem:[%s5407_s1 + $0x60] sm:$0xff]  ;;  %v3744_v51 = vld [vmem:[#allocation5 + $0x3a8] sm:$0xf]  ;;  %v4084_v11 = vld [vmem:[#allocation5 + $0x394] sm:$0xf] }
 0x2a9   :  { %v1870_v33 = vadd.f32 %v4903_v28, %v1756_v0  ;;  %v3745_v0 = vor.u32 %v4088_v17, %v3744_v51  ;;  %v3804_v51 = vld [vmem:[#allocation5 + $0x2a0] sm:$0xf]  ;;  %v4055_v17 = vld [vmem:[#allocation5 + $0x2a8] sm:$0xf0] }
 0x2ab   :  { %v1886_v4 = vmul.f32 0.0, %v1870_v33  ;;  %v4089_v33 = vld [vmem:[#allocation5 + $0x3b8] sm:$0xf0]  ;;  %2269 = vmatpush.bf16.msrb.mxu1 %v3745_v0  ;;  %v3684_v0 = vld [vmem:[#allocation5 + $0x330] sm:$0xf] }
 0x2ac   :  { %v3753_v37 = vor.u32 %v4089_v33, %v3752_v49  ;;  %v4072_v49 = vld [vmem:[#allocation5 + $0x334] sm:$0xf] }
 0x2ad   :  { %v1902_v8 = vadd.f32 %v1886_v4, %v1849_v13  ;;  %v3749_v13 = vor.u32 %v4087_v32, %v3746_v16  ;;  %v3733_v4 = vor.u32 %v4085_v12, %v3732_v21  ;;  %v3805_v32 = vor.u32 %v4055_v17, %v3804_v51  ;;  %v4073_v16 = vld [vmem:[#allocation5 + $0x338] sm:$0xf0]  ;;  %v4074_v21 = vld [vmem:[#allocation5 + $0x340] sm:$0xf0] }
 0x2ae   :  { %v1710_v62 = vpop.f32.mrf.mxu2  ;;  %v3685_v33 = vor.u32 %v4073_v16, %v3684_v0  ;;  %v5493_v17 = vld [vmem:[#allocation28_spill] sm:$0xff] }
 0x2af   :  { %v1918_v46 = vmax.f32 %v1902_v8, 0.0  ;;  %v1759_v40 = vadd.f32 %v1710_v62, %v1403_v59  ;;  %v4086_v59 = vld [vmem:[#allocation5 + $0x3a0] sm:$0xf0]  ;;  %2318 = vmatpush.bf16.msra.mxu2 %v3749_v13  ;;  %v3737_v8 = vor.u32 %v4084_v11, %v3734_v52  ;;  %2270 = vmatpush.bf16.msrb.mxu1 %v3733_v4  ;;  %v4221_v62 = vld [vmem:[%s5407_s1 + $0x68] sm:$0xff]  ;;  %v3686_v13 = vld [vmem:[#allocation5 + $0x33c] sm:$0xf0] }
 0x2b0   :  { %v3741_v7 = vor.u32 %v4086_v59, %v3740_v57  ;;  %v3689_v12 = vor.u32 %v4072_v49, %v3686_v13  ;;  %v3792_v4 = vld [vmem:[#allocation5 + $0x288] sm:$0xf]  ;;  %v4052_v52 = vld [vmem:[#allocation5 + $0x290] sm:$0xf0] }
 0x2b1   :  { %v4984_v23 = vpack.c.bf16 %v1918_v46, %v1917_v14  ;;  %v1871_v9 = vadd.f32 %v4903_v28, %v1759_v40  ;;  %v3720_v14 = vld [vmem:[#allocation5 + $0x378] sm:$0xf]  ;;  %v4082_v46 = vld [vmem:[#allocation5 + $0x380] sm:$0xf0]  ;;  %v4081_v40 = vld [vmem:[#allocation5 + $0x37c] sm:$0xf] }
 0x2b2   :  { %v3721_v63 = vor.u32 %v4082_v46, %v3720_v14  ;;  %v3725_v27 = vor.u32 %v4081_v40, %v3722_v48  ;;  %v4222_v57 = vld [vmem:[%s5407_s1 + $0x30] sm:$0xff]  ;;  %v4071_v14 = vld [vmem:[#allocation5 + $0x328] sm:$0xf0]  ;;  %v4049_v48 = vld [vmem:[#allocation5 + $0x278] sm:$0xf0] }
 0x2b3   :  { %v1887_v34 = vmul.f32 0.0, %v1871_v9  ;;  %2319 = vmatpush.bf16.msra.mxu2 %v3737_v8  ;;  %v4083_v9 = vld [vmem:[#allocation5 + $0x388] sm:$0xf0]  ;;  %v4223_v59 = vld [vmem:[%s5407_s1 + $0x70] sm:$0xff]  ;;  %v3793_v8 = vor.u32 %v4052_v52, %v3792_v4 }
 0x2b4   :  { %v3729_v45 = vor.u32 %v4083_v9, %v3728_v26  ;;  %2271 = vmatpush.bf16.msrb.mxu1 %v3721_v63  ;;  %v3780_v63 = vld [vmem:[#allocation5 + $0x270] sm:$0xf]  ;;  %v3660_v9 = vld [vmem:[#allocation5 + $0x300] sm:$0xf]  ;;  %v5496_v52 = vld [vmem:[#allocation30_spill] sm:$0xff] }
 0x2b5   :  { %v1903_v5 = vadd.f32 %v1887_v34, %v5489_v19  ;;  %v3781_v26 = vor.u32 %v4049_v48, %v3780_v63  ;;  %v5494_v13 = vld [vmem:[#allocation13_spill] sm:$0xff]  ;;  %v5500_v48 = vld [vmem:[#allocation32_spill] sm:$0xff] }
 0x2b6   :  { %v1712_v58 = vpop.f32.mrf.mxu2 }
 0x2b7   :  { %v1762_v6 = vadd.f32 %v1712_v58, %v1405_v42  ;;  %v1919_v24 = vmax.f32 %v1903_v5, 0.0  ;;  %v3828_v42 = vld [vmem:[#allocation5 + $0x2d0] sm:$0xf]  ;;  %v4061_v58 = vld [vmem:[#allocation5 + $0x2d8] sm:$0xf0]  ;;  %2320 = vmatpush.bf16.msra.mxu2 %v3725_v27 }
 0x2b8   :  { %v3829_v34 = vor.u32 %v4061_v58, %v3828_v42  ;;  %v3716_v5 = vld [vmem:[#allocation5 + $0x368] sm:$0xf]  ;;  %v4067_v27 = vld [vmem:[#allocation5 + $0x308] sm:$0xf0]  ;;  %v3662_v58 = vld [vmem:[#allocation5 + $0x30c] sm:$0xf0] }
 0x2b9   :  { %v1872_v56 = vadd.f32 %v4903_v28, %v1762_v6  ;;  %v4211_v28 = vld [vmem:[%s5407_s1 + $0x40] sm:$0xff]  ;;  %v4079_v6 = vld [vmem:[#allocation5 + $0x368] sm:$0xf0]  ;;  %v3661_v42 = vor.u32 %v4067_v27, %v3660_v9 }
 0x2ba   :  { %v5501_v9 = vld [vmem:[#allocation33_spill] sm:$0xff] }
 0x2bb   :  { %v1888_v25 = vmul.f32 0.0, %v1872_v56  ;;  %v3710_v56 = vld [vmem:[#allocation5 + $0x36c] sm:$0xf0] }
 0x2bc   :  { %v3713_v19 = vor.u32 %v4078_v10, %v3710_v56  ;;  %v3768_v56 = vld [vmem:[#allocation5 + $0x258] sm:$0xf] }
 0x2bd   :  { %v1904_v22 = vadd.f32 %v1888_v25, %v1851_v47  ;;  %v3709_v47 = vor.u32 %v4079_v6, %v3708_v61  ;;  %v4080_v25 = vld [vmem:[#allocation5 + $0x370] sm:$0xf0]  ;;  %v3668_v61 = vld [vmem:[#allocation5 + $0x308] sm:$0xf] }
 0x2be   :  { %2321 = vmatpush.bf16.msra.mxu2 %v3713_v19 }
 0x2bf   :  { %v1920_v44 = vmax.f32 %v1904_v22, 0.0  ;;  %v3816_v22 = vld [vmem:[#allocation5 + $0x2b8] sm:$0xf]  ;;  %2272 = vmatpush.bf16.msrb.mxu1 %v3709_v47  ;;  %v4046_v47 = vld [vmem:[#allocation5 + $0x260] sm:$0xf0] }
 0x2c0   :  { %v3769_v19 = vor.u32 %v4046_v47, %v3768_v56 }
 0x2c1   :  { %v4992_v29 = vpack.c.bf16 %v1920_v44, %v1919_v24  ;;  %v3717_v24 = vor.u32 %v4080_v25, %v3716_v5  ;;  %v4058_v44 = vld [vmem:[#allocation5 + $0x2c0] sm:$0xf0]  ;;  %v3756_v5 = vld [vmem:[#allocation5 + $0x240] sm:$0xf]  ;;  %v4043_v25 = vld [vmem:[#allocation5 + $0x248] sm:$0xf0] }
 0x2c3   :  { %1929 = vmatpush.bf16.msrb.mxu3 %v4992_v29  ;;  %2002 = vmatpush.bf16.msrb.mxu0 %v4992_v29 }
 0x2c7   :  { %1930 = vmatpush.bf16.msrb.mxu3 %v4984_v23  ;;  %2003 = vmatpush.bf16.msrb.mxu0 %v4984_v23 }
 0x2cb   :  { %1931 = vmatpush.bf16.msrb.mxu3 %v4971_v35  ;;  %2004 = vmatpush.bf16.msrb.mxu0 %v4971_v35 }
 0x2cf   :  { %1932 = vmatpush.bf16.msrb.mxu3 %v4956_v3  ;;  %2005 = vmatpush.bf16.msrb.mxu0 %v4956_v3 }
 0x2d3   :  { %1933 = vmatpush.bf16.msrb.mxu3 %v4941_v55  ;;  %2006 = vmatpush.bf16.msrb.mxu0 %v4941_v55 }
 0x2d7   :  { %1934 = vmatpush.bf16.msrb.mxu3 %v4927_v2  ;;  %2007 = vmatpush.bf16.msrb.mxu0 %v4927_v2 }
 0x2db   :  { %1935 = vmatpush.bf16.msrb.mxu3 %v4919_v18  ;;  %2008 = vmatpush.bf16.msrb.mxu0 %v4919_v18 }
 0x2df   :  { %1936 = vmatpush.bf16.msrb.mxu3 %v4911_v39  ;;  %2009 = vmatpush.bf16.msrb.mxu0 %v4911_v39 }
 0x2e2   :  { %1937 = vmatmul.bf16.vlgmr.msrb.gmra.mxu3 %v4210_v20  ;;  %2010 = vmatmul.bf16.vlgmr.msrb.gmra.mxu0 %v4211_v28  ;;  %v3696_v20 = vld [vmem:[#allocation5 + $0x348] sm:$0xf]  ;;  %v4076_v28 = vld [vmem:[#allocation5 + $0x350] sm:$0xf0] }
 0x2e3   :  { %2367 = vmatpush.bf16.msra.mxu3 %v3753_v37  ;;  %2544 = vmatpush.bf16.msra.mxu0 %v3841_v43  ;;  %v3692_v37 = vld [vmem:[#allocation5 + $0x338] sm:$0xf]  ;;  %v3680_v43 = vld [vmem:[#allocation5 + $0x320] sm:$0xf] }
 0x2e4   :  { %v3693_v11 = vor.u32 %v4074_v21, %v3692_v37  ;;  %v3681_v40 = vor.u32 %v4071_v14, %v3680_v43  ;;  %v5495_v21 = vld [vmem:[#allocation16_spill] sm:$0xff]  ;;  %v5499_v14 = vld [vmem:[#allocation15_spill] sm:$0xff] }
 0x2e7   :  { %2368 = vmatpush.bf16.msra.mxu3 %v3741_v7  ;;  %2545 = vmatpush.bf16.msra.mxu0 %v3829_v34  ;;  %v3672_v7 = vld [vmem:[#allocation5 + $0x318] sm:$0xf]  ;;  %v4068_v34 = vld [vmem:[#allocation5 + $0x310] sm:$0xf0] }
 0x2e8   :  { %v3669_v10 = vor.u32 %v4068_v34, %v3668_v61  ;;  %v5502_v34 = vld [vmem:[#allocation20_spill] sm:$0xff] }
 0x2eb   :  { %2369 = vmatpush.bf16.msra.mxu3 %v3729_v45  ;;  %v4066_v45 = vld [vmem:[#allocation5 + $0x304] sm:$0xf] }
 0x2ec   :  { %v3665_v6 = vor.u32 %v4066_v45, %v3662_v58 }
 0x2ef   :  { %2370 = vmatpush.bf16.msra.mxu3 %v3717_v24  ;;  %v4224_v24 = vld [vmem:[%s5407_s1 + $0x38] sm:$0xff] }
 0x2f2   :  { %1942 = vmatmul.bf16.gmra.mxu3 %v4212_v60  ;;  %2015 = vmatmul.bf16.gmra.mxu0 %v4213_v50  ;;  %v3817_v60 = vor.u32 %v4058_v44, %v3816_v22  ;;  %v4075_v50 = vld [vmem:[#allocation5 + $0x34c] sm:$0xf]  ;;  %v3757_v22 = vor.u32 %v4043_v25, %v3756_v5  ;;  %v4225_v44 = vld [vmem:[%s5407_s1 + $0x78] sm:$0xff]  ;;  %s4339_s1 = smov [#allocation8]  }
 0x2f3   :  { %v5504_v5 = vld [vmem:[#allocation34_spill] sm:$0xff]  ;;  %s3242_s27 = sshll.u32 %s4339_s1, 4  ;;  %s3243_s27 = int_to_ptr.vmem [resolvable:$true] %s3242_s27 }
 0x2f4   :  { %2546 = vmatpush.bf16.msra.mxu0 %v3817_v60 }
 0x2f8   :  { %2547 = vmatpush.bf16.msra.mxu0 %v3805_v32 }
 0x2fc   :  { %2548 = vmatpush.bf16.msra.mxu0 %v3793_v8 }
 0x300   :  { %2549 = vmatpush.bf16.msra.mxu0 %v3781_v26 }
 0x302   :  { %1947 = vmatmul.bf16.gmra.mxu3 %v4214_v38  ;;  %2020 = vmatmul.bf16.gmra.mxu0 %v4215_v41  ;;  %v3698_v38 = vld [vmem:[#allocation5 + $0x354] sm:$0xf0]  ;;  %v3704_v41 = vld [vmem:[#allocation5 + $0x350] sm:$0xf] }
 0x304   :  { %2550 = vmatpush.bf16.msra.mxu0 %v3769_v19 }
 0x308   :  { %2551 = vmatpush.bf16.msra.mxu0 %v3757_v22  ;;  %v5505_v22 = vld [vmem:[#allocation35_spill] sm:$0xff] }
 0x312   :  { %1952 = vmatmul.bf16.gmra.mxu3 %v4216_v30  ;;  %2025 = vmatmul.bf16.gmra.mxu0 %v4217_v54  ;;  %v3697_v30 = vor.u32 %v4076_v28, %v3696_v20  ;;  %v4077_v54 = vld [vmem:[#allocation5 + $0x358] sm:$0xf0] }
 0x314   :  { %2273 = vmatpush.bf16.msrb.mxu1 %v3697_v30 }
 0x318   :  { %2274 = vmatpush.bf16.msrb.mxu1 %v3685_v33 }
 0x322   :  { %1957 = vmatmul.bf16.gmra.mxu3 %v4218_v15  ;;  %2030 = vmatmul.bf16.gmra.mxu0 %v4219_v31  ;;  %v3701_v15 = vor.u32 %v4075_v50, %v3698_v38  ;;  %v3705_v31 = vor.u32 %v4077_v54, %v3704_v41  ;;  %v5490_v50 = vld [vmem:[#allocation14_spill] sm:$0xff]  ;;  %v5491_v41 = vld [vmem:[#allocation17_spill] sm:$0xff] }
 0x324   :  { %2322 = vmatpush.bf16.msra.mxu2 %v3701_v15  ;;  %2371 = vmatpush.bf16.msra.mxu3 %v3705_v31  ;;  %v5492_v31 = vld [vmem:[#allocation27_spill] sm:$0xff] }
 0x328   :  { %2323 = vmatpush.bf16.msra.mxu2 %v3689_v12  ;;  %2372 = vmatpush.bf16.msra.mxu3 %v3693_v11 }
 0x32c   :  { %2373 = vmatpush.bf16.msra.mxu3 %v3681_v40 }
 0x330   :  { %2374 = vmatpush.bf16.msra.mxu3 %v3669_v10  ;;  %v5503_v10 = vld [vmem:[#allocation18_spill] sm:$0xff] }
 0x332   :  { %1962 = vmatmul.bf16.gmra.mxu3 %v4220_v53  ;;  %2035 = vmatmul.bf16.gmra.mxu0 %v4221_v62  ;;  %v3673_v53 = vor.u32 %v4070_v1, %v3672_v7  ;;  %v3674_v62 = vld [vmem:[#allocation5 + $0x324] sm:$0xf0] }
 0x333   :  { %v3677_v46 = vor.u32 %v4069_v36, %v3674_v62  ;;  %v5498_v62 = vld [vmem:[#allocation12_spill] sm:$0xff] }
 0x334   :  { %2275 = vmatpush.bf16.msrb.mxu1 %v3673_v53 }
 0x335   :  { %2324 = vmatpush.bf16.msra.mxu2 %v3677_v46 }
 0x338   :  { %2276 = vmatpush.bf16.msrb.mxu1 %v3661_v42 }
 0x339   :  { %2325 = vmatpush.bf16.msra.mxu2 %v3665_v6 }
 0x342   :  { %1967 = vmatmul.bf16.gmra.mxu3 %v4222_v57  ;;  %2040 = vmatmul.bf16.gmra.mxu0 %v4223_v59  ;;  %v5497_v59 = vld [vmem:[#allocation31_spill] sm:$0xff] }
 0x352   :  { %1972 = vmatmul.bf16.gmra.mxu3 %v4224_v24  ;;  %2045 = vmatmul.bf16.gmra.mxu0 %v4225_v44 }
 0x35f   :  { %v2011_v20 = vpop.f32.mrf.mxu0 }
 0x360   :  { %v2051_v38 = vmul.f32 %v2011_v20, %v5490_v50  ;;  %v5506_v50 = vld [vmem:[#allocation19_spill] sm:$0xff] }
 0x365   :  { %v1938_v28 = vpop.f32.mrf.mxu3 }
 0x366   :  { %v1978_v51 = vmul.f32 %v1938_v28, %v5492_v31  ;;  %v3842_v31 = vld [vmem:[#allocation5 + $0x2f4] sm:$0xf0] }
 0x367   :  { %v2013_v60 = vpop.f32.mrf.mxu0 }
 0x368   :  { %v2052_v30 = vmul.f32 %v2013_v60, %v5491_v41  ;;  %v5507_v41 = vld [vmem:[#allocation23_spill] sm:$0xff] }
 0x36a   :  { %v2067_v54 = vpack.c.bf16 %v2052_v30, %v2051_v38 }
 0x36c   :  { %2277 = vmatmul.bf16.vlgmr.msrb.gmra.mxu1 %v2067_v54  ;;  %2326 = vmatmul.bf16.vlgmr.msra.gmra.mxu2 %v2067_v54 }
 0x36d   :  { %2375 = vmatmul.bf16.vlgmr.msra.gmra.mxu3 %v2067_v54  ;;  %v1940_v15 = vpop.f32.mrf.mxu3 }
 0x36e   :  { %v1979_v32 = vmul.f32 %v1940_v15, %v5493_v17  ;;  %v4063_v15 = vld [vmem:[#allocation5 + $0x2ec] sm:$0xf] }
 0x36f   :  { %v2016_v0 = vpop.f32.mrf.mxu0  ;;  %v3845_v17 = vor.u32 %v4063_v15, %v3842_v31  ;;  %v4103_v15 = vld [vmem:[#allocation5 + $0x428] sm:$0xf0] }
 0x370   :  { %v5062_v16 = vpack.c.bf16 %v1979_v32, %v1978_v51  ;;  %v2053_v37 = vmul.f32 %v2016_v0, %v5494_v13  ;;  %v3848_v51 = vld [vmem:[#allocation5 + $0x2f0] sm:$0xf]  ;;  %v4065_v32 = vld [vmem:[#allocation5 + $0x2f8] sm:$0xf0]  ;;  %v3936_v0 = vld [vmem:[#allocation5 + $0x468] sm:$0xf] }
 0x371   :  { %v3849_v13 = vor.u32 %v4065_v32, %v3848_v51  ;;  %2593 = vmatpush.bf16.msra.mxu1 %v3845_v17  ;;  %v4105_v17 = vld [vmem:[#allocation5 + $0x43c] sm:$0xf]  ;;  %v3914_v32 = vld [vmem:[#allocation5 + $0x444] sm:$0xf0] }
 0x372   :  { %2552 = vmatmul.bf16.vlgmr.msra.gmra.mxu0 %v5062_v16 }
 0x373   :  { %2642 = vmatpush.bf16.msrb.mxu2 %v3849_v13  ;;  %v3794_v13 = vld [vmem:[#allocation5 + $0x294] sm:$0xf0] }
 0x375   :  { %v1943_v49 = vpop.f32.mrf.mxu3 }
 0x376   :  { %v1980_v57 = vmul.f32 %v1943_v49, %v5496_v52  ;;  %v4112_v49 = vld [vmem:[#allocation5 + $0x470] sm:$0xf0] }
 0x377   :  { %v2018_v33 = vpop.f32.mrf.mxu0 }
 0x378   :  { %v2054_v12 = vmul.f32 %v2018_v33, %v5495_v21  ;;  %v5508_v21 = vld [vmem:[#allocation37_spill] sm:$0xff] }
 0x37a   :  { %v2068_v11 = vpack.c.bf16 %v2054_v12, %v2053_v37  ;;  %v3937_v37 = vor.u32 %v4112_v49, %v3936_v0  ;;  %v3917_v49 = vor.u32 %v4105_v17, %v3914_v32  ;;  %v3764_v17 = vld [vmem:[#allocation5 + $0x248] sm:$0xf]  ;;  %v5514_v32 = vld [vmem:[#allocation26_spill] sm:$0xff] }
 0x37c   :  { %2282 = vmatmul.bf16.gmra.mxu1 %v2068_v11  ;;  %2331 = vmatmul.bf16.gmra.mxu2 %v2068_v11 }
 0x37d   :  { %2380 = vmatmul.bf16.gmra.mxu3 %v2068_v11  ;;  %v1945_v4 = vpop.f32.mrf.mxu3  ;;  %v5509_v11 = vld [vmem:[#allocation36_spill] sm:$0xff] }
 0x37e   :  { %v1981_v8 = vmul.f32 %v1945_v4, %v5497_v59  ;;  %2852 = vmatpush.bf16.msrb.mxu3 %v3937_v37  ;;  %v3830_v59 = vld [vmem:[#allocation5 + $0x2dc] sm:$0xf0]  ;;  %v3800_v37 = vld [vmem:[#allocation5 + $0x290] sm:$0xf] }
 0x37f   :  { %v2021_v7 = vpop.f32.mrf.mxu0 }
 0x380   :  { %v5069_v1 = vpack.c.bf16 %v1981_v8, %v1980_v57  ;;  %v2055_v43 = vmul.f32 %v2021_v7, %v5498_v62  ;;  %v4060_v57 = vld [vmem:[#allocation5 + $0x2d4] sm:$0xf]  ;;  %v3836_v8 = vld [vmem:[#allocation5 + $0x2d8] sm:$0xf]  ;;  %v3924_v62 = vld [vmem:[#allocation5 + $0x450] sm:$0xf] }
 0x382   :  { %2557 = vmatmul.bf16.gmra.mxu0 %v5069_v1 }
 0x385   :  { %v1948_v36 = vpop.f32.mrf.mxu3 }
 0x386   :  { %v1982_v26 = vmul.f32 %v1948_v36, %v5500_v48  ;;  %v3833_v36 = vor.u32 %v4060_v57, %v3830_v59 }
 0x387   :  { %v2023_v53 = vpop.f32.mrf.mxu0 }
 0x388   :  { %v2056_v46 = vmul.f32 %v2023_v53, %v5499_v14  ;;  %v4062_v53 = vld [vmem:[#allocation5 + $0x2e0] sm:$0xf0]  ;;  %2594 = vmatpush.bf16.msra.mxu1 %v3833_v36  ;;  %v3902_v36 = vld [vmem:[#allocation5 + $0x42c] sm:$0xf0] }
 0x389   :  { %v3837_v14 = vor.u32 %v4062_v53, %v3836_v8  ;;  %v4102_v8 = vld [vmem:[#allocation5 + $0x424] sm:$0xf] }
 0x38a   :  { %v2069_v40 = vpack.c.bf16 %v2056_v46, %v2055_v43  ;;  %v4109_v43 = vld [vmem:[#allocation5 + $0x458] sm:$0xf0] }
 0x38b   :  { %v3925_v46 = vor.u32 %v4109_v43, %v3924_v62  ;;  %2643 = vmatpush.bf16.msrb.mxu2 %v3837_v14  ;;  %v5512_v53 = vld [vmem:[#allocation39_spill] sm:$0xff]  ;;  %v5513_v43 = vld [vmem:[#allocation38_spill] sm:$0xff] }
 0x38c   :  { %2287 = vmatmul.bf16.gmra.mxu1 %v2069_v40  ;;  %2336 = vmatmul.bf16.gmra.mxu2 %v2069_v40 }
 0x38d   :  { %2385 = vmatmul.bf16.gmra.mxu3 %v2069_v40  ;;  %v1950_v63 = vpop.f32.mrf.mxu3  ;;  %v4111_v40 = vld [vmem:[#allocation5 + $0x46c] sm:$0xf] }
 0x38e   :  { %v1983_v27 = vmul.f32 %v1950_v63, %v5501_v9  ;;  %v3938_v63 = vld [vmem:[#allocation5 + $0x474] sm:$0xf0]  ;;  %2853 = vmatpush.bf16.msrb.mxu3 %v3925_v46  ;;  %v3818_v9 = vld [vmem:[#allocation5 + $0x2c4] sm:$0xf0]  ;;  %v3905_v46 = vor.u32 %v4102_v8, %v3902_v36 }
 0x38f   :  { %v2026_v45 = vpop.f32.mrf.mxu0  ;;  %v3941_v48 = vor.u32 %v4111_v40, %v3938_v63  ;;  %v4048_v63 = vld [vmem:[#allocation5 + $0x274] sm:$0xf] }
 0x390   :  { %v5076_v42 = vpack.c.bf16 %v1983_v27, %v1982_v26  ;;  %v2057_v6 = vmul.f32 %v2026_v45, %v5502_v34  ;;  %v4057_v26 = vld [vmem:[#allocation5 + $0x2bc] sm:$0xf]  ;;  %v3824_v27 = vld [vmem:[#allocation5 + $0x2c0] sm:$0xf]  ;;  %v4106_v34 = vld [vmem:[#allocation5 + $0x440] sm:$0xf0] }
 0x391   :  { %2901 = vmatpush.bf16.msrb.mxu0 %v3941_v48  ;;  %v3821_v45 = vor.u32 %v4057_v26, %v3818_v9  ;;  %v3782_v48 = vld [vmem:[#allocation5 + $0x27c] sm:$0xf0]  ;;  %v3788_v26 = vld [vmem:[#allocation5 + $0x278] sm:$0xf] }
 0x392   :  { %2562 = vmatmul.bf16.gmra.mxu0 %v5076_v42 }
 0x393   :  { %2595 = vmatpush.bf16.msra.mxu1 %v3821_v45  ;;  %v4050_v45 = vld [vmem:[#allocation5 + $0x280] sm:$0xf0] }
 0x395   :  { %v1953_v58 = vpop.f32.mrf.mxu3 }
 0x396   :  { %v1984_v25 = vmul.f32 %v1953_v58, %v5504_v5  ;;  %v4059_v58 = vld [vmem:[#allocation5 + $0x2c8] sm:$0xf0] }
 0x397   :  { %v2028_v61 = vpop.f32.mrf.mxu0 }
 0x398   :  { %v2058_v56 = vmul.f32 %v2028_v61, %v5503_v10  ;;  %v3912_v61 = vld [vmem:[#allocation5 + $0x438] sm:$0xf]  ;;  %v3825_v10 = vor.u32 %v4059_v58, %v3824_v27  ;;  %v3785_v27 = vor.u32 %v4048_v63, %v3782_v48  ;;  %v3876_v58 = vld [vmem:[#allocation5 + $0x3f0] sm:$0xf] }
 0x39a   :  { %v2070_v47 = vpack.c.bf16 %v2058_v56, %v2057_v6  ;;  %v3913_v56 = vor.u32 %v4106_v34, %v3912_v61  ;;  %2644 = vmatpush.bf16.msrb.mxu2 %v3825_v10  ;;  %v4097_v61 = vld [vmem:[#allocation5 + $0x3f8] sm:$0xf0]  ;;  %v3789_v34 = vor.u32 %v4050_v45, %v3788_v26 }
 0x39b   :  { %v3877_v10 = vor.u32 %v4097_v61, %v3876_v58  ;;  %v5518_v58 = vld [vmem:[#allocation25_spill] sm:$0xff] }
 0x39c   :  { %2292 = vmatmul.bf16.gmra.mxu1 %v2070_v47  ;;  %2341 = vmatmul.bf16.gmra.mxu2 %v2070_v47 }
 0x39d   :  { %2390 = vmatmul.bf16.gmra.mxu3 %v2070_v47  ;;  %v1955_v19 = vpop.f32.mrf.mxu3  ;;  %v4108_v47 = vld [vmem:[#allocation5 + $0x454] sm:$0xf] }
 0x39e   :  { %v1985_v24 = vmul.f32 %v1955_v19, %v5505_v22  ;;  %v3926_v19 = vld [vmem:[#allocation5 + $0x45c] sm:$0xf0]  ;;  %2854 = vmatpush.bf16.msrb.mxu3 %v3913_v56  ;;  %v4054_v22 = vld [vmem:[#allocation5 + $0x2a4] sm:$0xf]  ;;  %v3890_v56 = vld [vmem:[#allocation5 + $0x414] sm:$0xf0] }
 0x39f   :  { %v2031_v44 = vpop.f32.mrf.mxu0  ;;  %v3929_v5 = vor.u32 %v4108_v47, %v3926_v19  ;;  %v4045_v19 = vld [vmem:[#allocation5 + $0x25c] sm:$0xf] }
 0x3a0   :  { %v5083_v20 = vpack.c.bf16 %v1985_v24, %v1984_v25  ;;  %v2059_v38 = vmul.f32 %v2031_v44, %v5506_v50  ;;  %v3806_v24 = vld [vmem:[#allocation5 + $0x2ac] sm:$0xf0]  ;;  %v3812_v44 = vld [vmem:[#allocation5 + $0x2a8] sm:$0xf]  ;;  %v5511_v50 = vld [vmem:[#allocation22_spill] sm:$0xff] }
 0x3a1   :  { %2902 = vmatpush.bf16.msrb.mxu0 %v3929_v5  ;;  %v3770_v5 = vld [vmem:[#allocation5 + $0x264] sm:$0xf0] }
 0x3a2   :  { %2567 = vmatmul.bf16.gmra.mxu0 %v5083_v20 }
 0x3a5   :  { %v1958_v28 = vpop.f32.mrf.mxu3  ;;  %2903 = vmatpush.bf16.msrb.mxu0 %v3917_v49  ;;  %v5515_v49 = vld [vmem:[#allocation24_spill] sm:$0xff] }
 0x3a6   :  { %v1986_v12 = vmul.f32 %v1958_v28, %v5508_v21  ;;  %v5510_v28 = vld [vmem:[#allocation21_spill] sm:$0xff] }
 0x3a7   :  { %v2033_v60 = vpop.f32.mrf.mxu0 }
 0x3a8   :  { %v2060_v30 = vmul.f32 %v2033_v60, %v5507_v41  ;;  %v3809_v41 = vor.u32 %v4054_v22, %v3806_v24  ;;  %v3773_v22 = vor.u32 %v4045_v19, %v3770_v5  ;;  %v4047_v24 = vld [vmem:[#allocation5 + $0x268] sm:$0xf0]  ;;  %v5521_v5 = vld [vmem:[#allocation42_spill] sm:$0xff] }
 0x3a9   :  { %2904 = vmatpush.bf16.msrb.mxu0 %v3905_v46  ;;  %v5517_v46 = vld [vmem:[#allocation41_spill] sm:$0xff] }
 0x3aa   :  { %v2071_v54 = vpack.c.bf16 %v2060_v30, %v2059_v38  ;;  %v4056_v30 = vld [vmem:[#allocation5 + $0x2b0] sm:$0xf0]  ;;  %2596 = vmatpush.bf16.msra.mxu1 %v3809_v41  ;;  %v3878_v41 = vld [vmem:[#allocation5 + $0x3fc] sm:$0xf0] }
 0x3ab   :  { %v3813_v31 = vor.u32 %v4056_v30, %v3812_v44  ;;  %v3864_v44 = vld [vmem:[#allocation5 + $0x3d8] sm:$0xf] }
 0x3ac   :  { %2297 = vmatmul.bf16.gmra.mxu1 %v2071_v54  ;;  %2346 = vmatmul.bf16.gmra.mxu2 %v2071_v54 }
 0x3ad   :  { %2395 = vmatmul.bf16.gmra.mxu3 %v2071_v54  ;;  %v1960_v33 = vpop.f32.mrf.mxu3  ;;  %v3900_v54 = vld [vmem:[#allocation5 + $0x420] sm:$0xf]  ;;  %2645 = vmatpush.bf16.msrb.mxu2 %v3813_v31  ;;  %v4042_v31 = vld [vmem:[#allocation5 + $0x244] sm:$0xf] }
 0x3ae   :  { %v1987_v4 = vmul.f32 %v1960_v33, %v5509_v11  ;;  %v3901_v51 = vor.u32 %v4103_v15, %v3900_v54  ;;  %v4051_v33 = vld [vmem:[#allocation5 + $0x28c] sm:$0xf]  ;;  %v3888_v11 = vld [vmem:[#allocation5 + $0x408] sm:$0xf] }
 0x3af   :  { %v2036_v52 = vpop.f32.mrf.mxu0  ;;  %v3797_v21 = vor.u32 %v4051_v33, %v3794_v13 }
 0x3b0   :  { %v5090_v7 = vpack.c.bf16 %v1987_v4, %v1986_v12  ;;  %v2061_v60 = vmul.f32 %v2036_v52, %v5510_v28  ;;  %2855 = vmatpush.bf16.msrb.mxu3 %v3901_v51  ;;  %v4053_v12 = vld [vmem:[#allocation5 + $0x298] sm:$0xf0]  ;;  %v4100_v4 = vld [vmem:[#allocation5 + $0x410] sm:$0xf0]  ;;  %v4094_v28 = vld [vmem:[#allocation5 + $0x3e0] sm:$0xf0] }
 0x3b1   :  { %v3801_v57 = vor.u32 %v4053_v12, %v3800_v37  ;;  %v3889_v59 = vor.u32 %v4100_v4, %v3888_v11  ;;  %2597 = vmatpush.bf16.msra.mxu1 %v3797_v21  ;;  %v3758_v51 = vld [vmem:[#allocation5 + $0x24c] sm:$0xf0]  ;;  %v4044_v37 = vld [vmem:[#allocation5 + $0x250] sm:$0xf0]  ;;  %v3852_v21 = vld [vmem:[#allocation5 + $0x3c0] sm:$0xf] }
 0x3b2   :  { %2572 = vmatmul.bf16.gmra.mxu0 %v5090_v7  ;;  %v3761_v13 = vor.u32 %v4042_v31, %v3758_v51  ;;  %v4091_v12 = vld [vmem:[#allocation5 + $0x3c8] sm:$0xf0]  ;;  %v3765_v11 = vor.u32 %v4044_v37, %v3764_v17 }
 0x3b3   :  { %2646 = vmatpush.bf16.msrb.mxu2 %v3801_v57  ;;  %v3853_v4 = vor.u32 %v4091_v12, %v3852_v21  ;;  %v3866_v57 = vld [vmem:[#allocation5 + $0x3e4] sm:$0xf0] }
 0x3b4   :  { %2856 = vmatpush.bf16.msrb.mxu3 %v3889_v59 }
 0x3b5   :  { %v1963_v6 = vpop.f32.mrf.mxu3  ;;  %2598 = vmatpush.bf16.msra.mxu1 %v3785_v27 }
 0x3b6   :  { %v1988_v62 = vmul.f32 %v1963_v6, %v5512_v53  ;;  %v4099_v6 = vld [vmem:[#allocation5 + $0x40c] sm:$0xf]  ;;  %v4090_v53 = vld [vmem:[#allocation5 + $0x3c4] sm:$0xf] }
 0x3b7   :  { %v2038_v25 = vpop.f32.mrf.mxu0  ;;  %v3893_v47 = vor.u32 %v4099_v6, %v3890_v56  ;;  %2647 = vmatpush.bf16.msrb.mxu2 %v3789_v34  ;;  %v5519_v34 = vld [vmem:[#allocation29_spill] sm:$0xff] }
 0x3b8   :  { %v2062_v38 = vmul.f32 %v2038_v25, %v5511_v50  ;;  %v3776_v25 = vld [vmem:[#allocation5 + $0x260] sm:$0xf]  ;;  %2857 = vmatpush.bf16.msrb.mxu3 %v3877_v10  ;;  %v3865_v50 = vor.u32 %v4094_v28, %v3864_v44 }
 0x3b9   :  { %2905 = vmatpush.bf16.msrb.mxu0 %v3893_v47  ;;  %2599 = vmatpush.bf16.msra.mxu1 %v3773_v22  ;;  %v5520_v47 = vld [vmem:[#allocation43_spill] sm:$0xff] }
 0x3ba   :  { %v2072_v0 = vpack.c.bf16 %v2062_v38, %v2061_v60  ;;  %v3777_v60 = vor.u32 %v4047_v24, %v3776_v25  ;;  %v4096_v38 = vld [vmem:[#allocation5 + $0x3f4] sm:$0xf] }
 0x3bb   :  { %v3881_v54 = vor.u32 %v4096_v38, %v3878_v41 }
 0x3bc   :  { %2302 = vmatmul.bf16.gmra.mxu1 %v2072_v0  ;;  %2351 = vmatmul.bf16.gmra.mxu2 %v2072_v0 }
 0x3bd   :  { %2400 = vmatmul.bf16.gmra.mxu3 %v2072_v0  ;;  %v1965_v52 = vpop.f32.mrf.mxu3  ;;  %2648 = vmatpush.bf16.msrb.mxu2 %v3777_v60 }
 0x3be   :  { %v1989_v14 = vmul.f32 %v1965_v52, %v5513_v43  ;;  %2858 = vmatpush.bf16.msrb.mxu3 %v3865_v50  ;;  %2906 = vmatpush.bf16.msrb.mxu0 %v3881_v54  ;;  %v4093_v52 = vld [vmem:[#allocation5 + $0x3dc] sm:$0xf]  ;;  %v5516_v43 = vld [vmem:[#allocation40_spill] sm:$0xff] }
 0x3bf   :  { %v2041_v40 = vpop.f32.mrf.mxu0  ;;  %2600 = vmatpush.bf16.msra.mxu1 %v3761_v13  ;;  %v3869_v8 = vor.u32 %v4093_v52, %v3866_v57 }
 0x3c0   :  { %v5097_v9 = vpack.c.bf16 %v1989_v14, %v1988_v62  ;;  %v2063_v0 = vmul.f32 %v2041_v40, %v5514_v32  ;;  %v3854_v62 = vld [vmem:[#allocation5 + $0x3cc] sm:$0xf0] }
 0x3c1   :  { %2649 = vmatpush.bf16.msrb.mxu2 %v3765_v11  ;;  %v3857_v63 = vor.u32 %v4090_v53, %v3854_v62 }
 0x3c2   :  { %2577 = vmatmul.bf16.gmra.mxu0 %v5097_v9  ;;  %2859 = vmatpush.bf16.msrb.mxu3 %v3853_v4 }
 0x3c3   :  { %2907 = vmatpush.bf16.msrb.mxu0 %v3869_v8 }
 0x3c5   :  { %v1968_v30 = vpop.f32.mrf.mxu3 }
 0x3c6   :  { %v1990_v14 = vmul.f32 %v1968_v30, %v5516_v43 }
 0x3c7   :  { %v2043_v15 = vpop.f32.mrf.mxu0  ;;  %2908 = vmatpush.bf16.msrb.mxu0 %v3857_v63 }
 0x3c8   :  { %v2064_v33 = vmul.f32 %v2043_v15, %v5515_v49 }
 0x3ca   :  { %v2073_v59 = vpack.c.bf16 %v2064_v33, %v2063_v0 }
 0x3cc   :  { %2307 = vmatmul.bf16.gmra.mxu1 %v2073_v59  ;;  %2356 = vmatmul.bf16.gmra.mxu2 %v2073_v59 }
 0x3cd   :  { %2405 = vmatmul.bf16.gmra.mxu3 %v2073_v59  ;;  %v1970_v36 = vpop.f32.mrf.mxu3 }
 0x3ce   :  { %v1991_v40 = vmul.f32 %v1970_v36, %v5517_v46 }
 0x3cf   :  { %v2046_v48 = vpop.f32.mrf.mxu0 }
 0x3d0   :  { %v5104_v26 = vpack.c.bf16 %v1991_v40, %v1990_v14  ;;  %v2065_v61 = vmul.f32 %v2046_v48, %v5518_v58  ;;  %v4113_v40 = vld [vmem:[#allocation5 + $0x478] sm:$0xf0] }
 0x3d2   :  { %2582 = vmatmul.bf16.gmra.mxu0 %v5104_v26 }
 0x3d5   :  { %v1973_v27 = vpop.f32.mrf.mxu3 }
 0x3d6   :  { %v1992_v19 = vmul.f32 %v1973_v27, %v5520_v47  ;;  %v3932_v27 = vld [vmem:[#allocation5 + $0x458] sm:$0xf] }
 0x3d7   :  { %v2048_v45 = vpop.f32.mrf.mxu0 }
 0x3d8   :  { %v2066_v10 = vmul.f32 %v2048_v45, %v5519_v34  ;;  %v4110_v45 = vld [vmem:[#allocation5 + $0x460] sm:$0xf0] }
 0x3d9   :  { %v3933_v34 = vor.u32 %v4110_v45, %v3932_v27 }
 0x3da   :  { %v2074_v6 = vpack.c.bf16 %v2066_v10, %v2065_v61 }
 0x3dc   :  { %2312 = vmatmul.bf16.gmra.mxu1 %v2074_v6  ;;  %2361 = vmatmul.bf16.gmra.mxu2 %v2074_v6 }
 0x3dd   :  { %2410 = vmatmul.bf16.gmra.mxu3 %v2074_v6  ;;  %v1975_v56 = vpop.f32.mrf.mxu3  ;;  %v3920_v6 = vld [vmem:[#allocation5 + $0x440] sm:$0xf] }
 0x3de   :  { %v1993_v25 = vmul.f32 %v1975_v56, %v5521_v5  ;;  %v4107_v56 = vld [vmem:[#allocation5 + $0x448] sm:$0xf0]  ;;  %v3908_v5 = vld [vmem:[#allocation5 + $0x428] sm:$0xf] }
 0x3df   :  { %v3921_v47 = vor.u32 %v4107_v56, %v3920_v6 }
 0x3e0   :  { %v5111_v22 = vpack.c.bf16 %v1993_v25, %v1992_v19  ;;  %v4104_v25 = vld [vmem:[#allocation5 + $0x430] sm:$0xf0] }
 0x3e2   :  { %2587 = vmatmul.bf16.gmra.mxu0 %v5111_v22 }
 0x3e9   :  { %v2278_v24 = vpop.f32.mrf.mxu1 }
 0x3ec   :  { %2601 = vmatmul.bf16.vlgmr.msra.gmra.mxu1 %v5062_v16  ;;  %2650 = vmatmul.bf16.vlgmr.msrb.gmra.mxu2 %v5062_v16 }
 0x3ed   :  { %2860 = vmatmul.bf16.vlgmr.msrb.gmra.mxu3 %v4911_v39 }
 0x3ef   :  { %v2553_v44 = vpop.f32.mrf.mxu0  ;;  %v5146_v21 = vpop.f32.mrf.mxu2 }
 0x3f0   :  { %v5117_v28 = vpop.f32.mrf.mxu3  ;;  %v5119_v60 = vadd.f32 %v2553_v44, %v2278_v24 }
 0x3f1   :  { %v2280_v50 = vpop.f32.mrf.mxu1 }
 0x3f2   :  { %2909 = vmatmul.bf16.vlgmr.msrb.gmra.mxu0 %v4911_v39 }
 0x3f7   :  { %v2555_v38 = vpop.f32.mrf.mxu0  ;;  %v5155_v57 = vpop.f32.mrf.mxu2 }
 0x3f8   :  { %v5122_v41 = vpop.f32.mrf.mxu3  ;;  %v5124_v30 = vadd.f32 %v2555_v38, %v2280_v50  ;;  %v3909_v50 = vor.u32 %v4104_v25, %v3908_v5 }
 0x3f9   :  { %v2283_v54 = vpop.f32.mrf.mxu1 }
 0x3fc   :  { %2606 = vmatmul.bf16.gmra.mxu1 %v5069_v1  ;;  %2655 = vmatmul.bf16.gmra.mxu2 %v5069_v1 }
 0x3fd   :  { %2865 = vmatmul.bf16.gmra.mxu3 %v4919_v18 }
 0x3ff   :  { %v2558_v16 = vpop.f32.mrf.mxu0  ;;  %v5166_v46 = vpop.f32.mrf.mxu2 }
 0x400   :  { %v5129_v15 = vpop.f32.mrf.mxu3  ;;  %v5131_v31 = vadd.f32 %v2558_v16, %v2283_v54  ;;  %v3896_v54 = vld [vmem:[#allocation5 + $0x410] sm:$0xf]  ;;  %v4101_v16 = vld [vmem:[#allocation5 + $0x418] sm:$0xf0] }
 0x401   :  { %v2285_v51 = vpop.f32.mrf.mxu1 }
 0x402   :  { %2914 = vmatmul.bf16.gmra.mxu0 %v4919_v18 }
 0x407   :  { %v2560_v17 = vpop.f32.mrf.mxu0 }
 0x408   :  { %v5134_v32 = vpop.f32.mrf.mxu3  ;;  %v5136_v0 = vadd.f32 %v2560_v17, %v2285_v51  ;;  %v3897_v51 = vor.u32 %v4101_v16, %v3896_v54 }
 0x409   :  { %v2288_v49 = vpop.f32.mrf.mxu1 }
 0x40c   :  { %2611 = vmatmul.bf16.gmra.mxu1 %v5076_v42  ;;  %2660 = vmatmul.bf16.gmra.mxu2 %v5076_v42 }
 0x40d   :  { %2870 = vmatmul.bf16.gmra.mxu3 %v4927_v2 }
 0x40f   :  { %v2563_v1 = vpop.f32.mrf.mxu0 }
 0x410   :  { %v5141_v33 = vpop.f32.mrf.mxu3  ;;  %v5143_v13 = vadd.f32 %v2563_v1, %v2288_v49  ;;  %v3884_v1 = vld [vmem:[#allocation5 + $0x3f8] sm:$0xf] }
 0x411   :  { %v2290_v37 = vpop.f32.mrf.mxu1 }
 0x412   :  { %2919 = vmatmul.bf16.gmra.mxu0 %v4927_v2 }
 0x417   :  { %v2565_v12 = vpop.f32.mrf.mxu0 }
 0x418   :  { %v5148_v11 = vpop.f32.mrf.mxu3  ;;  %v5150_v4 = vadd.f32 %v2565_v12, %v2290_v37  ;;  %v4098_v37 = vld [vmem:[#allocation5 + $0x400] sm:$0xf0] }
 0x419   :  { %v2293_v52 = vpop.f32.mrf.mxu1 }
 0x41c   :  { %2616 = vmatmul.bf16.gmra.mxu1 %v5083_v20  ;;  %2665 = vmatmul.bf16.gmra.mxu2 %v5083_v20  ;;  %v3944_v20 = vld [vmem:[#allocation5 + $0x470] sm:$0xf] }
 0x41d   :  { %2875 = vmatmul.bf16.gmra.mxu3 %v4941_v55  ;;  %v3945_v63 = vor.u32 %v4113_v40, %v3944_v20  ;;  %v3860_v40 = vld [vmem:[#allocation5 + $0x3c8] sm:$0xf] }
 0x41f   :  { %v2568_v42 = vpop.f32.mrf.mxu0  ;;  %2950 = vmatpush.bf16.msrb.mxu1 %v3945_v63  ;;  %v4092_v63 = vld [vmem:[#allocation5 + $0x3d0] sm:$0xf0] }
 0x420   :  { %v5157_v59 = vpop.f32.mrf.mxu3  ;;  %v5159_v8 = vadd.f32 %v2568_v42, %v2293_v52  ;;  %v3885_v42 = vor.u32 %v4098_v37, %v3884_v1 }
 0x421   :  { %v2295_v36 = vpop.f32.mrf.mxu1 }
 0x422   :  { %2924 = vmatmul.bf16.gmra.mxu0 %v4941_v55 }
 0x423   :  { %2951 = vmatpush.bf16.msrb.mxu1 %v3933_v34  ;;  %v3861_v34 = vor.u32 %v4092_v63, %v3860_v40  ;;  %v5230_v40 = vld [vmem:[#allocation7 + $0x3] ss:$0 sm:$0xff] }
 0x427   :  { %v2570_v53 = vpop.f32.mrf.mxu0  ;;  %2952 = vmatpush.bf16.msrb.mxu1 %v3921_v47 }
 0x428   :  { %v5162_v62 = vpop.f32.mrf.mxu3  ;;  %v5164_v43 = vadd.f32 %v2570_v53, %v2295_v36  ;;  %v3872_v53 = vld [vmem:[#allocation5 + $0x3e0] sm:$0xf] }
 0x429   :  { %v2298_v14 = vpop.f32.mrf.mxu1 }
 0x42b   :  { %2953 = vmatpush.bf16.msrb.mxu1 %v3909_v50 }
 0x42c   :  { %2621 = vmatmul.bf16.gmra.mxu1 %v5090_v7  ;;  %2670 = vmatmul.bf16.gmra.mxu2 %v5090_v7  ;;  %v5176_v7 = vpop.f32.mrf.mxu2 }
 0x42d   :  { %2880 = vmatmul.bf16.gmra.mxu3 %v4956_v3 }
 0x42f   :  { %v2573_v48 = vpop.f32.mrf.mxu0  ;;  %2954 = vmatpush.bf16.msrb.mxu1 %v3897_v51 }
 0x430   :  { %v5171_v58 = vpop.f32.mrf.mxu3  ;;  %v5173_v61 = vadd.f32 %v2573_v48, %v2298_v14 }
 0x431   :  { %v2300_v10 = vpop.f32.mrf.mxu1 }
 0x432   :  { %2929 = vmatmul.bf16.gmra.mxu0 %v4956_v3 }
 0x433   :  { %2955 = vmatpush.bf16.msrb.mxu1 %v3885_v42 }
 0x434   :  { %v5185_v17 = vpop.f32.mrf.mxu2 }
 0x437   :  { %v2575_v19 = vpop.f32.mrf.mxu0 }
 0x438   :  { %v5178_v24 = vpop.f32.mrf.mxu3  ;;  %v5180_v44 = vadd.f32 %v2575_v19, %v2300_v10 }
 0x439   :  { %v2303_v38 = vpop.f32.mrf.mxu1 }
 0x43c   :  { %2626 = vmatmul.bf16.gmra.mxu1 %v5097_v9  ;;  %2675 = vmatmul.bf16.gmra.mxu2 %v5097_v9  ;;  %v4095_v9 = vld [vmem:[#allocation5 + $0x3e8] sm:$0xf0]  ;;  %v5192_v48 = vpop.f32.mrf.mxu2 }
 0x43d   :  { %2885 = vmatmul.bf16.gmra.mxu3 %v4971_v35  ;;  %v3873_v14 = vor.u32 %v4095_v9, %v3872_v53  ;;  %v5228_v9 = vld [vmem:[#allocation7 + $0x4] ss:$0 sm:$0xff] }
 0x43f   :  { %v2578_v49 = vpop.f32.mrf.mxu0  ;;  %2956 = vmatpush.bf16.msrb.mxu1 %v3873_v14 }
 0x440   :  { %v5187_v12 = vpop.f32.mrf.mxu3  ;;  %v5189_v52 = vadd.f32 %v2578_v49, %v2303_v38 }
 0x441   :  { %v2305_v36 = vpop.f32.mrf.mxu1 }
 0x442   :  { %2934 = vmatmul.bf16.gmra.mxu0 %v4971_v35 }
 0x443   :  { %2957 = vmatpush.bf16.msrb.mxu1 %v3861_v34 }
 0x444   :  { %v5205_v5 = vpop.f32.mrf.mxu2 }
 0x447   :  { %v2580_v20 = vpop.f32.mrf.mxu0 }
 0x448   :  { %v5194_v27 = vpop.f32.mrf.mxu3  ;;  %v5196_v45 = vadd.f32 %v2580_v20, %v2305_v36 }
 0x449   :  { %v2308_v10 = vpop.f32.mrf.mxu1 }
 0x44c   :  { %2631 = vmatmul.bf16.gmra.mxu1 %v5104_v26  ;;  %2680 = vmatmul.bf16.gmra.mxu2 %v5104_v26  ;;  %v5212_v16 = vpop.f32.mrf.mxu2 }
 0x44d   :  { %2890 = vmatmul.bf16.gmra.mxu3 %v4984_v23 }
 0x44f   :  { %v2583_v6 = vpop.f32.mrf.mxu0 }
 0x450   :  { %v5201_v56 = vpop.f32.mrf.mxu3  ;;  %v5203_v47 = vadd.f32 %v2583_v6, %v2308_v10 }
 0x451   :  { %v2310_v19 = vpop.f32.mrf.mxu1 }
 0x452   :  { %2939 = vmatmul.bf16.gmra.mxu0 %v4984_v23 }
 0x457   :  { %v2585_v25 = vpop.f32.mrf.mxu0 }
 0x458   :  { %v5208_v50 = vpop.f32.mrf.mxu3  ;;  %v5210_v38 = vadd.f32 %v2585_v25, %v2310_v19 }
 0x459   :  { %v2313_v54 = vpop.f32.mrf.mxu1 }
 0x45c   :  { %2636 = vmatmul.bf16.gmra.mxu1 %v5111_v22  ;;  %2685 = vmatmul.bf16.gmra.mxu2 %v5111_v22 }
 0x45d   :  { %2895 = vmatmul.bf16.gmra.mxu3 %v4992_v29 }
 0x45f   :  { %v2588_v26 = vpop.f32.mrf.mxu0 }
 0x460   :  { %v5217_v51 = vpop.f32.mrf.mxu3  ;;  %v5219_v49 = vadd.f32 %v2588_v26, %v2313_v54 }
 0x461   :  { %v2315_v1 = vpop.f32.mrf.mxu1 }
 0x462   :  { %2944 = vmatmul.bf16.gmra.mxu0 %v4992_v29 }
 0x467   :  { %v2590_v37 = vpop.f32.mrf.mxu0 }
 0x468   :  { %v5222_v42 = vpop.f32.mrf.mxu3  ;;  %v5224_v36 = vadd.f32 %v2590_v37, %v2315_v1 }
 0x469   :  { %v2602_v53 = vpop.f32.mrf.mxu1 }
 0x46a   :  { %v2603_v22 = vadd.f32 %v2602_v53, %v5146_v21 }
 0x46c   :  { %2958 = vmatmul.bf16.vlgmr.msrb.gmra.mxu1 %v4911_v39  ;;  %v5237_v39 = vpop.f32.mrf.mxu2 }
 0x46f   :  { %v2910_v14 = vpop.f32.mrf.mxu0 }
 0x470   :  { %v2861_v20 = vpop.f32.mrf.mxu3  ;;  %v3000_v63 = vadd.f32 %v2910_v14, %v2603_v22 }
 0x471   :  { %v2999_v34 = vadd.f32 %v2861_v20, %v5119_v60  ;;  %v2604_v10 = vpop.f32.mrf.mxu1 }
 0x472   :  { %v3089_v6 = vadd.f32 %v5228_v9, %v3000_v63  ;;  %v2605_v21 = vadd.f32 %v2604_v10, %v5155_v57 }
 0x473   :  { %v3052_v19 = vadd.f32 %v5230_v40, %v2999_v34 }
 0x474   :  { %v3105_v25 = vmul.f32 0.0, %v3089_v6  ;;  %v5247_v57 = vpop.f32.mrf.mxu2 }
 0x476   :  { %v5235_v54 = vadd.f32 %v3105_v25, %v3052_v19 }
 0x477   :  { %v2912_v26 = vpop.f32.mrf.mxu0 }
 0x478   :  { %v2863_v1 = vpop.f32.mrf.mxu3  ;;  %v3003_v53 = vadd.f32 %v2912_v26, %v2605_v21 }
 0x479   :  { %v3002_v37 = vadd.f32 %v2863_v1, %v5124_v30  ;;  %v2607_v22 = vpop.f32.mrf.mxu1 }
 0x47a   :  { %v3090_v20 = vadd.f32 %v5228_v9, %v3003_v53  ;;  %v2608_v34 = vadd.f32 %v2607_v22, %v5166_v46 }
 0x47b   :  { %v3053_v60 = vadd.f32 %v5230_v40, %v3002_v37 }
 0x47c   :  { %2963 = vmatmul.bf16.gmra.mxu1 %v4919_v18 }
 0x47d   :  { %v3069_v14 = vmul.f32 0.0, %v3053_v60 }
 0x47f   :  { %v5244_v63 = vadd.f32 %v3090_v20, %v3069_v14  ;;  %v2915_v6 = vpop.f32.mrf.mxu0 }
 0x480   :  { %v2866_v19 = vpop.f32.mrf.mxu3  ;;  %v3006_v30 = vadd.f32 %v2915_v6, %v2608_v34 }
 0x481   :  { %v3005_v10 = vadd.f32 %v2866_v19, %v5131_v31  ;;  %v2609_v25 = vpop.f32.mrf.mxu1  ;;  %v5257_v31 = vpop.f32.mrf.mxu2 }
 0x482   :  { %v3091_v18 = vadd.f32 %v5228_v9, %v3006_v30  ;;  %v2610_v1 = vadd.f32 %v2609_v25, %v5176_v7 }
 0x483   :  { %v3054_v21 = vadd.f32 %v5230_v40, %v3005_v10 }
 0x485   :  { %v3070_v26 = vmul.f32 0.0, %v3054_v21 }
 0x487   :  { %v5253_v37 = vadd.f32 %v3091_v18, %v3070_v26  ;;  %v2917_v53 = vpop.f32.mrf.mxu0 }
 0x488   :  { %v2868_v60 = vpop.f32.mrf.mxu3  ;;  %v3009_v46 = vadd.f32 %v2917_v53, %v2610_v1 }
 0x489   :  { %v3008_v22 = vadd.f32 %v2868_v60, %v5136_v0  ;;  %v2612_v14 = vpop.f32.mrf.mxu1  ;;  %v5267_v60 = vpop.f32.mrf.mxu2 }
 0x48a   :  { %v3092_v20 = vadd.f32 %v5228_v9, %v3009_v46  ;;  %v2613_v7 = vadd.f32 %v2612_v14, %v5185_v17 }
 0x48b   :  { %v3055_v34 = vadd.f32 %v5230_v40, %v3008_v22 }
 0x48c   :  { %v3108_v6 = vmul.f32 0.0, %v3092_v20  ;;  %2968 = vmatmul.bf16.gmra.mxu1 %v4927_v2 }
 0x48d   :  { %v3071_v19 = vmul.f32 0.0, %v3055_v34 }
 0x48f   :  { %v5262_v10 = vadd.f32 %v3108_v6, %v3071_v19  ;;  %v2920_v30 = vpop.f32.mrf.mxu0 }
 0x490   :  { %v2871_v25 = vpop.f32.mrf.mxu3  ;;  %v3012_v21 = vadd.f32 %v2920_v30, %v2613_v7 }
 0x491   :  { %v3011_v0 = vadd.f32 %v2871_v25, %v5143_v13  ;;  %v2614_v26 = vpop.f32.mrf.mxu1 }
 0x492   :  { %v3093_v18 = vadd.f32 %v5228_v9, %v3012_v21  ;;  %v2615_v2 = vadd.f32 %v2614_v26, %v5192_v48  ;;  %v5277_v21 = vpop.f32.mrf.mxu2 }
 0x493   :  { %v3056_v1 = vadd.f32 %v5230_v40, %v3011_v0 }
 0x494   :  { %v3109_v53 = vmul.f32 0.0, %v3093_v18 }
 0x495   :  { %v3072_v46 = vmul.f32 0.0, %v3056_v1 }
 0x497   :  { %v5270_v22 = vadd.f32 %v3109_v53, %v3072_v46  ;;  %v2922_v17 = vpop.f32.mrf.mxu0 }
 0x498   :  { %v2873_v14 = vpop.f32.mrf.mxu3  ;;  %v3015_v20 = vadd.f32 %v2922_v17, %v2615_v2 }
 0x499   :  { %v3014_v34 = vadd.f32 %v2873_v14, %v5150_v4  ;;  %v2617_v6 = vpop.f32.mrf.mxu1 }
 0x49a   :  { %v3094_v13 = vadd.f32 %v5228_v9, %v3015_v20  ;;  %v2618_v25 = vadd.f32 %v2617_v6, %v5205_v5  ;;  %v5287_v6 = vpop.f32.mrf.mxu2 }
 0x49b   :  { %v3057_v19 = vadd.f32 %v5230_v40, %v3014_v34 }
 0x49c   :  { %v3110_v7 = vmul.f32 0.0, %v3094_v13  ;;  %2973 = vmatmul.bf16.gmra.mxu1 %v4941_v55 }
 0x49d   :  { %v3073_v30 = vmul.f32 0.0, %v3057_v19 }
 0x49f   :  { %v5279_v48 = vadd.f32 %v3110_v7, %v3073_v30  ;;  %v2925_v0 = vpop.f32.mrf.mxu0 }
 0x4a0   :  { %v2876_v26 = vpop.f32.mrf.mxu3  ;;  %v3018_v18 = vadd.f32 %v2925_v0, %v2618_v25 }
 0x4a1   :  { %v3017_v4 = vadd.f32 %v2876_v26, %v5159_v8  ;;  %v2619_v1 = vpop.f32.mrf.mxu1 }
 0x4a2   :  { %v3095_v53 = vadd.f32 %v5228_v9, %v3018_v18  ;;  %v2620_v55 = vadd.f32 %v2619_v1, %v5212_v16 }
 0x4a3   :  { %v3058_v46 = vadd.f32 %v5230_v40, %v3017_v4 }
 0x4a4   :  { %v3111_v2 = vmul.f32 0.0, %v3095_v53 }
 0x4a5   :  { %v3074_v17 = vmul.f32 0.0, %v3058_v46  ;;  %v5298_v46 = vpop.f32.mrf.mxu2 }
 0x4a7   :  { %v5285_v14 = vadd.f32 %v3111_v2, %v3074_v17  ;;  %v2927_v5 = vpop.f32.mrf.mxu0 }
 0x4a8   :  { %v2878_v20 = vpop.f32.mrf.mxu3  ;;  %v3021_v34 = vadd.f32 %v2927_v5, %v2620_v55 }
 0x4a9   :  { %v3020_v13 = vadd.f32 %v2878_v20, %v5164_v43  ;;  %v2622_v19 = vpop.f32.mrf.mxu1 }
 0x4aa   :  { %v3096_v8 = vadd.f32 %v5228_v9, %v3021_v34  ;;  %v2623_v16 = vadd.f32 %v2622_v19, %v5237_v39 }
 0x4ab   :  { %v3059_v7 = vadd.f32 %v5230_v40, %v3020_v13 }
 0x4ac   :  { %v3112_v30 = vmul.f32 0.0, %v3096_v8  ;;  %2978 = vmatmul.bf16.gmra.mxu1 %v4956_v3 }
 0x4ad   :  { %v3075_v25 = vmul.f32 0.0, %v3059_v7 }
 0x4af   :  { %v5294_v0 = vadd.f32 %v3112_v30, %v3075_v25  ;;  %v2930_v26 = vpop.f32.mrf.mxu0  ;;  %v5308_v30 = vpop.f32.mrf.mxu2 }
 0x4b0   :  { %v2881_v18 = vpop.f32.mrf.mxu3  ;;  %v3024_v4 = vadd.f32 %v2930_v26, %v2623_v16 }
 0x4b1   :  { %v3023_v1 = vadd.f32 %v2881_v18, %v5173_v61  ;;  %v2624_v53 = vpop.f32.mrf.mxu1 }
 0x4b2   :  { %v3097_v43 = vadd.f32 %v5228_v9, %v3024_v4  ;;  %v2625_v3 = vadd.f32 %v2624_v53, %v5247_v57 }
 0x4b3   :  { %v3060_v2 = vadd.f32 %v5230_v40, %v3023_v1 }
 0x4b4   :  { %v3113_v17 = vmul.f32 0.0, %v3097_v43 }
 0x4b5   :  { %v3076_v55 = vmul.f32 0.0, %v3060_v2 }
 0x4b7   :  { %v5302_v5 = vadd.f32 %v3113_v17, %v3076_v55  ;;  %v2932_v39 = vpop.f32.mrf.mxu0  ;;  %v2651_v55 = vpop.f32.mrf.mxu2 }
 0x4b8   :  { %v2883_v20 = vpop.f32.mrf.mxu3  ;;  %v3027_v34 = vadd.f32 %v2932_v39, %v2625_v3 }
 0x4b9   :  { %v3026_v13 = vadd.f32 %v2883_v20, %v5180_v44  ;;  %v2627_v19 = vpop.f32.mrf.mxu1 }
 0x4ba   :  { %v3098_v61 = vadd.f32 %v5228_v9, %v3027_v34  ;;  %v2628_v57 = vadd.f32 %v2627_v19, %v5257_v31 }
 0x4bb   :  { %v3061_v8 = vadd.f32 %v5230_v40, %v3026_v13 }
 0x4bc   :  { %v3114_v7 = vmul.f32 0.0, %v3098_v61  ;;  %2983 = vmatmul.bf16.gmra.mxu1 %v4971_v35 }
 0x4bd   :  { %v3077_v25 = vmul.f32 0.0, %v3061_v8 }
 0x4bf   :  { %v5311_v16 = vadd.f32 %v3114_v7, %v3077_v25  ;;  %v2935_v26 = vpop.f32.mrf.mxu0 }
 0x4c0   :  { %v2886_v18 = vpop.f32.mrf.mxu3  ;;  %v3030_v4 = vadd.f32 %v2935_v26, %v2628_v57 }
 0x4c1   :  { %v3029_v44 = vadd.f32 %v2886_v18, %v5189_v52  ;;  %v2629_v1 = vpop.f32.mrf.mxu1  ;;  %v2653_v18 = vpop.f32.mrf.mxu2 }
 0x4c2   :  { %v3099_v53 = vadd.f32 %v5228_v9, %v3030_v4  ;;  %v2630_v35 = vadd.f32 %v2629_v1, %v5267_v60 }
 0x4c3   :  { %v3062_v43 = vadd.f32 %v5230_v40, %v3029_v44 }
 0x4c4   :  { %v3115_v2 = vmul.f32 0.0, %v3099_v53 }
 0x4c5   :  { %v3078_v17 = vmul.f32 0.0, %v3062_v43 }
 0x4c7   :  { %v5317_v3 = vadd.f32 %v3115_v2, %v3078_v17  ;;  %v2937_v31 = vpop.f32.mrf.mxu0 }
 0x4c8   :  { %v2888_v39 = vpop.f32.mrf.mxu3  ;;  %v3033_v20 = vadd.f32 %v2937_v31, %v2630_v35 }
 0x4c9   :  { %v3032_v34 = vadd.f32 %v2888_v39, %v5196_v45  ;;  %v2632_v13 = vpop.f32.mrf.mxu1 }
 0x4ca   :  { %v3100_v52 = vadd.f32 %v5228_v9, %v3033_v20  ;;  %v2633_v7 = vadd.f32 %v2632_v13, %v5277_v21 }
 0x4cb   :  { %v3063_v19 = vadd.f32 %v5230_v40, %v3032_v34 }
 0x4cc   :  { %v3116_v61 = vmul.f32 0.0, %v3100_v52  ;;  %2988 = vmatmul.bf16.gmra.mxu1 %v4984_v23 }
 0x4cd   :  { %v3079_v8 = vmul.f32 0.0, %v3063_v19 }
 0x4cf   :  { %v5324_v60 = vadd.f32 %v3116_v61, %v3079_v8  ;;  %v2940_v25 = vpop.f32.mrf.mxu0 }
 0x4d0   :  { %v2891_v57 = vpop.f32.mrf.mxu3  ;;  %v3036_v26 = vadd.f32 %v2940_v25, %v2633_v7 }
 0x4d1   :  { %v3035_v4 = vadd.f32 %v2891_v57, %v5203_v47  ;;  %v2634_v45 = vpop.f32.mrf.mxu1  ;;  %v2656_v47 = vpop.f32.mrf.mxu2 }
 0x4d2   :  { %v3101_v44 = vadd.f32 %v5228_v9, %v3036_v26  ;;  %v2635_v23 = vadd.f32 %v2634_v45, %v5287_v6 }
 0x4d3   :  { %v3064_v1 = vadd.f32 %v5230_v40, %v3035_v4 }
 0x4d4   :  { %v3117_v53 = vmul.f32 0.0, %v3101_v44 }
 0x4d5   :  { %v3080_v43 = vmul.f32 0.0, %v3064_v1 }
 0x4d7   :  { %v5330_v2 = vadd.f32 %v3117_v53, %v3080_v43  ;;  %v2942_v21 = vpop.f32.mrf.mxu0  ;;  %v2652_v53 = vadd.f32 %v2651_v55, %v5117_v28  ;;  %v2654_v28 = vadd.f32 %v2653_v18, %v5122_v41 }
 0x4d8   :  { %v2893_v17 = vpop.f32.mrf.mxu3  ;;  %v3039_v35 = vadd.f32 %v2942_v21, %v2635_v23 }
 0x4d9   :  { %v3038_v31 = vadd.f32 %v2893_v17, %v5210_v38  ;;  %v2637_v39 = vpop.f32.mrf.mxu1  ;;  %v2658_v45 = vpop.f32.mrf.mxu2 }
 0x4da   :  { %v3102_v20 = vadd.f32 %v5228_v9, %v3039_v35  ;;  %v2638_v19 = vadd.f32 %v2637_v39, %v5298_v46  ;;  %v2659_v18 = vadd.f32 %v2658_v45, %v5134_v32 }
 0x4db   :  { %v3065_v34 = vadd.f32 %v5230_v40, %v3038_v31  ;;  %v5348_v31 = vld [vmem:[#allocation7 + $0x5] ss:$0 sm:$0xff] }
 0x4dc   :  { %v3118_v13 = vmul.f32 0.0, %v3102_v20  ;;  %2993 = vmatmul.bf16.gmra.mxu1 %v4992_v29 }
 0x4dd   :  { %v3081_v52 = vmul.f32 0.0, %v3065_v34 }
 0x4df   :  { %v5337_v6 = vadd.f32 %v3118_v13, %v3081_v52  ;;  %v2945_v61 = vpop.f32.mrf.mxu0 }
 0x4e0   :  { %v2896_v8 = vpop.f32.mrf.mxu3  ;;  %v3042_v7 = vadd.f32 %v2945_v61, %v2638_v19 }
 0x4e1   :  { %v3041_v25 = vadd.f32 %v2896_v8, %v5219_v49  ;;  %v2639_v38 = vpop.f32.mrf.mxu1  ;;  %v2661_v13 = vpop.f32.mrf.mxu2 }
 0x4e2   :  { %v3103_v57 = vadd.f32 %v5228_v9, %v3042_v7  ;;  %v2640_v29 = vadd.f32 %v2639_v38, %v5308_v30  ;;  %v2657_v7 = vadd.f32 %v2656_v47, %v5129_v15  ;;  %v2662_v47 = vadd.f32 %v2661_v13, %v5141_v33 }
 0x4e3   :  { %v3066_v26 = vadd.f32 %v5230_v40, %v3041_v25 }
 0x4e4   :  { %v3119_v4 = vmul.f32 0.0, %v3103_v57 }
 0x4e5   :  { %v3082_v44 = vmul.f32 0.0, %v3066_v26 }
 0x4e7   :  { %v5343_v1 = vadd.f32 %v3119_v4, %v3082_v44  ;;  %v2947_v46 = vpop.f32.mrf.mxu0 }
 0x4e8   :  { %v2898_v43 = vpop.f32.mrf.mxu3  ;;  %v3045_v23 = vadd.f32 %v2947_v46, %v2640_v29 }
 0x4e9   :  { %v3044_v21 = vadd.f32 %v2898_v43, %v5224_v36  ;;  %v2959_v49 = vpop.f32.mrf.mxu1  ;;  %v2663_v25 = vpop.f32.mrf.mxu2 }
 0x4ea   :  { %v3104_v17 = vadd.f32 %v5228_v9, %v3045_v23  ;;  %v3001_v35 = vadd.f32 %v2959_v49, %v2652_v53  ;;  %v2664_v45 = vadd.f32 %v2663_v25, %v5148_v11 }
 0x4eb   :  { %v3067_v39 = vadd.f32 %v5230_v40, %v3044_v21 }
 0x4ec   :  { %v3120_v20 = vmul.f32 0.0, %v3104_v17  ;;  %v3142_v30 = vadd.f32 %v5348_v31, %v3001_v35 }
 0x4ed   :  { %v3083_v34 = vmul.f32 0.0, %v3067_v39 }
 0x4ee   :  { %v3158_v19 = vmul.f32 0.0, %v3142_v30 }
 0x4ef   :  { %v5352_v52 = vadd.f32 %v3120_v20, %v3083_v34 }
 0x4f0   :  { %v3174_v9 = vadd.f32 %v3158_v19, %v5235_v54 }
 0x4f1   :  { %v2961_v55 = vpop.f32.mrf.mxu1  ;;  %v2666_v54 = vpop.f32.mrf.mxu2 }
 0x4f2   :  { %v3004_v36 = vadd.f32 %v2961_v55, %v2654_v28  ;;  %v3190_v57 = vmax.f32 %v3174_v9, 0.0  ;;  %v2667_v13 = vadd.f32 %v2666_v54, %v5157_v59 }
 0x4f4   :  { %v3143_v61 = vadd.f32 %v5348_v31, %v3004_v36 }
 0x4f6   :  { %v3159_v8 = vmul.f32 0.0, %v3143_v61 }
 0x4f8   :  { %v3175_v40 = vadd.f32 %v3159_v8, %v5244_v63 }
 0x4f9   :  { %v2964_v38 = vpop.f32.mrf.mxu1  ;;  %v2668_v39 = vpop.f32.mrf.mxu2 }
 0x4fa   :  { %v3191_v26 = vmax.f32 %v3175_v40, 0.0  ;;  %v3007_v4 = vadd.f32 %v2964_v38, %v2657_v7  ;;  %v2669_v7 = vadd.f32 %v2668_v39, %v5162_v62 }
 0x4fc   :  { %v4117_v44 = vpack.c.bf16 %v3191_v26, %v3190_v57  ;;  %v3144_v41 = vadd.f32 %v5348_v31, %v3007_v4 }
 0x4fe   :  { %4118 = vst [vmem:[#allocation8] sm:$0xff] %v4117_v44   ;;  %v3160_v29 = vmul.f32 0.0, %v3144_v41 }
 0x500   :  { %v3176_v43 = vadd.f32 %v3160_v29, %v5253_v37 }
 0x501   :  { %v2966_v46 = vpop.f32.mrf.mxu1  ;;  %v2671_v33 = vpop.f32.mrf.mxu2 }
 0x502   :  { %v3010_v53 = vadd.f32 %v2966_v46, %v2659_v18  ;;  %v3192_v23 = vmax.f32 %v3176_v43, 0.0 }
 0x504   :  { %v3145_v15 = vadd.f32 %v5348_v31, %v3010_v53 }
 0x506   :  { %v3177_v63 = vadd.f32 %v3145_v15, %v5262_v10 }
 0x508   :  { %v3193_v21 = vmax.f32 %v3177_v63, 0.0 }
 0x509   :  { %v2969_v49 = vpop.f32.mrf.mxu1  ;;  %v2673_v40 = vpop.f32.mrf.mxu2 }
 0x50a   :  { %v4122_v17 = vpack.c.bf16 %v3193_v21, %v3192_v23  ;;  %v3013_v35 = vadd.f32 %v2969_v49, %v2662_v47  ;;  %v2674_v54 = vadd.f32 %v2673_v40, %v5178_v24 }
 0x50c   :  { %4154 = vst [vmem:[#allocation8 + $0x8] sm:$0xff] %v4122_v17   ;;  %v3146_v32 = vadd.f32 %v5348_v31, %v3013_v35 }
 0x50e   :  { %v3162_v34 = vmul.f32 0.0, %v3146_v32 }
 0x510   :  { %v3178_v10 = vadd.f32 %v3162_v34, %v5270_v22 }
 0x511   :  { %v2971_v20 = vpop.f32.mrf.mxu1  ;;  %v2676_v46 = vpop.f32.mrf.mxu2 }
 0x512   :  { %v3016_v37 = vadd.f32 %v2971_v20, %v2664_v45  ;;  %v3194_v36 = vmax.f32 %v3178_v10, 0.0  ;;  %v2677_v23 = vadd.f32 %v2676_v46, %v5187_v12 }
 0x514   :  { %v3147_v30 = vadd.f32 %v5348_v31, %v3016_v37 }
 0x516   :  { %v3163_v28 = vmul.f32 0.0, %v3147_v30 }
 0x518   :  { %v3179_v55 = vadd.f32 %v3163_v28, %v5279_v48  ;;  %v2672_v48 = vadd.f32 %v2671_v33, %v5171_v58 }
 0x519   :  { %v2974_v19 = vpop.f32.mrf.mxu1  ;;  %v2678_v47 = vpop.f32.mrf.mxu2 }
 0x51a   :  { %v3195_v61 = vmax.f32 %v3179_v55, 0.0  ;;  %v3019_v9 = vadd.f32 %v2974_v19, %v2667_v13  ;;  %v2679_v20 = vadd.f32 %v2678_v47, %v5194_v27 }
 0x51c   :  { %v4127_v8 = vpack.c.bf16 %v3195_v61, %v3194_v36  ;;  %v3148_v11 = vadd.f32 %v5348_v31, %v3019_v9 }
 0x51e   :  { %4155 = vst [vmem:[#allocation8 + $0x10] sm:$0xff] %v4127_v8   ;;  %v3164_v38 = vmul.f32 0.0, %v3148_v11 }
 0x520   :  { %v3180_v59 = vadd.f32 %v3164_v38, %v5285_v14 }
 0x521   :  { %v2976_v25 = vpop.f32.mrf.mxu1  ;;  %v2681_v45 = vpop.f32.mrf.mxu2 }
 0x522   :  { %v3022_v22 = vadd.f32 %v2976_v25, %v2669_v7  ;;  %v3196_v41 = vmax.f32 %v3180_v59, 0.0 }
 0x524   :  { %v3149_v57 = vadd.f32 %v5348_v31, %v3022_v22 }
 0x526   :  { %v3165_v26 = vmul.f32 0.0, %v3149_v57 }
 0x528   :  { %v3181_v4 = vadd.f32 %v3165_v26, %v5294_v0 }
 0x529   :  { %v2979_v44 = vpop.f32.mrf.mxu1  ;;  %v2683_v33 = vpop.f32.mrf.mxu2 }
 0x52a   :  { %v3197_v18 = vmax.f32 %v3181_v4, 0.0  ;;  %v3025_v29 = vadd.f32 %v2979_v44, %v2672_v48  ;;  %v2684_v9 = vadd.f32 %v2683_v33, %v5208_v50 }
 0x52c   :  { %v4132_v53 = vpack.c.bf16 %v3197_v18, %v3196_v41  ;;  %v3150_v62 = vadd.f32 %v5348_v31, %v3025_v29 }
 0x52e   :  { %4156 = vst [vmem:[#allocation8 + $0x18] sm:$0xff] %v4132_v53   ;;  %v3166_v15 = vmul.f32 0.0, %v3150_v62 }
 0x530   :  { %v3182_v58 = vadd.f32 %v3166_v15, %v5302_v5 }
 0x531   :  { %v2981_v43 = vpop.f32.mrf.mxu1 }
 0x532   :  { %v3028_v63 = vadd.f32 %v2981_v43, %v2674_v54  ;;  %v3198_v17 = vmax.f32 %v3182_v58, 0.0 }
 0x534   :  { %v3151_v14 = vadd.f32 %v5348_v31, %v3028_v63 }
 0x536   :  { %v3167_v0 = vmul.f32 0.0, %v3151_v14 }
 0x538   :  { %v3183_v21 = vadd.f32 %v3167_v0, %v5311_v16  ;;  %v2682_v16 = vadd.f32 %v2681_v45, %v5201_v56 }
 0x539   :  { %v2984_v49 = vpop.f32.mrf.mxu1 }
 0x53a   :  { %v3199_v35 = vmax.f32 %v3183_v21, 0.0  ;;  %v3031_v39 = vadd.f32 %v2984_v49, %v2677_v23 }
 0x53c   :  { %v4137_v32 = vpack.c.bf16 %v3199_v35, %v3198_v17  ;;  %v3152_v24 = vadd.f32 %v5348_v31, %v3031_v39 }
 0x53e   :  { %4157 = vst [vmem:[#allocation8 + $0x20] sm:$0xff] %v4137_v32   ;;  %v3168_v37 = vmul.f32 0.0, %v3152_v24 }
 0x540   :  { %v3184_v12 = vadd.f32 %v3168_v37, %v5317_v3  ;;  %v2686_v3 = vpop.f32.mrf.mxu2 }
 0x541   :  { %v2986_v34 = vpop.f32.mrf.mxu1  ;;  %v2687_v25 = vadd.f32 %v2686_v3, %v5217_v51 }
 0x542   :  { %v3034_v30 = vadd.f32 %v2986_v34, %v2679_v20  ;;  %v3200_v55 = vmax.f32 %v3184_v12, 0.0 }
 0x544   :  { %v3153_v5 = vadd.f32 %v5348_v31, %v3034_v30 }
 0x546   :  { %v3169_v10 = vmul.f32 0.0, %v3153_v5 }
 0x548   :  { %v3185_v28 = vadd.f32 %v3169_v10, %v5324_v60  ;;  %v2688_v4 = vpop.f32.mrf.mxu2 }
 0x549   :  { %v2989_v13 = vpop.f32.mrf.mxu1  ;;  %v2689_v44 = vadd.f32 %v2688_v4, %v5222_v42 }
 0x54a   :  { %v3201_v19 = vmax.f32 %v3185_v28, 0.0  ;;  %v3037_v36 = vadd.f32 %v2989_v13, %v2682_v16 }
 0x54c   :  { %v4142_v61 = vpack.c.bf16 %v3201_v19, %v3200_v55  ;;  %v3154_v27 = vadd.f32 %v5348_v31, %v3037_v36 }
 0x54e   :  { %4158 = vst [vmem:[#allocation8 + $0x28] sm:$0xff] %v4142_v61   ;;  %v3170_v11 = vmul.f32 0.0, %v3154_v27 }
 0x550   :  { %v3186_v56 = vadd.f32 %v3170_v11, %v5330_v2 }
 0x551   :  { %v2991_v8 = vpop.f32.mrf.mxu1 }
 0x552   :  { %v3040_v7 = vadd.f32 %v2991_v8, %v2684_v9  ;;  %v3202_v57 = vmax.f32 %v3186_v56, 0.0 }
 0x554   :  { %v3155_v40 = vadd.f32 %v5348_v31, %v3040_v7 }
 0x556   :  { %v3171_v60 = vmul.f32 0.0, %v3155_v40 }
 0x558   :  { %v3187_v38 = vadd.f32 %v3171_v60, %v5337_v6 }
 0x559   :  { %v2994_v22 = vpop.f32.mrf.mxu1 }
 0x55a   :  { %v3203_v59 = vmax.f32 %v3187_v38, 0.0  ;;  %v3043_v26 = vadd.f32 %v2994_v22, %v2687_v25 }
 0x55c   :  { %v4147_v48 = vpack.c.bf16 %v3203_v59, %v3202_v57  ;;  %v3156_v50 = vadd.f32 %v5348_v31, %v3043_v26 }
 0x55e   :  { %4159 = vst [vmem:[#allocation8 + $0x30] sm:$0xff] %v4147_v48   ;;  %v3172_v18 = vmul.f32 0.0, %v3156_v50 }
 0x560   :  { %v3188_v51 = vadd.f32 %v3172_v18, %v5343_v1 }
 0x561   :  { %v2996_v41 = vpop.f32.mrf.mxu1 }
 0x562   :  { %v3046_v29 = vadd.f32 %v2996_v41, %v2689_v44  ;;  %v3204_v53 = vmax.f32 %v3188_v51, 0.0 }
 0x564   :  { %v3157_v2 = vadd.f32 %v5348_v31, %v3046_v29 }
 0x566   :  { %v3173_v46 = vmul.f32 0.0, %v3157_v2 }
 0x568   :  { %v3189_v6 = vadd.f32 %v3173_v46, %v5352_v52 }
 0x56a   :  { %v3205_v62 = vmax.f32 %v3189_v6, 0.0 }
 0x56c   :  { %v4152_v54 = vpack.c.bf16 %v3205_v62, %v3204_v53 }
 0x56e   :  { %4160 = vst [vmem:[#allocation8 + $0x38] sm:$0xff] %v4152_v54  }
 0x56f   :  { %3250 = dma.vmem_to_hbm [thread:$0]  %s3243_s27, 1024, %s3245_s29, [#allocation4], %s4332_s30, %s4332_s30, %s4333_s6  }
 0x570   :  { %4326 = dma.done.wait [#allocation4], 1024  }
 0x571   :  { %4327 = vsyncadd [#allocation4], 4294966272 }
 0x572   :  { %3255 = vsyncpa [#allocation3], 1 }
 0x573   :  { %3256 = vsyncpa [#allocation6], 1 }
 0x574   :  { %3257 = vsyncpa [#allocation4], 1 }

</bundles_post_ra>
